<compile_context>
chip_gen: v5e
topology: v5e:2x2
jax: 0.10.0
libtpu: 0.0.40
codegen_flags: <defaults>
</compile_context>

<pallas_src>
import math
from functools import partial

import jax
import jax.numpy as jnp
from jax.experimental import pallas as pl
from jax.experimental.pallas import tpu as pltpu


SOFTMAX_APPROX_RECIP = True   # set False for tight numerical-parity runs


# ------------------------------ helpers --------------------------------------

def _cparams(*sem):
    return pltpu.CompilerParams(
        dimension_semantics=sem,
        vmem_limit_bytes=64 * 1024 * 1024,
    )


def _layernorm(x, g, b, eps):
    mu = jnp.mean(x, axis=-1, keepdims=True)
    var = jnp.mean(jnp.square(x - mu), axis=-1, keepdims=True)
    return (x - mu) * jax.lax.rsqrt(var + eps) * g + b


# ------------------------- patch-embed linear kernel -------------------------

def _linear_kernel(x_ref, w_ref, b_ref, o_ref):
    o_ref[...] = (
        jnp.dot(x_ref[...].astype(jnp.bfloat16), w_ref[...],
                preferred_element_type=jnp.float32)
        + b_ref[...]
    )


def linear_rows(x2d, w_bf16, b_f32):
    M, K = x2d.shape
    N = w_bf16.shape[1]
    # large row tiles; pad M up instead of falling back to tiny divisor tiles
    tm = M if M <= 1024 else 512
    Mp = -(-M // tm) * tm
    if Mp != M:
        x2d = jnp.pad(x2d, ((0, Mp - M), (0, 0)))
    out = pl.pallas_call(
        _linear_kernel,
        out_shape=jax.ShapeDtypeStruct((Mp, N), jnp.float32),
        grid=(Mp // tm,),
        in_specs=[
            pl.BlockSpec((tm, K), lambda i: (i, 0)),
            pl.BlockSpec((K, N), lambda i: (0, 0)),
            pl.BlockSpec((1, N), lambda i: (0, 0)),
        ],
        out_specs=pl.BlockSpec((tm, N), lambda i: (i, 0)),
        compiler_params=_cparams("parallel"),
    )(x2d, w_bf16, b_f32.reshape(1, N))
    return out[:M] if Mp != M else out


# --------------- fused transformer block kernel (attn + MLP) -----------------

def _block_kernel(x_ref, g1_ref, b1_ref, wqkv_ref, bqkv_ref, wp_ref, bp_ref,
                  g2_ref, b2_ref, w1_ref, bb1_ref, w2_ref, bb2_ref, o_ref,
                  *, num_heads, scale, n_real, eps):
    x = x_ref[0]                                   # (Np, E) f32 residual input
    Np, E = x.shape
    hd = E // num_heads

    # --- LayerNorm1 + fused QKV projection (bf16 MXU, f32 accumulation) ------
    h = _layernorm(x, g1_ref[...], b1_ref[...], eps)
    qkv = (jnp.dot(h.astype(jnp.bfloat16), wqkv_ref[...],
                   preferred_element_type=jnp.float32)
           + bqkv_ref[...])                        # (Np, 3E) = [q | k | v]

    q_bf = (qkv[:, :E] * scale).astype(jnp.bfloat16)          # pre-scaled q
    kT_bf = jnp.transpose(qkv[:, E:2 * E]).astype(jnp.bfloat16)  # (E, Np) once
    v_bf = qkv[:, 2 * E:].astype(jnp.bfloat16)

    # (1, Np) additive key mask (broadcast over query rows) for padded tokens
    if n_real < Np:
        key_ids = jax.lax.broadcasted_iota(jnp.int32, (1, Np), 1)
        kmask = jnp.where(key_ids < n_real, 0.0, -1e30).astype(jnp.float32)
    else:
        kmask = None

    # Per-head attention; contexts stay in registers and are assembled once.
    # TODO(synk): for large head counts (>=12) switch to a fori_loop + VMEM
    # staging to bound live ranges (vreg pressure on v5e).
    ctx_parts = []
    for hh in range(num_heads):
        lo, hi = hh * hd, (hh + 1) * hd
        s = jnp.dot(q_bf[:, lo:hi], kT_bf[lo:hi, :],
                    preferred_element_type=jnp.float32)        # (Np, Np)
        if kmask is not None:
            s = s + kmask
        m = jnp.max(s, axis=-1, keepdims=True)
        p = jnp.exp(s - m)
        p = p * pl.reciprocal(jnp.sum(p, axis=-1, keepdims=True),
                              approx=SOFTMAX_APPROX_RECIP)
        ctx_parts.append(jnp.dot(p.astype(jnp.bfloat16), v_bf[:, lo:hi],
                                 preferred_element_type=jnp.float32))
    ctx = jnp.concatenate(ctx_parts, axis=-1).astype(jnp.bfloat16)  # (Np, E)

    attn_out = (jnp.dot(ctx, wp_ref[...], preferred_element_type=jnp.float32)
                + bp_ref[...])
    x1 = x + attn_out                               # residual 1

    # --- LayerNorm2 + MLP ------------------------------------------------------
    h2 = _layernorm(x1, g2_ref[...], b2_ref[...], eps)
    h1 = (jnp.dot(h2.astype(jnp.bfloat16), w1_ref[...],
                  preferred_element_type=jnp.float32) + bb1_ref[...])
    # exact (erf) GELU, matching PyTorch nn.GELU default
    h1 = 0.5 * h1 * (1.0 + jax.lax.erf(h1 * (1.0 / math.sqrt(2.0))))
    mlp_out = (jnp.dot(h1.astype(jnp.bfloat16), w2_ref[...],
                       preferred_element_type=jnp.float32) + bb2_ref[...])

    o_ref[0] = x1 + mlp_out                         # residual 2


def transformer_block(x, blk, *, num_heads, scale, n_real, eps=1e-6):
    B, Np, E = x.shape
    H = blk["w1"].shape[1]
    kern = partial(_block_kernel, num_heads=num_heads, scale=scale,
                   n_real=n_real, eps=eps)
    full = lambda b: (0, 0)
    return pl.pallas_call(
        kern,
        out_shape=jax.ShapeDtypeStruct((B, Np, E), jnp.float32),
        grid=(B,),
        in_specs=[
            pl.BlockSpec((1, Np, E), lambda b: (b, 0, 0)),
            pl.BlockSpec((1, E), full),            # ln1 gamma
            pl.BlockSpec((1, E), full),            # ln1 beta
            pl.BlockSpec((E, 3 * E), full),        # wqkv
            pl.BlockSpec((1, 3 * E), full),        # bqkv
            pl.BlockSpec((E, E), full),            # wproj
            pl.BlockSpec((1, E), full),            # bproj
            pl.BlockSpec((1, E), full),            # ln2 gamma
            pl.BlockSpec((1, E), full),            # ln2 beta
            pl.BlockSpec((E, H), full),            # w1
            pl.BlockSpec((1, H), full),            # b1
            pl.BlockSpec((H, E), full),            # w2
            pl.BlockSpec((1, E), full),            # b2
        ],
        out_specs=pl.BlockSpec((1, Np, E), lambda b: (b, 0, 0)),
        compiler_params=_cparams("parallel"),       # megacore across batch
    )(x,
      blk["ln1_g"].reshape(1, E), blk["ln1_b"].reshape(1, E),
      blk["wqkv"], blk["bqkv"].reshape(1, 3 * E),
      blk["wproj"], blk["bproj"].reshape(1, E),
      blk["ln2_g"].reshape(1, E), blk["ln2_b"].reshape(1, E),
      blk["w1"], blk["b1"].reshape(1, H),
      blk["w2"], blk["b2"].reshape(1, E))


# ------------- fused final LayerNorm + classifier head (cls rows only) -------

def _head_kernel(x_ref, g_ref, b_ref, w_ref, bh_ref, o_ref, *, eps):
    h = _layernorm(x_ref[...], g_ref[...], b_ref[...], eps)
    o_ref[...] = (jnp.dot(h.astype(jnp.bfloat16), w_ref[...],
                          preferred_element_type=jnp.float32) + bh_ref[...])


def head_block(cls2d, ln_g, ln_b, w_head, b_head, *, eps=1e-6):
    B, E = cls2d.shape
    C = w_head.shape[1]
    Cp = -(-C // 128) * 128                         # lane-dense output slab
    if Cp != C:
        w_head = jnp.pad(w_head, ((0, 0), (0, Cp - C)))
        b_head = jnp.pad(b_head, (0, Cp - C))
    out = pl.pallas_call(
        partial(_head_kernel, eps=eps),
        out_shape=jax.ShapeDtypeStruct((B, Cp), jnp.float32),
        grid=(1,),
        in_specs=[
            pl.BlockSpec((B, E), lambda i: (0, 0)),
            pl.BlockSpec((1, E), lambda i: (0, 0)),
            pl.BlockSpec((1, E), lambda i: (0, 0)),
            pl.BlockSpec((E, Cp), lambda i: (0, 0)),
            pl.BlockSpec((1, Cp), lambda i: (0, 0)),
        ],
        out_specs=pl.BlockSpec((B, Cp), lambda i: (0, 0)),
        compiler_params=_cparams("arbitrary"),
    )(cls2d, ln_g.reshape(1, E), ln_b.reshape(1, E),
      w_head, b_head.reshape(1, Cp))
    return out[:, :C]


# ---------------------------- parameter setup --------------------------------

def init_params(key, cfg):
    E = cfg["embed"]
    p = cfg["patch"]
    in_c = cfg["in_c"]
    hidden = int(E * cfg["mlp_ratio"])
    n_patches = (cfg["img"] // p) ** 2

    def nrm(k, shape, std):
        return std * jax.random.normal(k, shape, dtype=jnp.float32)

    def nrm_bf16(k, shape, std):               # matmul weights stored in bf16
        return nrm(k, shape, std).astype(jnp.bfloat16)

    keys = jax.random.split(key, 4 + cfg["depth"])
    params = {
        # patch-embed conv (kernel==stride) folded into a matmul weight
        "w_patch": nrm_bf16(keys[0], (in_c * p * p, E), 0.02),
        "b_patch": jnp.zeros((E,), jnp.float32),
        "cls_token": nrm(keys[1], (1, 1, E), 0.02),
        "pos_embed": nrm(keys[2], (1, n_patches + 1, E), 0.02),
        "norm_g": jnp.ones((E,), jnp.float32),
        "norm_b": jnp.zeros((E,), jnp.float32),
        "w_head": nrm_bf16(keys[3], (E, cfg["num_classes"]), 0.01),
        "b_head": jnp.zeros((cfg["num_classes"],), jnp.float32),
        "blocks": [],
    }
    for d in range(cfg["depth"]):
        bk = jax.random.split(keys[4 + d], 4)
        params["blocks"].append({
            "ln1_g": jnp.ones((E,), jnp.float32),
            "ln1_b": jnp.zeros((E,), jnp.float32),
            "wqkv": nrm_bf16(bk[0], (E, 3 * E), 0.01),   # columns = [q | k | v]
            "bqkv": jnp.zeros((3 * E,), jnp.float32),
            "wproj": nrm_bf16(bk[1], (E, E), 0.01),
            "bproj": jnp.zeros((E,), jnp.float32),
            "ln2_g": jnp.ones((E,), jnp.float32),
            "ln2_b": jnp.zeros((E,), jnp.float32),
            "w1": nrm_bf16(bk[2], (E, hidden), 0.01),
            "b1": jnp.zeros((hidden,), jnp.float32),
            "w2": nrm_bf16(bk[3], (hidden, E), 0.01),
            "b2": jnp.zeros((E,), jnp.float32),
        })
    return params


# ------------------------------- forward -------------------------------------

def vit_forward(x_nchw, params, cfg):
    B, in_c, Himg, Wimg = x_nchw.shape
    p = cfg["patch"]
    E = cfg["embed"]
    Gh, Gw = Himg // p, Wimg // p
    n_patches = Gh * Gw

    # --- PatchEmbed: conv(kernel=stride=patch) == matmul over patch rows -----
    xp = x_nchw.reshape(B, in_c, Gh, p, Gw, p)
    xp = xp.transpose(0, 2, 4, 1, 3, 5).reshape(B * n_patches, in_c * p * p)
    tok = linear_rows(xp, params["w_patch"], params["b_patch"])
    tok = tok.reshape(B, n_patches, E)

    # --- cls token + positional embedding ------------------------------------
    cls = jnp.broadcast_to(params["cls_token"], (B, 1, E))
    x = jnp.concatenate([cls, tok], axis=1) + params["pos_embed"]
    n_real = n_patches + 1

    # pad sequence length to a multiple of 8 (sublane-aligned tiles);
    # padded key tokens are masked inside the attention kernel.
    n_pad = -(-n_real // 8) * 8
    if n_pad != n_real:
        x = jnp.pad(x, ((0, 0), (0, n_pad - n_real), (0, 0)))

    num_heads = cfg["heads"]
    scale = (E // num_heads) ** -0.5

    # --- transformer blocks (one fused pallas_call per block) ----------------
    # Residual stream kept f32 across HBM for parity with the PyTorch module.
    for blk in params["blocks"]:
        x = transformer_block(x, blk, num_heads=num_heads, scale=scale,
                              n_real=n_real)

    # --- final norm + head, applied only to the cls rows ----------------------
    cls_out = x[:, 0, :]                             # pre_logits = Identity
    logits = head_block(cls_out, params["norm_g"], params["norm_b"],
                        params["w_head"], params["b_head"])
    return logits


# --------------------------------- main ---------------------------------------

if __name__ == "__main__":
    # small config consistent with the module (embed_dim % num_heads == 0,
    # img_size % patch_size == 0); eval mode so dropout / drop-path are no-ops.
    cfg = dict(img=32, patch=4, in_c=1, embed=128, depth=2, heads=4,
               mlp_ratio=2, num_classes=10)

    key = jax.random.PRNGKey(0)
    k_param, k_x = jax.random.split(key)
    params = init_params(k_param, cfg)

    x = jax.random.normal(k_x, (2, cfg["in_c"], cfg["img"], cfg["img"]),
                          dtype=jnp.float32)         # NCHW, like PyTorch

    fwd = jax.jit(lambda xx, pp: vit_forward(xx, pp, cfg))
    logits = jax.block_until_ready(fwd(x, params))
    assert logits.shape == (2, cfg["num_classes"])
    assert bool(jnp.all(jnp.isfinite(logits)))
    print("KERNEL_OK")
</pallas_src>

<mosaic_0001>
module attributes {stable_mosaic.version = 11 : i64} {
  func.func @_linear_kernel(%arg0: i32, %arg1: memref<128x16xf32, #tpu.memory_space<vmem>>, %arg2: memref<16x128xbf16, #tpu.memory_space<vmem>>, %arg3: memref<1x128xf32, #tpu.memory_space<vmem>>, %arg4: memref<128x128xf32, #tpu.memory_space<vmem>>) attributes {dimension_semantics = [#tpu.dimension_semantics<parallel>], iteration_bounds = array<i64: 1>, scalar_prefetch = 0 : i64, scratch_operands = 0 : i64, tpu.core_type = #tpu.core_type<tc>, window_params = [{transform_indices = @transform_0, window_bounds = array<i64: 128, 16>}, {pipeline_mode = #tpu.pipeline_mode<synchronous>, transform_indices = @transform_1, window_bounds = array<i64: 16, 128>}, {pipeline_mode = #tpu.pipeline_mode<synchronous>, transform_indices = @transform_2, window_bounds = array<i64: 1, 128>}, {transform_indices = @transform_3, window_bounds = array<i64: 128, 128>}]} {
    %c0 = arith.constant 0 : index
    %c0_0 = arith.constant 0 : index
    %0 = vector.load %arg1[%c0, %c0_0] : memref<128x16xf32, #tpu.memory_space<vmem>>, vector<128x16xf32>
    %1 = arith.truncf %0 : vector<128x16xf32> to vector<128x16xbf16>
    %c0_1 = arith.constant 0 : index
    %c0_2 = arith.constant 0 : index
    %2 = vector.load %arg2[%c0_1, %c0_2] : memref<16x128xbf16, #tpu.memory_space<vmem>>, vector<16x128xbf16>
    %cst = arith.constant dense<0.000000e+00> : vector<128x128xf32>
    %3 = tpu.matmul %1, %2, %cst {dimension_numbers = #tpu.dot_dimension_numbers<[1], [0], [0], [1], [0, 0, 1, 1], [], []>} : vector<128x16xbf16>, vector<16x128xbf16>, vector<128x128xf32> -> vector<128x128xf32>
    %c0_3 = arith.constant 0 : index
    %c0_4 = arith.constant 0 : index
    %4 = vector.load %arg3[%c0_3, %c0_4] : memref<1x128xf32, #tpu.memory_space<vmem>>, vector<1x128xf32>
    %5 = vector.broadcast %4 : vector<1x128xf32> to vector<128x128xf32>
    %6 = arith.addf %3, %5 : vector<128x128xf32>
    %c0_5 = arith.constant 0 : index
    %c0_6 = arith.constant 0 : index
    %7 = vector.load %arg4[%c0_5, %c0_6] : memref<128x128xf32, #tpu.memory_space<vmem>>, vector<128x128xf32>
    tpu.vector_store %arg4[%c0_5, %c0_6], %6 {strides = array<i32>} : memref<128x128xf32, #tpu.memory_space<vmem>>, vector<128x128xf32>,
    return
  }
  func.func @transform_0(%arg0: i32) -> (i32, i32) {
    %c0_i32 = arith.constant 0 : i32
    %c0_i32_0 = arith.constant 0 : i32
    return %arg0, %c0_i32 : i32, i32
  }
  func.func @transform_1(%arg0: i32) -> (i32, i32) {
    %c0_i32 = arith.constant 0 : i32
    %c0_i32_0 = arith.constant 0 : i32
    %c0_i32_1 = arith.constant 0 : i32
    return %c0_i32, %c0_i32_0 : i32, i32
  }
  func.func @transform_2(%arg0: i32) -> (i32, i32) {
    %c0_i32 = arith.constant 0 : i32
    %c0_i32_0 = arith.constant 0 : i32
    %c0_i32_1 = arith.constant 0 : i32
    return %c0_i32, %c0_i32_0 : i32, i32
  }
  func.func @transform_3(%arg0: i32) -> (i32, i32) {
    %c0_i32 = arith.constant 0 : i32
    %c0_i32_0 = arith.constant 0 : i32
    return %arg0, %c0_i32 : i32, i32
  }
}

module attributes {stable_mosaic.version = 11 : i64} {
  func.func @_block_kernel(%arg0: i32, %arg1: memref<1x72x128xf32, #tpu.memory_space<vmem>>, %arg2: memref<1x128xf32, #tpu.memory_space<vmem>>, %arg3: memref<1x128xf32, #tpu.memory_space<vmem>>, %arg4: memref<128x384xbf16, #tpu.memory_space<vmem>>, %arg5: memref<1x384xf32, #tpu.memory_space<vmem>>, %arg6: memref<128x128xbf16, #tpu.memory_space<vmem>>, %arg7: memref<1x128xf32, #tpu.memory_space<vmem>>, %arg8: memref<1x128xf32, #tpu.memory_space<vmem>>, %arg9: memref<1x128xf32, #tpu.memory_space<vmem>>, %arg10: memref<128x256xbf16, #tpu.memory_space<vmem>>, %arg11: memref<1x256xf32, #tpu.memory_space<vmem>>, %arg12: memref<256x128xbf16, #tpu.memory_space<vmem>>, %arg13: memref<1x128xf32, #tpu.memory_space<vmem>>, %arg14: memref<1x72x128xf32, #tpu.memory_space<vmem>>) attributes {dimension_semantics = [#tpu.dimension_semantics<parallel>], iteration_bounds = array<i64: 2>, scalar_prefetch = 0 : i64, scratch_operands = 0 : i64, tpu.core_type = #tpu.core_type<tc>, window_params = [{transform_indices = @transform_0, window_bounds = array<i64: 1, 72, 128>}, {pipeline_mode = #tpu.pipeline_mode<synchronous>, transform_indices = @transform_1, window_bounds = array<i64: 1, 128>}, {pipeline_mode = #tpu.pipeline_mode<synchronous>, transform_indices = @transform_2, window_bounds = array<i64: 1, 128>}, {pipeline_mode = #tpu.pipeline_mode<synchronous>, transform_indices = @transform_3, window_bounds = array<i64: 128, 384>}, {pipeline_mode = #tpu.pipeline_mode<synchronous>, transform_indices = @transform_4, window_bounds = array<i64: 1, 384>}, {pipeline_mode = #tpu.pipeline_mode<synchronous>, transform_indices = @transform_5, window_bounds = array<i64: 128, 128>}, {pipeline_mode = #tpu.pipeline_mode<synchronous>, transform_indices = @transform_6, window_bounds = array<i64: 1, 128>}, {pipeline_mode = #tpu.pipeline_mode<synchronous>, transform_indices = @transform_7, window_bounds = array<i64: 1, 128>}, {pipeline_mode = #tpu.pipeline_mode<synchronous>, transform_indices = @transform_8, window_bounds = array<i64: 1, 128>}, {pipeline_mode = #tpu.pipeline_mode<synchronous>, transform_indices = @transform_9, window_bounds = array<i64: 128, 256>}, {pipeline_mode = #tpu.pipeline_mode<synchronous>, transform_indices = @transform_10, window_bounds = array<i64: 1, 256>}, {pipeline_mode = #tpu.pipeline_mode<synchronous>, transform_indices = @transform_11, window_bounds = array<i64: 256, 128>}, {pipeline_mode = #tpu.pipeline_mode<synchronous>, transform_indices = @transform_12, window_bounds = array<i64: 1, 128>}, {transform_indices = @transform_13, window_bounds = array<i64: 1, 72, 128>}]} {
    %c0 = arith.constant 0 : index
    %c0_0 = arith.constant 0 : index
    %c0_1 = arith.constant 0 : index
    %0 = vector.load %arg1[%c0, %c0_0, %c0_1] : memref<1x72x128xf32, #tpu.memory_space<vmem>>, vector<1x72x128xf32>
    %1 = vector.shape_cast %0 : vector<1x72x128xf32> to vector<72x128xf32>
    %c0_2 = arith.constant 0 : index
    %c0_3 = arith.constant 0 : index
    %2 = vector.load %arg2[%c0_2, %c0_3] : memref<1x128xf32, #tpu.memory_space<vmem>>, vector<1x128xf32>
    %c0_4 = arith.constant 0 : index
    %c0_5 = arith.constant 0 : index
    %3 = vector.load %arg3[%c0_4, %c0_5] : memref<1x128xf32, #tpu.memory_space<vmem>>, vector<1x128xf32>
    %cst = arith.constant dense<0.000000e+00> : vector<72xf32>
    %4 = vector.multi_reduction <add>, %1, %cst [1] : vector<72x128xf32> to vector<72xf32>
    %5 = vector.shape_cast %4 : vector<72xf32> to vector<72x1xf32>
    %cst_6 = arith.constant 1.280000e+02 : f32
    %6 = vector.broadcast %cst_6 : f32 to vector<72x1xf32>
    %7 = arith.divf %5, %6 : vector<72x1xf32>
    %8 = vector.broadcast %7 : vector<72x1xf32> to vector<72x128xf32>
    %9 = arith.subf %1, %8 : vector<72x128xf32>
    %10 = arith.mulf %9, %9 : vector<72x128xf32>
    %cst_7 = arith.constant dense<0.000000e+00> : vector<72xf32>
    %11 = vector.multi_reduction <add>, %10, %cst_7 [1] : vector<72x128xf32> to vector<72xf32>
    %12 = vector.shape_cast %11 : vector<72xf32> to vector<72x1xf32>
    %cst_8 = arith.constant 1.280000e+02 : f32
    %13 = vector.broadcast %cst_8 : f32 to vector<72x1xf32>
    %14 = arith.divf %12, %13 : vector<72x1xf32>
    %15 = vector.broadcast %7 : vector<72x1xf32> to vector<72x128xf32>
    %16 = arith.subf %1, %15 : vector<72x128xf32>
    %cst_9 = arith.constant 9.99999997E-7 : f32
    %17 = vector.broadcast %cst_9 : f32 to vector<72x1xf32>
    %18 = arith.addf %14, %17 : vector<72x1xf32>
    %19 = math.rsqrt %18 : vector<72x1xf32>
    %20 = vector.broadcast %19 : vector<72x1xf32> to vector<72x128xf32>
    %21 = arith.mulf %16, %20 : vector<72x128xf32>
    %22 = vector.broadcast %2 : vector<1x128xf32> to vector<72x128xf32>
    %23 = arith.mulf %21, %22 : vector<72x128xf32>
    %24 = vector.broadcast %3 : vector<1x128xf32> to vector<72x128xf32>
    %25 = arith.addf %23, %24 : vector<72x128xf32>
    %26 = arith.truncf %25 : vector<72x128xf32> to vector<72x128xbf16>
    %c0_10 = arith.constant 0 : index
    %c0_11 = arith.constant 0 : index
    %27 = vector.load %arg4[%c0_10, %c0_11] : memref<128x384xbf16, #tpu.memory_space<vmem>>, vector<128x384xbf16>
    %cst_12 = arith.constant dense<0.000000e+00> : vector<72x384xf32>
    %28 = tpu.matmul %26, %27, %cst_12 {dimension_numbers = #tpu.dot_dimension_numbers<[1], [0], [0], [1], [0, 0, 1, 1], [], []>} : vector<72x128xbf16>, vector<128x384xbf16>, vector<72x384xf32> -> vector<72x384xf32>
    %c0_13 = arith.constant 0 : index
    %c0_14 = arith.constant 0 : index
    %29 = vector.load %arg5[%c0_13, %c0_14] : memref<1x384xf32, #tpu.memory_space<vmem>>, vector<1x384xf32>
    %30 = vector.broadcast %29 : vector<1x384xf32> to vector<72x384xf32>
    %31 = arith.addf %28, %30 : vector<72x384xf32>
    %32 = vector.extract_strided_slice %31 {offsets = [0, 0], sizes = [72, 128], strides = [1, 1]} : vector<72x384xf32> to vector<72x128xf32>
    %cst_15 = arith.constant 0.176776692 : f32
    %33 = vector.broadcast %cst_15 : f32 to vector<72x128xf32>
    %34 = arith.mulf %32, %33 : vector<72x128xf32>
    %35 = arith.truncf %34 : vector<72x128xf32> to vector<72x128xbf16>
    %36 = vector.extract_strided_slice %31 {offsets = [0, 128], sizes = [72, 128], strides = [1, 1]} : vector<72x384xf32> to vector<72x128xf32>
    %37 = tpu.transpose %36, [1, 0] : vector<72x128xf32> -> vector<128x72xf32>
    %38 = arith.truncf %37 : vector<128x72xf32> to vector<128x72xbf16>
    %39 = vector.extract_strided_slice %31 {offsets = [0, 256], sizes = [72, 128], strides = [1, 1]} : vector<72x384xf32> to vector<72x128xf32>
    %40 = arith.truncf %39 : vector<72x128xf32> to vector<72x128xbf16>
    %41 = tpu.iota {dimensions = array<i32: 1>} : vector<1x72xi32>
    %c65_i32 = arith.constant 65 : i32
    %42 = vector.broadcast %c65_i32 : i32 to vector<1x72xi32>
    %43 = arith.cmpi slt, %41, %42 : vector<1x72xi32>
    %cst_16 = arith.constant 0.000000e+00 : f32
    %cst_17 = arith.constant -1.000000e+30 : f32
    %44 = vector.broadcast %cst_16 : f32 to vector<1x72xf32>
    %45 = vector.broadcast %cst_17 : f32 to vector<1x72xf32>
    %46 = arith.select %43, %44, %45 : vector<1x72xi1>, vector<1x72xf32>
    %47 = vector.extract_strided_slice %35 {offsets = [0, 0], sizes = [72, 32], strides = [1, 1]} : vector<72x128xbf16> to vector<72x32xbf16>
    %48 = vector.extract_strided_slice %38 {offsets = [0, 0], sizes = [32, 72], strides = [1, 1]} : vector<128x72xbf16> to vector<32x72xbf16>
    %cst_18 = arith.constant dense<0.000000e+00> : vector<72x72xf32>
    %49 = tpu.matmul %47, %48, %cst_18 {dimension_numbers = #tpu.dot_dimension_numbers<[1], [0], [0], [1], [0, 0, 1, 1], [], []>} : vector<72x32xbf16>, vector<32x72xbf16>, vector<72x72xf32> -> vector<72x72xf32>
    %50 = vector.broadcast %46 : vector<1x72xf32> to vector<72x72xf32>
    %51 = arith.addf %49, %50 : vector<72x72xf32>
    %cst_19 = arith.constant dense<0xFF800000> : vector<72xf32>
    %52 = vector.multi_reduction <maximumf>, %51, %cst_19 [1] : vector<72x72xf32> to vector<72xf32>
    %53 = vector.shape_cast %52 : vector<72xf32> to vector<72x1xf32>
    %54 = vector.broadcast %53 : vector<72x1xf32> to vector<72x72xf32>
    %55 = arith.subf %51, %54 : vector<72x72xf32>
    %56 = math.exp %55 : vector<72x72xf32>
    %cst_20 = arith.constant dense<0.000000e+00> : vector<72xf32>
    %57 = vector.multi_reduction <add>, %56, %cst_20 [1] : vector<72x72xf32> to vector<72xf32>
    %58 = vector.shape_cast %57 : vector<72xf32> to vector<72x1xf32>
    %59 = tpu.reciprocal %58 {approx = true} : vector<72x1xf32> -> vector<72x1xf32>
    %60 = vector.broadcast %59 : vector<72x1xf32> to vector<72x72xf32>
    %61 = arith.mulf %56, %60 : vector<72x72xf32>
    %62 = arith.truncf %61 : vector<72x72xf32> to vector<72x72xbf16>
    %63 = vector.extract_strided_slice %40 {offsets = [0, 0], sizes = [72, 32], strides = [1, 1]} : vector<72x128xbf16> to vector<72x32xbf16>
    %cst_21 = arith.constant dense<0.000000e+00> : vector<72x32xf32>
    %64 = tpu.matmul %62, %63, %cst_21 {dimension_numbers = #tpu.dot_dimension_numbers<[1], [0], [0], [1], [0, 0, 1, 1], [], []>} : vector<72x72xbf16>, vector<72x32xbf16>, vector<72x32xf32> -> vector<72x32xf32>
    %65 = vector.extract_strided_slice %35 {offsets = [0, 32], sizes = [72, 32], strides = [1, 1]} : vector<72x128xbf16> to vector<72x32xbf16>
    %66 = vector.extract_strided_slice %38 {offsets = [32, 0], sizes = [32, 72], strides = [1, 1]} : vector<128x72xbf16> to vector<32x72xbf16>
    %cst_22 = arith.constant dense<0.000000e+00> : vector<72x72xf32>
    %67 = tpu.matmul %65, %66, %cst_22 {dimension_numbers = #tpu.dot_dimension_numbers<[1], [0], [0], [1], [0, 0, 1, 1], [], []>} : vector<72x32xbf16>, vector<32x72xbf16>, vector<72x72xf32> -> vector<72x72xf32>
    %68 = vector.broadcast %46 : vector<1x72xf32> to vector<72x72xf32>
    %69 = arith.addf %67, %68 : vector<72x72xf32>
    %cst_23 = arith.constant dense<0xFF800000> : vector<72xf32>
    %70 = vector.multi_reduction <maximumf>, %69, %cst_23 [1] : vector<72x72xf32> to vector<72xf32>
    %71 = vector.shape_cast %70 : vector<72xf32> to vector<72x1xf32>
    %72 = vector.broadcast %71 : vector<72x1xf32> to vector<72x72xf32>
    %73 = arith.subf %69, %72 : vector<72x72xf32>
    %74 = math.exp %73 : vector<72x72xf32>
    %cst_24 = arith.constant dense<0.000000e+00> : vector<72xf32>
    %75 = vector.multi_reduction <add>, %74, %cst_24 [1] : vector<72x72xf32> to vector<72xf32>
    %76 = vector.shape_cast %75 : vector<72xf32> to vector<72x1xf32>
    %77 = tpu.reciprocal %76 {approx = true} : vector<72x1xf32> -> vector<72x1xf32>
    %78 = vector.broadcast %77 : vector<72x1xf32> to vector<72x72xf32>
    %79 = arith.mulf %74, %78 : vector<72x72xf32>
    %80 = arith.truncf %79 : vector<72x72xf32> to vector<72x72xbf16>
    %81 = vector.extract_strided_slice %40 {offsets = [0, 32], sizes = [72, 32], strides = [1, 1]} : vector<72x128xbf16> to vector<72x32xbf16>
    %cst_25 = arith.constant dense<0.000000e+00> : vector<72x32xf32>
    %82 = tpu.matmul %80, %81, %cst_25 {dimension_numbers = #tpu.dot_dimension_numbers<[1], [0], [0], [1], [0, 0, 1, 1], [], []>} : vector<72x72xbf16>, vector<72x32xbf16>, vector<72x32xf32> -> vector<72x32xf32>
    %83 = vector.extract_strided_slice %35 {offsets = [0, 64], sizes = [72, 32], strides = [1, 1]} : vector<72x128xbf16> to vector<72x32xbf16>
    %84 = vector.extract_strided_slice %38 {offsets = [64, 0], sizes = [32, 72], strides = [1, 1]} : vector<128x72xbf16> to vector<32x72xbf16>
    %cst_26 = arith.constant dense<0.000000e+00> : vector<72x72xf32>
    %85 = tpu.matmul %83, %84, %cst_26 {dimension_numbers = #tpu.dot_dimension_numbers<[1], [0], [0], [1], [0, 0, 1, 1], [], []>} : vector<72x32xbf16>, vector<32x72xbf16>, vector<72x72xf32> -> vector<72x72xf32>
    %86 = vector.broadcast %46 : vector<1x72xf32> to vector<72x72xf32>
    %87 = arith.addf %85, %86 : vector<72x72xf32>
    %cst_27 = arith.constant dense<0xFF800000> : vector<72xf32>
    %88 = vector.multi_reduction <maximumf>, %87, %cst_27 [1] : vector<72x72xf32> to vector<72xf32>
    %89 = vector.shape_cast %88 : vector<72xf32> to vector<72x1xf32>
    %90 = vector.broadcast %89 : vector<72x1xf32> to vector<72x72xf32>
    %91 = arith.subf %87, %90 : vector<72x72xf32>
    %92 = math.exp %91 : vector<72x72xf32>
    %cst_28 = arith.constant dense<0.000000e+00> : vector<72xf32>
    %93 = vector.multi_reduction <add>, %92, %cst_28 [1] : vector<72x72xf32> to vector<72xf32>
    %94 = vector.shape_cast %93 : vector<72xf32> to vector<72x1xf32>
    %95 = tpu.reciprocal %94 {approx = true} : vector<72x1xf32> -> vector<72x1xf32>
    %96 = vector.broadcast %95 : vector<72x1xf32> to vector<72x72xf32>
    %97 = arith.mulf %92, %96 : vector<72x72xf32>
    %98 = arith.truncf %97 : vector<72x72xf32> to vector<72x72xbf16>
    %99 = vector.extract_strided_slice %40 {offsets = [0, 64], sizes = [72, 32], strides = [1, 1]} : vector<72x128xbf16> to vector<72x32xbf16>
    %cst_29 = arith.constant dense<0.000000e+00> : vector<72x32xf32>
    %100 = tpu.matmul %98, %99, %cst_29 {dimension_numbers = #tpu.dot_dimension_numbers<[1], [0], [0], [1], [0, 0, 1, 1], [], []>} : vector<72x72xbf16>, vector<72x32xbf16>, vector<72x32xf32> -> vector<72x32xf32>
    %101 = vector.extract_strided_slice %35 {offsets = [0, 96], sizes = [72, 32], strides = [1, 1]} : vector<72x128xbf16> to vector<72x32xbf16>
    %102 = vector.extract_strided_slice %38 {offsets = [96, 0], sizes = [32, 72], strides = [1, 1]} : vector<128x72xbf16> to vector<32x72xbf16>
    %cst_30 = arith.constant dense<0.000000e+00> : vector<72x72xf32>
    %103 = tpu.matmul %101, %102, %cst_30 {dimension_numbers = #tpu.dot_dimension_numbers<[1], [0], [0], [1], [0, 0, 1, 1], [], []>} : vector<72x32xbf16>, vector<32x72xbf16>, vector<72x72xf32> -> vector<72x72xf32>
    %104 = vector.broadcast %46 : vector<1x72xf32> to vector<72x72xf32>
    %105 = arith.addf %103, %104 : vector<72x72xf32>
    %cst_31 = arith.constant dense<0xFF800000> : vector<72xf32>
    %106 = vector.multi_reduction <maximumf>, %105, %cst_31 [1] : vector<72x72xf32> to vector<72xf32>
    %107 = vector.shape_cast %106 : vector<72xf32> to vector<72x1xf32>
    %108 = vector.broadcast %107 : vector<72x1xf32> to vector<72x72xf32>
    %109 = arith.subf %105, %108 : vector<72x72xf32>
    %110 = math.exp %109 : vector<72x72xf32>
    %cst_32 = arith.constant dense<0.000000e+00> : vector<72xf32>
    %111 = vector.multi_reduction <add>, %110, %cst_32 [1] : vector<72x72xf32> to vector<72xf32>
    %112 = vector.shape_cast %111 : vector<72xf32> to vector<72x1xf32>
    %113 = tpu.reciprocal %112 {approx = true} : vector<72x1xf32> -> vector<72x1xf32>
    %114 = vector.broadcast %113 : vector<72x1xf32> to vector<72x72xf32>
    %115 = arith.mulf %110, %114 : vector<72x72xf32>
    %116 = arith.truncf %115 : vector<72x72xf32> to vector<72x72xbf16>
    %117 = vector.extract_strided_slice %40 {offsets = [0, 96], sizes = [72, 32], strides = [1, 1]} : vector<72x128xbf16> to vector<72x32xbf16>
    %cst_33 = arith.constant dense<0.000000e+00> : vector<72x32xf32>
    %118 = tpu.matmul %116, %117, %cst_33 {dimension_numbers = #tpu.dot_dimension_numbers<[1], [0], [0], [1], [0, 0, 1, 1], [], []>} : vector<72x72xbf16>, vector<72x32xbf16>, vector<72x32xf32> -> vector<72x32xf32>
    %119 = tpu.concatenate %64, %82, %100, %118 in 1 : vector<72x32xf32>, vector<72x32xf32>, vector<72x32xf32>, vector<72x32xf32> -> vector<72x128xf32>
    %120 = arith.truncf %119 : vector<72x128xf32> to vector<72x128xbf16>
    %c0_34 = arith.constant 0 : index
    %c0_35 = arith.constant 0 : index
    %121 = vector.load %arg6[%c0_34, %c0_35] : memref<128x128xbf16, #tpu.memory_space<vmem>>, vector<128x128xbf16>
    %cst_36 = arith.constant dense<0.000000e+00> : vector<72x128xf32>
    %122 = tpu.matmul %120, %121, %cst_36 {dimension_numbers = #tpu.dot_dimension_numbers<[1], [0], [0], [1], [0, 0, 1, 1], [], []>} : vector<72x128xbf16>, vector<128x128xbf16>, vector<72x128xf32> -> vector<72x128xf32>
    %c0_37 = arith.constant 0 : index
    %c0_38 = arith.constant 0 : index
    %123 = vector.load %arg7[%c0_37, %c0_38] : memref<1x128xf32, #tpu.memory_space<vmem>>, vector<1x128xf32>
    %124 = vector.broadcast %123 : vector<1x128xf32> to vector<72x128xf32>
    %125 = arith.addf %122, %124 : vector<72x128xf32>
    %126 = arith.addf %1, %125 : vector<72x128xf32>
    %c0_39 = arith.constant 0 : index
    %c0_40 = arith.constant 0 : index
    %127 = vector.load %arg8[%c0_39, %c0_40] : memref<1x128xf32, #tpu.memory_space<vmem>>, vector<1x128xf32>
    %c0_41 = arith.constant 0 : index
    %c0_42 = arith.constant 0 : index
    %128 = vector.load %arg9[%c0_41, %c0_42] : memref<1x128xf32, #tpu.memory_space<vmem>>, vector<1x128xf32>
    %cst_43 = arith.constant dense<0.000000e+00> : vector<72xf32>
    %129 = vector.multi_reduction <add>, %126, %cst_43 [1] : vector<72x128xf32> to vector<72xf32>
    %130 = vector.shape_cast %129 : vector<72xf32> to vector<72x1xf32>
    %cst_44 = arith.constant 1.280000e+02 : f32
    %131 = vector.broadcast %cst_44 : f32 to vector<72x1xf32>
    %132 = arith.divf %130, %131 : vector<72x1xf32>
    %133 = vector.broadcast %132 : vector<72x1xf32> to vector<72x128xf32>
    %134 = arith.subf %126, %133 : vector<72x128xf32>
    %135 = arith.mulf %134, %134 : vector<72x128xf32>
    %cst_45 = arith.constant dense<0.000000e+00> : vector<72xf32>
    %136 = vector.multi_reduction <add>, %135, %cst_45 [1] : vector<72x128xf32> to vector<72xf32>
    %137 = vector.shape_cast %136 : vector<72xf32> to vector<72x1xf32>
    %cst_46 = arith.constant 1.280000e+02 : f32
    %138 = vector.broadcast %cst_46 : f32 to vector<72x1xf32>
    %139 = arith.divf %137, %138 : vector<72x1xf32>
    %140 = vector.broadcast %132 : vector<72x1xf32> to vector<72x128xf32>
    %141 = arith.subf %126, %140 : vector<72x128xf32>
    %cst_47 = arith.constant 9.99999997E-7 : f32
    %142 = vector.broadcast %cst_47 : f32 to vector<72x1xf32>
    %143 = arith.addf %139, %142 : vector<72x1xf32>
    %144 = math.rsqrt %143 : vector<72x1xf32>
    %145 = vector.broadcast %144 : vector<72x1xf32> to vector<72x128xf32>
    %146 = arith.mulf %141, %145 : vector<72x128xf32>
    %147 = vector.broadcast %127 : vector<1x128xf32> to vector<72x128xf32>
    %148 = arith.mulf %146, %147 : vector<72x128xf32>
    %149 = vector.broadcast %128 : vector<1x128xf32> to vector<72x128xf32>
    %150 = arith.addf %148, %149 : vector<72x128xf32>
    %151 = arith.truncf %150 : vector<72x128xf32> to vector<72x128xbf16>
    %c0_48 = arith.constant 0 : index
    %c0_49 = arith.constant 0 : index
    %152 = vector.load %arg10[%c0_48, %c0_49] : memref<128x256xbf16, #tpu.memory_space<vmem>>, vector<128x256xbf16>
    %cst_50 = arith.constant dense<0.000000e+00> : vector<72x256xf32>
    %153 = tpu.matmul %151, %152, %cst_50 {dimension_numbers = #tpu.dot_dimension_numbers<[1], [0], [0], [1], [0, 0, 1, 1], [], []>} : vector<72x128xbf16>, vector<128x256xbf16>, vector<72x256xf32> -> vector<72x256xf32>
    %c0_51 = arith.constant 0 : index
    %c0_52 = arith.constant 0 : index
    %154 = vector.load %arg11[%c0_51, %c0_52] : memref<1x256xf32, #tpu.memory_space<vmem>>, vector<1x256xf32>
    %155 = vector.broadcast %154 : vector<1x256xf32> to vector<72x256xf32>
    %156 = arith.addf %153, %155 : vector<72x256xf32>
    %cst_53 = arith.constant 5.000000e-01 : f32
    %157 = vector.broadcast %cst_53 : f32 to vector<72x256xf32>
    %158 = arith.mulf %157, %156 : vector<72x256xf32>
    %cst_54 = arith.constant 0.707106769 : f32
    %159 = vector.broadcast %cst_54 : f32 to vector<72x256xf32>
    %160 = arith.mulf %156, %159 : vector<72x256xf32>
    %161 = math.erf %160 : vector<72x256xf32>
    %cst_55 = arith.constant 1.000000e+00 : f32
    %162 = vector.broadcast %cst_55 : f32 to vector<72x256xf32>
    %163 = arith.addf %162, %161 : vector<72x256xf32>
    %164 = arith.mulf %158, %163 : vector<72x256xf32>
    %165 = arith.truncf %164 : vector<72x256xf32> to vector<72x256xbf16>
    %c0_56 = arith.constant 0 : index
    %c0_57 = arith.constant 0 : index
    %166 = vector.load %arg12[%c0_56, %c0_57] : memref<256x128xbf16, #tpu.memory_space<vmem>>, vector<256x128xbf16>
    %cst_58 = arith.constant dense<0.000000e+00> : vector<72x128xf32>
    %167 = tpu.matmul %165, %166, %cst_58 {dimension_numbers = #tpu.dot_dimension_numbers<[1], [0], [0], [1], [0, 0, 1, 1], [], []>} : vector<72x256xbf16>, vector<256x128xbf16>, vector<72x128xf32> -> vector<72x128xf32>
    %c0_59 = arith.constant 0 : index
    %c0_60 = arith.constant 0 : index
    %168 = vector.load %arg13[%c0_59, %c0_60] : memref<1x128xf32, #tpu.memory_space<vmem>>, vector<1x128xf32>
    %169 = vector.broadcast %168 : vector<1x128xf32> to vector<72x128xf32>
    %170 = arith.addf %167, %169 : vector<72x128xf32>
    %171 = arith.addf %126, %170 : vector<72x128xf32>
    %c0_61 = arith.constant 0 : index
    %c0_62 = arith.constant 0 : index
    %c0_63 = arith.constant 0 : index
    %172 = vector.load %arg14[%c0_61, %c0_62, %c0_63] : memref<1x72x128xf32, #tpu.memory_space<vmem>>, vector<1x72x128xf32>
    %173 = vector.shape_cast %172 : vector<1x72x128xf32> to vector<72x128xf32>
    %174 = vector.shape_cast %171 : vector<72x128xf32> to vector<1x72x128xf32>
    tpu.vector_store %arg14[%c0_61, %c0_62, %c0_63], %174 {strides = array<i32>} : memref<1x72x128xf32, #tpu.memory_space<vmem>>, vector<1x72x128xf32>,
    return
  }
  func.func @transform_0(%arg0: i32) -> (i32, i32, i32) {
    %c0_i32 = arith.constant 0 : i32
    %c0_i32_0 = arith.constant 0 : i32
    %c0_i32_1 = arith.constant 0 : i32
    return %arg0, %c0_i32, %c0_i32_0 : i32, i32, i32
  }
  func.func @transform_1(%arg0: i32) -> (i32, i32) {
    %c0_i32 = arith.constant 0 : i32
    %c0_i32_0 = arith.constant 0 : i32
    %c0_i32_1 = arith.constant 0 : i32
    return %c0_i32, %c0_i32_0 : i32, i32
  }
  func.func @transform_2(%arg0: i32) -> (i32, i32) {
    %c0_i32 = arith.constant 0 : i32
    %c0_i32_0 = arith.constant 0 : i32
    %c0_i32_1 = arith.constant 0 : i32
    return %c0_i32, %c0_i32_0 : i32, i32
  }
  func.func @transform_3(%arg0: i32) -> (i32, i32) {
    %c0_i32 = arith.constant 0 : i32
    %c0_i32_0 = arith.constant 0 : i32
    %c0_i32_1 = arith.constant 0 : i32
    return %c0_i32, %c0_i32_0 : i32, i32
  }
  func.func @transform_4(%arg0: i32) -> (i32, i32) {
    %c0_i32 = arith.constant 0 : i32
    %c0_i32_0 = arith.constant 0 : i32
    %c0_i32_1 = arith.constant 0 : i32
    return %c0_i32, %c0_i32_0 : i32, i32
  }
  func.func @transform_5(%arg0: i32) -> (i32, i32) {
    %c0_i32 = arith.constant 0 : i32
    %c0_i32_0 = arith.constant 0 : i32
    %c0_i32_1 = arith.constant 0 : i32
    return %c0_i32, %c0_i32_0 : i32, i32
  }
  func.func @transform_6(%arg0: i32) -> (i32, i32) {
    %c0_i32 = arith.constant 0 : i32
    %c0_i32_0 = arith.constant 0 : i32
    %c0_i32_1 = arith.constant 0 : i32
    return %c0_i32, %c0_i32_0 : i32, i32
  }
  func.func @transform_7(%arg0: i32) -> (i32, i32) {
    %c0_i32 = arith.constant 0 : i32
    %c0_i32_0 = arith.constant 0 : i32
    %c0_i32_1 = arith.constant 0 : i32
    return %c0_i32, %c0_i32_0 : i32, i32
  }
  func.func @transform_8(%arg0: i32) -> (i32, i32) {
    %c0_i32 = arith.constant 0 : i32
    %c0_i32_0 = arith.constant 0 : i32
    %c0_i32_1 = arith.constant 0 : i32
    return %c0_i32, %c0_i32_0 : i32, i32
  }
  func.func @transform_9(%arg0: i32) -> (i32, i32) {
    %c0_i32 = arith.constant 0 : i32
    %c0_i32_0 = arith.constant 0 : i32
    %c0_i32_1 = arith.constant 0 : i32
    return %c0_i32, %c0_i32_0 : i32, i32
  }
  func.func @transform_10(%arg0: i32) -> (i32, i32) {
    %c0_i32 = arith.constant 0 : i32
    %c0_i32_0 = arith.constant 0 : i32
    %c0_i32_1 = arith.constant 0 : i32
    return %c0_i32, %c0_i32_0 : i32, i32
  }
  func.func @transform_11(%arg0: i32) -> (i32, i32) {
    %c0_i32 = arith.constant 0 : i32
    %c0_i32_0 = arith.constant 0 : i32
    %c0_i32_1 = arith.constant 0 : i32
    return %c0_i32, %c0_i32_0 : i32, i32
  }
  func.func @transform_12(%arg0: i32) -> (i32, i32) {
    %c0_i32 = arith.constant 0 : i32
    %c0_i32_0 = arith.constant 0 : i32
    %c0_i32_1 = arith.constant 0 : i32
    return %c0_i32, %c0_i32_0 : i32, i32
  }
  func.func @transform_13(%arg0: i32) -> (i32, i32, i32) {
    %c0_i32 = arith.constant 0 : i32
    %c0_i32_0 = arith.constant 0 : i32
    %c0_i32_1 = arith.constant 0 : i32
    return %arg0, %c0_i32, %c0_i32_0 : i32, i32, i32
  }
}

module attributes {stable_mosaic.version = 11 : i64} {
  func.func @_head_kernel(%arg0: i32, %arg1: memref<2x128xf32, #tpu.memory_space<vmem>>, %arg2: memref<1x128xf32, #tpu.memory_space<vmem>>, %arg3: memref<1x128xf32, #tpu.memory_space<vmem>>, %arg4: memref<128x128xbf16, #tpu.memory_space<vmem>>, %arg5: memref<1x128xf32, #tpu.memory_space<vmem>>, %arg6: memref<2x128xf32, #tpu.memory_space<vmem>>) attributes {dimension_semantics = [#tpu.dimension_semantics<arbitrary>], iteration_bounds = array<i64: 1>, scalar_prefetch = 0 : i64, scratch_operands = 0 : i64, tpu.core_type = #tpu.core_type<tc>, window_params = [{pipeline_mode = #tpu.pipeline_mode<synchronous>, transform_indices = @transform_0, window_bounds = array<i64: 2, 128>}, {pipeline_mode = #tpu.pipeline_mode<synchronous>, transform_indices = @transform_1, window_bounds = array<i64: 1, 128>}, {pipeline_mode = #tpu.pipeline_mode<synchronous>, transform_indices = @transform_2, window_bounds = array<i64: 1, 128>}, {pipeline_mode = #tpu.pipeline_mode<synchronous>, transform_indices = @transform_3, window_bounds = array<i64: 128, 128>}, {pipeline_mode = #tpu.pipeline_mode<synchronous>, transform_indices = @transform_4, window_bounds = array<i64: 1, 128>}, {pipeline_mode = #tpu.pipeline_mode<synchronous>, transform_indices = @transform_5, window_bounds = array<i64: 2, 128>}]} {
    %c0 = arith.constant 0 : index
    %c0_0 = arith.constant 0 : index
    %0 = vector.load %arg1[%c0, %c0_0] : memref<2x128xf32, #tpu.memory_space<vmem>>, vector<2x128xf32>
    %c0_1 = arith.constant 0 : index
    %c0_2 = arith.constant 0 : index
    %1 = vector.load %arg2[%c0_1, %c0_2] : memref<1x128xf32, #tpu.memory_space<vmem>>, vector<1x128xf32>
    %c0_3 = arith.constant 0 : index
    %c0_4 = arith.constant 0 : index
    %2 = vector.load %arg3[%c0_3, %c0_4] : memref<1x128xf32, #tpu.memory_space<vmem>>, vector<1x128xf32>
    %cst = arith.constant dense<0.000000e+00> : vector<2xf32>
    %3 = vector.multi_reduction <add>, %0, %cst [1] : vector<2x128xf32> to vector<2xf32>
    %4 = vector.shape_cast %3 : vector<2xf32> to vector<2x1xf32>
    %cst_5 = arith.constant 1.280000e+02 : f32
    %5 = vector.broadcast %cst_5 : f32 to vector<2x1xf32>
    %6 = arith.divf %4, %5 : vector<2x1xf32>
    %7 = vector.broadcast %6 : vector<2x1xf32> to vector<2x128xf32>
    %8 = arith.subf %0, %7 : vector<2x128xf32>
    %9 = arith.mulf %8, %8 : vector<2x128xf32>
    %cst_6 = arith.constant dense<0.000000e+00> : vector<2xf32>
    %10 = vector.multi_reduction <add>, %9, %cst_6 [1] : vector<2x128xf32> to vector<2xf32>
    %11 = vector.shape_cast %10 : vector<2xf32> to vector<2x1xf32>
    %cst_7 = arith.constant 1.280000e+02 : f32
    %12 = vector.broadcast %cst_7 : f32 to vector<2x1xf32>
    %13 = arith.divf %11, %12 : vector<2x1xf32>
    %14 = vector.broadcast %6 : vector<2x1xf32> to vector<2x128xf32>
    %15 = arith.subf %0, %14 : vector<2x128xf32>
    %cst_8 = arith.constant 9.99999997E-7 : f32
    %16 = vector.broadcast %cst_8 : f32 to vector<2x1xf32>
    %17 = arith.addf %13, %16 : vector<2x1xf32>
    %18 = math.rsqrt %17 : vector<2x1xf32>
    %19 = vector.broadcast %18 : vector<2x1xf32> to vector<2x128xf32>
    %20 = arith.mulf %15, %19 : vector<2x128xf32>
    %21 = vector.broadcast %1 : vector<1x128xf32> to vector<2x128xf32>
    %22 = arith.mulf %20, %21 : vector<2x128xf32>
    %23 = vector.broadcast %2 : vector<1x128xf32> to vector<2x128xf32>
    %24 = arith.addf %22, %23 : vector<2x128xf32>
    %25 = arith.truncf %24 : vector<2x128xf32> to vector<2x128xbf16>
    %c0_9 = arith.constant 0 : index
    %c0_10 = arith.constant 0 : index
    %26 = vector.load %arg4[%c0_9, %c0_10] : memref<128x128xbf16, #tpu.memory_space<vmem>>, vector<128x128xbf16>
    %cst_11 = arith.constant dense<0.000000e+00> : vector<2x128xf32>
    %27 = tpu.matmul %25, %26, %cst_11 {dimension_numbers = #tpu.dot_dimension_numbers<[1], [0], [0], [1], [0, 0, 1, 1], [], []>} : vector<2x128xbf16>, vector<128x128xbf16>, vector<2x128xf32> -> vector<2x128xf32>
    %c0_12 = arith.constant 0 : index
    %c0_13 = arith.constant 0 : index
    %28 = vector.load %arg5[%c0_12, %c0_13] : memref<1x128xf32, #tpu.memory_space<vmem>>, vector<1x128xf32>
    %29 = vector.broadcast %28 : vector<1x128xf32> to vector<2x128xf32>
    %30 = arith.addf %27, %29 : vector<2x128xf32>
    %c0_14 = arith.constant 0 : index
    %c0_15 = arith.constant 0 : index
    %31 = vector.load %arg6[%c0_14, %c0_15] : memref<2x128xf32, #tpu.memory_space<vmem>>, vector<2x128xf32>
    tpu.vector_store %arg6[%c0_14, %c0_15], %30 {strides = array<i32>} : memref<2x128xf32, #tpu.memory_space<vmem>>, vector<2x128xf32>,
    return
  }
  func.func @transform_0(%arg0: i32) -> (i32, i32) {
    %c0_i32 = arith.constant 0 : i32
    %c0_i32_0 = arith.constant 0 : i32
    %c0_i32_1 = arith.constant 0 : i32
    return %c0_i32, %c0_i32_0 : i32, i32
  }
  func.func @transform_1(%arg0: i32) -> (i32, i32) {
    %c0_i32 = arith.constant 0 : i32
    %c0_i32_0 = arith.constant 0 : i32
    %c0_i32_1 = arith.constant 0 : i32
    return %c0_i32, %c0_i32_0 : i32, i32
  }
  func.func @transform_2(%arg0: i32) -> (i32, i32) {
    %c0_i32 = arith.constant 0 : i32
    %c0_i32_0 = arith.constant 0 : i32
    %c0_i32_1 = arith.constant 0 : i32
    return %c0_i32, %c0_i32_0 : i32, i32
  }
  func.func @transform_3(%arg0: i32) -> (i32, i32) {
    %c0_i32 = arith.constant 0 : i32
    %c0_i32_0 = arith.constant 0 : i32
    %c0_i32_1 = arith.constant 0 : i32
    return %c0_i32, %c0_i32_0 : i32, i32
  }
  func.func @transform_4(%arg0: i32) -> (i32, i32) {
    %c0_i32 = arith.constant 0 : i32
    %c0_i32_0 = arith.constant 0 : i32
    %c0_i32_1 = arith.constant 0 : i32
    return %c0_i32, %c0_i32_0 : i32, i32
  }
  func.func @transform_5(%arg0: i32) -> (i32, i32) {
    %c0_i32 = arith.constant 0 : i32
    %c0_i32_0 = arith.constant 0 : i32
    %c0_i32_1 = arith.constant 0 : i32
    return %c0_i32, %c0_i32_0 : i32, i32
  }
}

</mosaic_0001>

<bundles_post_ra>
// kernel: _lambda_.4
= control target key start
LH: loop header
LB: loop body
LE: loop exit
PB: predicated region body
PF: predicated region fallthrough
CT: control target
= control target key end

     0   :  { %vm51_vm0 = vcmask 130048   ;;  %s292_s1 = inlined_call_operand.vmem [shape: bf16[16,128], index: 1, kind: input, shape index: {}]   ;;  %s293_s0 = inlined_call_operand.vmem [shape: f32[128,16], index: 0, kind: input, shape index: {}]   ;;  %s294_s2 = inlined_call_operand.vmem [shape: f32[1,128], index: 2, kind: input, shape index: {}]   ;;  %s295_s3 = inlined_call_operand.vmem [shape: f32[128,128], index: 3, kind: output, shape index: {}]  }
   0x1   :  { %v157_v0 = vld [vmem:[%s292_s1] sm:$0xff]  ;;  %v16_v2 = vld [vmem:[%s293_s0 + $0x8] sm:$0xff]  ;;  %v17_v13 = vld [vmem:[%s293_s0 + $0x10] sm:$0xff] }
   0x2   :  { %v15_v1 = vld [vmem:[%s293_s0] sm:$0xff]  ;;  %v20_v5 = vld [vmem:[%s293_s0 + $0x28] sm:$0xff]  ;;  %83 = vmatpush.bf16.msra.mxu0 %v157_v0  ;;  %158 = vmatpush.bf16.msra.mxu1 %v157_v0  ;;  %v18_v14 = vld [vmem:[%s293_s0 + $0x18] sm:$0xff] }
   0x3   :  { %v31_v3 = vpack.c.bf16 %v16_v2, %v15_v1  ;;  %v19_v4 = vld [vmem:[%s293_s0 + $0x20] sm:$0xff]  ;;  %v24_v8 = vld [vmem:[%s293_s0 + $0x48] sm:$0xff]  ;;  %159 = vmatpush.bf16.msra.mxu2 %v157_v0  ;;  %160 = vmatpush.bf16.msra.mxu3 %v157_v0  ;;  %v21_v15 = vld [vmem:[%s293_s0 + $0x30] sm:$0xff]  ;;  %v32_v21 = vpack.c.bf16 %v18_v14, %v17_v13 }
   0x4   :  { %v23_v6 = vld [vmem:[%s293_s0 + $0x40] sm:$0xff]  ;;  %v33_v7 = vpack.c.bf16 %v20_v5, %v19_v4  ;;  %v28_v10 = vld [vmem:[%s293_s0 + $0x68] sm:$0xff]  ;;  %v22_v16 = vld [vmem:[%s293_s0 + $0x38] sm:$0xff] }
   0x5   :  { %v27_v9 = vld [vmem:[%s293_s0 + $0x60] sm:$0xff]  ;;  %v35_v11 = vpack.c.bf16 %v24_v8, %v23_v6  ;;  %149 = vmatmul.msk.bf16.vlgmr.msra.gmra.mxu0 %vm51_vm0, %v31_v3  ;;  %v25_v17 = vld [vmem:[%s293_s0 + $0x50] sm:$0xff]  ;;  %v26_v18 = vld [vmem:[%s293_s0 + $0x58] sm:$0xff]  ;;  %v34_v22 = vpack.c.bf16 %v22_v16, %v21_v15 }
   0x6   :  { %v37_v12 = vpack.c.bf16 %v28_v10, %v27_v9  ;;  %151 = vmatmul.msk.bf16.vlgmr.msra.gmra.mxu1 %vm51_vm0, %v33_v7  ;;  %v29_v19 = vld [vmem:[%s293_s0 + $0x70] sm:$0xff]  ;;  %v30_v20 = vld [vmem:[%s293_s0 + $0x78] sm:$0xff]  ;;  %v36_v23 = vpack.c.bf16 %v26_v18, %v25_v17  ;;  %v161_v25 = vld [vmem:[%s294_s2] ss:$0 sm:$0xff] }
   0x7   :  { %153 = vmatmul.msk.bf16.vlgmr.msra.gmra.mxu2 %vm51_vm0, %v35_v11  ;;  %v38_v24 = vpack.c.bf16 %v30_v20, %v29_v19 }
   0x8   :  { %155 = vmatmul.msk.bf16.vlgmr.msra.gmra.mxu3 %vm51_vm0, %v37_v12 }
  0x15   :  { %150 = vmatmul.msk.bf16.gmra.mxu0 %vm51_vm0, %v32_v21 }
  0x16   :  { %152 = vmatmul.msk.bf16.gmra.mxu1 %vm51_vm0, %v34_v22 }
  0x17   :  { %154 = vmatmul.msk.bf16.gmra.mxu2 %vm51_vm0, %v36_v23 }
  0x18   :  { %156 = vmatmul.msk.bf16.gmra.mxu3 %vm51_vm0, %v38_v24 }
  0x82   :  { %v85_v26 = vpop.f32.mrf.mxu0 }
  0x83   :  { %v95_v27 = vpop.f32.mrf.mxu1  ;;  %v86_v28 = vadd.f32 %v161_v25, %v85_v26 }
  0x84   :  { %v96_v29 = vadd.f32 %v161_v25, %v95_v27 }
  0x85   :  { %125 = vst [vmem:[%s295_s3] sm:$0xff] %v86_v28 }
  0x86   :  { %129 = vst [vmem:[%s295_s3 + $0x20] sm:$0xff] %v96_v29 }
  0x8a   :  { %v105_v30 = vpop.f32.mrf.mxu2  ;;  %v87_v34 = vpop.f32.mrf.mxu0 }
  0x8b   :  { %v115_v31 = vpop.f32.mrf.mxu3  ;;  %v106_v32 = vadd.f32 %v161_v25, %v105_v30  ;;  %v97_v35 = vpop.f32.mrf.mxu1  ;;  %v88_v36 = vadd.f32 %v161_v25, %v87_v34 }
  0x8c   :  { %v116_v33 = vadd.f32 %v161_v25, %v115_v31  ;;  %v98_v37 = vadd.f32 %v161_v25, %v97_v35 }
  0x8d   :  { %133 = vst [vmem:[%s295_s3 + $0x40] sm:$0xff] %v106_v32 }
  0x8e   :  { %137 = vst [vmem:[%s295_s3 + $0x60] sm:$0xff] %v116_v33 }
  0x8f   :  { %126 = vst [vmem:[%s295_s3 + $0x8] sm:$0xff] %v88_v36 }
  0x90   :  { %130 = vst [vmem:[%s295_s3 + $0x28] sm:$0xff] %v98_v37 }
  0x92   :  { %v107_v38 = vpop.f32.mrf.mxu2  ;;  %v90_v42 = vpop.f32.mrf.mxu0 }
  0x93   :  { %v117_v39 = vpop.f32.mrf.mxu3  ;;  %v108_v40 = vadd.f32 %v161_v25, %v107_v38  ;;  %v100_v43 = vpop.f32.mrf.mxu1  ;;  %v91_v44 = vadd.f32 %v161_v25, %v90_v42 }
  0x94   :  { %v118_v41 = vadd.f32 %v161_v25, %v117_v39  ;;  %v101_v45 = vadd.f32 %v161_v25, %v100_v43 }
  0x95   :  { %134 = vst [vmem:[%s295_s3 + $0x48] sm:$0xff] %v108_v40 }
  0x96   :  { %138 = vst [vmem:[%s295_s3 + $0x68] sm:$0xff] %v118_v41 }
  0x97   :  { %127 = vst [vmem:[%s295_s3 + $0x10] sm:$0xff] %v91_v44 }
  0x98   :  { %131 = vst [vmem:[%s295_s3 + $0x30] sm:$0xff] %v101_v45 }
  0x9a   :  { %v110_v46 = vpop.f32.mrf.mxu2  ;;  %v92_v50 = vpop.f32.mrf.mxu0 }
  0x9b   :  { %v120_v47 = vpop.f32.mrf.mxu3  ;;  %v111_v48 = vadd.f32 %v161_v25, %v110_v46  ;;  %v102_v51 = vpop.f32.mrf.mxu1  ;;  %v93_v52 = vadd.f32 %v161_v25, %v92_v50 }
  0x9c   :  { %v121_v49 = vadd.f32 %v161_v25, %v120_v47  ;;  %v103_v53 = vadd.f32 %v161_v25, %v102_v51 }
  0x9d   :  { %135 = vst [vmem:[%s295_s3 + $0x50] sm:$0xff] %v111_v48 }
  0x9e   :  { %139 = vst [vmem:[%s295_s3 + $0x70] sm:$0xff] %v121_v49 }
  0x9f   :  { %128 = vst [vmem:[%s295_s3 + $0x18] sm:$0xff] %v93_v52 }
  0xa0   :  { %132 = vst [vmem:[%s295_s3 + $0x38] sm:$0xff] %v103_v53 }
  0xa2   :  { %v112_v54 = vpop.f32.mrf.mxu2 }
  0xa3   :  { %v122_v55 = vpop.f32.mrf.mxu3  ;;  %v113_v56 = vadd.f32 %v161_v25, %v112_v54 }
  0xa4   :  { %v123_v57 = vadd.f32 %v161_v25, %v122_v55 }
  0xa5   :  { %136 = vst [vmem:[%s295_s3 + $0x58] sm:$0xff] %v113_v56 }
  0xa6   :  { %140 = vst [vmem:[%s295_s3 + $0x78] sm:$0xff] %v123_v57 }

// kernel: _lambda_.7
= control target key start
LH: loop header
LB: loop body
LE: loop exit
PB: predicated region body
PF: predicated region fallthrough
CT: control target
= control target key end

     0   :  { %vm24_vm0 = vcmask 1041408   ;;  %s309_s0 = inlined_call_operand.vmem [shape: f32[2,128], index: 0, kind: input, shape index: {}]   ;;  %s310_s1 = inlined_call_operand.vmem [shape: f32[1,128], index: 1, kind: input, shape index: {}]   ;;  %s311_s2 = inlined_call_operand.vmem [shape: f32[1,128], index: 2, kind: input, shape index: {}]   ;;  %s312_s3 = inlined_call_operand.vmem [shape: bf16[128,128], index: 3, kind: input, shape index: {}]   ;;  %s313_s4 = inlined_call_operand.vmem [shape: f32[1,128], index: 4, kind: input, shape index: {}]   ;;  %s314_s5 = inlined_call_operand.hbm [shape: f32[2,128], index: 5, kind: output, shape index: {}]  }
   0x1   :  { %v21_v0 = vld [vmem:[%s309_s0] sm:$0x3] }
   0x2   :  { %v25_v1 = vsel %vm24_vm0, %v21_v0, 0.0 }
   0x3   :  { %26 = vadd.xlane.f32.xlu0 %v25_v1 }
   0x4   :  { %10 = vsyncpa [#allocation3], 0  ;;  %v236_v2 = vmov 128.0   ;;  %v200_v3 = vld [vmem:[%s312_s3 + $0x38] sm:$0xff]  ;;  %v199_v15 = vld [vmem:[%s312_s3 + $0x30] sm:$0xff]  ;;  %s237_s15 = smov [#allocation2]  }
   0x5   :  { %206 = vrcp.f32 %v236_v2  ;;  %131 = vmatpush.bf16.msra.mxu0 %v200_v3  ;;  %v198_v16 = vld [vmem:[%s312_s3 + $0x28] sm:$0xff]  ;;  %v197_v17 = vld [vmem:[%s312_s3 + $0x20] sm:$0xff]  ;;  %v196_v18 = vld [vmem:[%s312_s3 + $0x18] sm:$0xff]  ;;  %s150_s16 = sshll.u32 %s237_s15, 4  ;;  %s151_s16 = int_to_ptr.vmem [resolvable:$true] %s150_s16 }
   0x6   :  { %v195_v19 = vld [vmem:[%s312_s3 + $0x10] sm:$0xff]  ;;  %v194_v20 = vld [vmem:[%s312_s3 + $0x8] sm:$0xff]  ;;  %v193_v21 = vld [vmem:[%s312_s3] sm:$0xff] }
   0x7   :  { %v203_v31 = vld [vmem:[%s310_s1] ss:$0 sm:$0xff]  ;;  %s152_s1 = sshll.u32 %s314_s5, 4  ;;  %s153_s1 = int_to_ptr.hbm [resolvable:$true] %s152_s1 }
   0x8   :  { %v204_v34 = vld [vmem:[%s311_s2] ss:$0 sm:$0xff] }
   0x9   :  { %132 = vmatpush.bf16.msra.mxu0 %v199_v15  ;;  %v205_v38 = vld [vmem:[%s313_s4] ss:$0 sm:$0xff] }
   0xb   :  { %v207_v4 = vpop.eup %206 }
   0xc   :  { %v29_v5 = vmul.f32 128.0, %v207_v4  ;;  %vm33_vm1 = vweird.f32 %v207_v4 }
   0xd   :  { %133 = vmatpush.bf16.msra.mxu0 %v198_v16 }
   0xe   :  { %v30_v6 = vsub.f32 1.0, %v29_v5 }
  0x10   :  { %v31_v7 = vmul.f32 %v207_v4, %v30_v6 }
  0x11   :  { %134 = vmatpush.bf16.msra.mxu0 %v197_v17 }
  0x12   :  { %v32_v8 = vadd.f32 %v207_v4, %v31_v7 }
  0x14   :  { %v34_v9 = vsel %vm33_vm1, %v207_v4, %v32_v8 }
  0x15   :  { %135 = vmatpush.bf16.msra.mxu0 %v196_v18 }
  0x19   :  { %136 = vmatpush.bf16.msra.mxu0 %v195_v19 }
  0x1d   :  { %137 = vmatpush.bf16.msra.mxu0 %v194_v20 }
  0x21   :  { %138 = vmatpush.bf16.msra.mxu0 %v193_v21 }
  0x76   :  { %v27_v10 = vpop.xlane.xlu0 %26 }
  0x77   :  { %v35_v11 = vmul.f32 %v34_v9, %v27_v10 }
  0x79   :  { %v36_v12 = vsub.f32 %v21_v0, %v35_v11 }
  0x7b   :  { %v37_v13 = vmul.f32 %v36_v12, %v36_v12 }
  0x7d   :  { %v38_v14 = vsel %vm24_vm0, %v37_v13, 0.0 }
  0x7e   :  { %39 = vadd.xlane.f32.xlu0 %v38_v14 }
  0xf1   :  { %v40_v22 = vpop.xlane.xlu0 %39 }
  0xf2   :  { %v41_v23 = vmul.f32 %v40_v22, %v34_v9 }
  0xf4   :  { %v42_v24 = vadd.f32 1e-06, %v41_v23 }
  0xf6   :  { %208 = vrsqrt.f32 %v42_v24  ;;  %vm49_vm3 = vweird.f32 %v42_v24 }
  0xfc   :  { %v209_v25 = vpop.eup %208 }
  0xfd   :  { %v44_v26 = vmul.f32 %v209_v25, %v42_v24  ;;  %vm50_vm2 = vweird.f32 %v209_v25 }
  0xfe   :  { %vm51_vm4 = vmor %vm49_vm3, %vm50_vm2 }
  0xff   :  { %v45_v27 = vmul.f32 %v209_v25, %v44_v26 }
 0x101   :  { %v46_v28 = vmul.f32 0.5, %v45_v27 }
 0x103   :  { %v47_v29 = vsub.f32 1.5, %v46_v28 }
 0x105   :  { %v48_v30 = vmul.f32 %v209_v25, %v47_v29 }
 0x107   :  { %v52_v32 = vsel %vm51_vm4, %v209_v25, %v48_v30 }
 0x108   :  { %v53_v33 = vmul.f32 %v52_v32, %v36_v12 }
 0x10a   :  { %v57_v35 = vmul.f32 %v203_v31, %v53_v33 }
 0x10c   :  { %v61_v36 = vadd.f32 %v204_v34, %v57_v35 }
 0x10e   :  { %v62_v37 = vpack.c.bf16 %v61_v36, %v61_v36 }
 0x110   :  { %139 = vmatmul.bf16.vlgmr.msra.gmra.mxu0 %v62_v37 }
 0x18d   :  { %v140_v39 = vpop.f32.mrf.mxu0 }
 0x18e   :  { %v141_v40 = vadd.f32 %v205_v38, %v140_v39 }
 0x190   :  { %144 = vst [vmem:[#allocation2] sm:$0x3] %v141_v40 }
 0x191   :  { %155 = dma.vmem_to_hbm [thread:$0]  %s151_s16, 32, %s153_s1, [#allocation3]  }
 0x195   :  { %v142_v41 = vpop.f32.mrf.mxu0 }
 0x196   :  { %234 = dma.done.wait [#allocation3], 32  }
 0x197   :  { %235 = vsyncadd [#allocation3], 4294967264 }
 0x198   :  { %160 = vsyncpa [#allocation3], 1 }

// kernel: _lambda_.5
= control target key start
LH: loop header
LB: loop body
LE: loop exit
PB: predicated region body
PF: predicated region fallthrough
CT: control target
= control target key end

     0   :  { %s4482_s25 = smov 0   ;;  %s6580_s0 = inlined_call_operand.vmem [shape: f32[2,72,128], index: 0, kind: input, shape index: {}]   ;;  %s6581_s1 = inlined_call_operand.vmem [shape: f32[1,128], index: 1, kind: input, shape index: {}]   ;;  %s6582_s2 = inlined_call_operand.vmem [shape: f32[1,128], index: 2, kind: input, shape index: {}]   ;;  %s6583_s3 = inlined_call_operand.vmem [shape: bf16[128,384], index: 3, kind: input, shape index: {}]   ;;  %s6584_s4 = inlined_call_operand.vmem [shape: f32[1,384], index: 4, kind: input, shape index: {}]   ;;  %s6585_s5 = inlined_call_operand.vmem [shape: bf16[128,128], index: 5, kind: input, shape index: {}]   ;;  %s6586_s6 = inlined_call_operand.vmem [shape: f32[1,128], index: 6, kind: input, shape index: {}]   ;;  %s6587_s7 = inlined_call_operand.vmem [shape: f32[1,128], index: 7, kind: input, shape index: {}]   ;;  %s6588_s8 = inlined_call_operand.vmem [shape: f32[1,128], index: 8, kind: input, shape index: {}]   ;;  %s6589_s9 = inlined_call_operand.vmem [shape: bf16[128,256], index: 9, kind: input, shape index: {}]   ;;  %s6590_s10 = inlined_call_operand.vmem [shape: f32[1,256], index: 10, kind: input, shape index: {}]   ;;  %s6591_s11 = inlined_call_operand.vmem [shape: bf16[256,128], index: 11, kind: input, shape index: {}]   ;;  %s6592_s12 = inlined_call_operand.vmem [shape: f32[1,128], index: 12, kind: input, shape index: {}]   ;;  %s6593_s13 = inlined_call_operand.vmem [shape: f32[2,72,128], index: 13, kind: output, shape index: {}]  }
   0x1 LB: > { %s3704_s26 = sadd.s32 4294967295, %s4405_s25   ;;  %p3708_p0 = scmp.ge.s32.totalorder %s4405_s25, 1  ;;  %s4405_s25 = sphi %s4482_s25, %s23_s25  }
   0x2   : > { %p387_p1 = scmp.lt.s32.totalorder %s4405_s25, 3 }
   0x4   : > { %p388_p2 = pnand %p3708_p0, %p387_p1 }
   0x5   : > { %p431_p3 = scmp.lt.s32.totalorder (!%p388_p2), %s3704_s26, 1  ;;  %s4408_s28 = smov (!%p388_p2), 96  }
   0x6   : > { %391 = sbr.rel (%p388_p2) target bundleno = 2439 (0x987), region = 72  ;;  %s4409_s29 = smov (!%p388_p2), 32  }
   0x7   : > { %s4410_s14 = smov (!%p388_p2), 64  }
   0xb   : > { %s6621_s26 = smov (!%p431_p3, %s3704_s26), 1  ;;  %v4407_v7 = vmov 128.0   ;;  %v3797_v44 = vld [vmem:[%s6583_s3 + $0xa8] sm:$0xf]  ;;  %v4049_v45 = vld [vmem:[%s6583_s3 + $0xb0] sm:$0xf0] }
   0xc   : > { %s4091_s27 = smul.u32 72, %s6621_s26  ;;  %4172 = vrcp.f32 %v4407_v7  ;;  %v4048_v46 = vld [vmem:[%s6583_s3 + $0xac] sm:$0xf]  ;;  %v3798_v47 = vor.u32 %v4049_v45, %v3797_v44  ;;  %v3799_v48 = vld [vmem:[%s6583_s3 + $0xb4] sm:$0xf0] }
   0xd   : > { %v3805_v49 = vld [vmem:[%s6583_s3 + $0xb0] sm:$0xf]  ;;  %v4050_v50 = vld [vmem:[%s6583_s3 + $0xb8] sm:$0xf0]  ;;  %v3802_v51 = vor.u32 %v4048_v46, %v3799_v48  ;;  %v4045_v55 = vld [vmem:[%s6583_s3 + $0x94] sm:$0xf] }
   0xe   : > { %s4498_s30 = scalar_lea.vmem %s6580_s0, %s4091_s27  ;;  %v3806_v52 = vor.u32 %v4050_v50, %v3805_v49  ;;  %837 = vmatpush.bf16.msra.mxu0 %v3798_v47  ;;  %v3785_v53 = vld [vmem:[%s6583_s3 + $0x90] sm:$0xf]  ;;  %v4046_v54 = vld [vmem:[%s6583_s3 + $0x98] sm:$0xf0]  ;;  %v3787_v57 = vld [vmem:[%s6583_s3 + $0x9c] sm:$0xf0]  ;;  %s6546_s16 = scalar_lea.vmem %s6593_s13, %s4091_s27 }
   0xf   : > { %v444_v0 = vld [vmem:[%s4498_s30 + $0x10] sm:$0xff]  ;;  %v442_v1 = vld [vmem:[%s4498_s30] sm:$0xff]  ;;  %v445_v3 = vld [vmem:[%s4498_s30 + $0x18] sm:$0xff]  ;;  %870 = vmatpush.bf16.msra.mxu1 %v3802_v51  ;;  %v3786_v56 = vor.u32 %v4046_v54, %v3785_v53  ;;  %v3790_v60 = vor.u32 %v4045_v55, %v3787_v57 }
  0x10   : > { %v446_v2 = vld [vmem:[%s4498_s30 + $0x20] sm:$0xff]  ;;  %457 = vadd.xlane.f32.xlu1 %v444_v0  ;;  %453 = vadd.xlane.f32.xlu0 %v442_v1  ;;  %v443_v4 = vld [vmem:[%s4498_s30 + $0x8] sm:$0xff]  ;;  %v448_v6 = vld [vmem:[%s4498_s30 + $0x30] sm:$0xff] }
  0x11   : > { %461 = vadd.xlane.f32.xlu2 %v446_v2  ;;  %v447_v5 = vld [vmem:[%s4498_s30 + $0x28] sm:$0xff]  ;;  %v4523_v29 = vld [vmem:[%s4498_s30 + $0x38] sm:$0xff]  ;;  %v4539_v38 = vld [vmem:[%s4498_s30 + $0x40] sm:$0xff]  ;;  %903 = vmatpush.bf16.msra.mxu2 %v3806_v52 }
  0x12   : > { %v4173_v8 = vpop.eup %4172  ;;  %v3793_v58 = vld [vmem:[%s6583_s3 + $0x98] sm:$0xf]  ;;  %v4047_v59 = vld [vmem:[%s6583_s3 + $0xa0] sm:$0xf0]  ;;  %838 = vmatpush.bf16.msra.mxu0 %v3786_v56  ;;  %v3761_v7 = vld [vmem:[%s6583_s3 + $0x60] sm:$0xf] }
  0x13   : > { %v472_v9 = vmul.f32 128.0, %v4173_v8  ;;  %vm476_vm0 = vweird.f32 %v4173_v8  ;;  %v3794_v61 = vor.u32 %v4047_v59, %v3793_v58  ;;  %871 = vmatpush.bf16.msra.mxu1 %v3790_v60  ;;  %v3773_v62 = vld [vmem:[%s6583_s3 + $0x78] sm:$0xf]  ;;  %v4043_v63 = vld [vmem:[%s6583_s3 + $0x80] sm:$0xf0] }
  0x14   : > { %v3725_v44 = vld [vmem:[%s6583_s3 + $0x18] sm:$0xf]  ;;  %v4031_v45 = vld [vmem:[%s6583_s3 + $0x20] sm:$0xf0]  ;;  %v4030_v46 = vld [vmem:[%s6583_s3 + $0x1c] sm:$0xf] }
  0x15   : > { %v473_v10 = vsub.f32 1.0, %v472_v9  ;;  %904 = vmatpush.bf16.msra.mxu2 %v3794_v61  ;;  %v4039_v9 = vld [vmem:[%s6583_s3 + $0x64] sm:$0xf]  ;;  %v3726_v48 = vor.u32 %v4031_v45, %v3725_v44  ;;  %v3727_v49 = vld [vmem:[%s6583_s3 + $0x24] sm:$0xf0] }
  0x16   : > { %v3733_v50 = vld [vmem:[%s6583_s3 + $0x20] sm:$0xf]  ;;  %v4032_v51 = vld [vmem:[%s6583_s3 + $0x28] sm:$0xf0]  ;;  %v3730_v53 = vor.u32 %v4030_v46, %v3727_v49  ;;  %v4027_v59 = vld [vmem:[%s6583_s3 + $0x4] sm:$0xf] }
  0x17   : > { %v474_v11 = vmul.f32 %v4173_v8, %v473_v10  ;;  %v3734_v54 = vor.u32 %v4032_v51, %v3733_v50  ;;  %v3713_v56 = vld [vmem:[%s6583_s3] sm:$0xf]  ;;  %v4028_v57 = vld [vmem:[%s6583_s3 + $0x8] sm:$0xf0]  ;;  %v3715_v60 = vld [vmem:[%s6583_s3 + $0xc] sm:$0xf0] }
  0x18   : > { %459 = vadd.xlane.f32.xlu1 %v445_v3  ;;  %455 = vadd.xlane.f32.xlu0 %v443_v4  ;;  %v3714_v58 = vor.u32 %v4028_v57, %v3713_v56  ;;  %v3721_v61 = vld [vmem:[%s6583_s3 + $0x8] sm:$0xf]  ;;  %v4729_v49 = vld [vmem:[%s6581_s1] ss:$0 sm:$0xff] }
  0x19   : > { %463 = vadd.xlane.f32.xlu2 %v447_v5  ;;  %v475_v12 = vadd.f32 %v4173_v8, %v474_v11  ;;  %v3763_v11 = vld [vmem:[%s6583_s3 + $0x6c] sm:$0xf0]  ;;  %v4736_v57 = vld [vmem:[%s6582_s2] ss:$0 sm:$0xff] }
  0x1b   : > { %v4507_v13 = vsel %vm476_vm0, %v4173_v8, %v475_v12  ;;  %v4040_v8 = vld [vmem:[%s6583_s3 + $0x68] sm:$0xf0]  ;;  %v3769_v12 = vld [vmem:[%s6583_s3 + $0x68] sm:$0xf] }
  0x1c   : > { %v3762_v10 = vor.u32 %v4040_v8, %v3761_v7 }
  0x21   : > { %465 = vadd.xlane.f32.xlu2 %v448_v6 }
  0x83   : > { %v458_v14 = vpop.xlane.xlu1 %457  ;;  %v454_v15 = vpop.xlane.xlu0 %453 }
  0x84   : > { %v478_v16 = vmul.f32 %v4507_v13, %v454_v15  ;;  %v462_v17 = vpop.xlane.xlu2 %461  ;;  %v480_v28 = vmul.f32 %v4507_v13, %v458_v14  ;;  %v4041_v14 = vld [vmem:[%s6583_s3 + $0x70] sm:$0xf0]  ;;  %v3766_v15 = vor.u32 %v4039_v9, %v3763_v11 }
  0x85   : > { %v482_v37 = vmul.f32 %v4507_v13, %v462_v17  ;;  %v3749_v17 = vld [vmem:[%s6583_s3 + $0x48] sm:$0xf] }
  0x86   : > { %v4510_v18 = vsub.f32 %v442_v1, %v478_v16  ;;  %v4532_v33 = vsub.f32 %v444_v0, %v480_v28  ;;  %v4042_v0 = vld [vmem:[%s6583_s3 + $0x7c] sm:$0xf]  ;;  %v3774_v1 = vor.u32 %v4043_v63, %v3773_v62  ;;  %v3770_v16 = vor.u32 %v4041_v14, %v3769_v12  ;;  %v4029_v63 = vld [vmem:[%s6583_s3 + $0x10] sm:$0xf0] }
  0x87   : > { %v4546_v41 = vsub.f32 %v446_v2, %v482_v37  ;;  %v3775_v2 = vld [vmem:[%s6583_s3 + $0x84] sm:$0xf0]  ;;  %v3745_v37 = vld [vmem:[%s6583_s3 + $0x38] sm:$0xf]  ;;  %v3718_v62 = vor.u32 %v4027_v59, %v3715_v60 }
  0x88   : > { %v496_v19 = vmul.f32 %v4510_v18, %v4510_v18  ;;  %v498_v39 = vmul.f32 %v4532_v33, %v4532_v33  ;;  %839 = vmatpush.bf16.msra.mxu0 %v3774_v1 }
  0x89   : > { %v500_v43 = vmul.f32 %v4546_v41, %v4546_v41 }
  0x8a   : > { %505 = vadd.xlane.f32.xlu0 %v496_v19  ;;  %v4037_v19 = vld [vmem:[%s6583_s3 + $0x50] sm:$0xf0] }
  0x8b   : > { %v460_v20 = vpop.xlane.xlu1 %459  ;;  %v456_v21 = vpop.xlane.xlu0 %455 }
  0x8c   : > { %v481_v22 = vmul.f32 %v4507_v13, %v460_v20  ;;  %v479_v23 = vmul.f32 %v4507_v13, %v456_v21  ;;  %v464_v24 = vpop.xlane.xlu2 %463  ;;  %840 = vmatpush.bf16.msra.mxu0 %v3762_v10  ;;  %v4036_v20 = vld [vmem:[%s6583_s3 + $0x4c] sm:$0xf]  ;;  %v3750_v21 = vor.u32 %v4037_v19, %v3749_v17 }
  0x8d   : > { %v483_v27 = vmul.f32 %v4507_v13, %v464_v24  ;;  %v4038_v24 = vld [vmem:[%s6583_s3 + $0x58] sm:$0xf0] }
  0x8e   : > { %v4516_v25 = vsub.f32 %v445_v3, %v481_v22  ;;  %v4518_v26 = vsub.f32 %v443_v4, %v479_v23  ;;  %v3781_v3 = vld [vmem:[%s6583_s3 + $0x80] sm:$0xf]  ;;  %v4044_v4 = vld [vmem:[%s6583_s3 + $0x88] sm:$0xf0]  ;;  %v3751_v22 = vld [vmem:[%s6583_s3 + $0x54] sm:$0xf0] }
  0x8f   : > { %v4530_v32 = vsub.f32 %v447_v5, %v483_v27  ;;  %v3778_v5 = vor.u32 %v4042_v0, %v3775_v2  ;;  %v3757_v23 = vld [vmem:[%s6583_s3 + $0x50] sm:$0xf]  ;;  %v3754_v27 = vor.u32 %v4036_v20, %v3751_v22  ;;  %v3722_v0 = vor.u32 %v4029_v63, %v3721_v61 }
  0x90   : > { %v499_v30 = vmul.f32 %v4516_v25, %v4516_v25  ;;  %v497_v31 = vmul.f32 %v4518_v26, %v4518_v26  ;;  %v3758_v28 = vor.u32 %v4038_v24, %v3757_v23  ;;  %841 = vmatpush.bf16.msra.mxu0 %v3750_v21 }
  0x91   : > { %v501_v35 = vmul.f32 %v4530_v32, %v4530_v32  ;;  %872 = vmatpush.bf16.msra.mxu1 %v3778_v5 }
  0x92   : > { %511 = vadd.xlane.f32.xlu2 %v499_v30  ;;  %467 = vadd.xlane.f32.xlu0 %v4523_v29  ;;  %v3737_v30 = vld [vmem:[%s6583_s3 + $0x30] sm:$0xf] }
  0x93   : > { %507 = vadd.xlane.f32.xlu1 %v497_v31  ;;  %v4034_v31 = vld [vmem:[%s6583_s3 + $0x38] sm:$0xf0] }
  0x94   : > { %v466_v34 = vpop.xlane.xlu2 %465 }
  0x95   : > { %v484_v36 = vmul.f32 %v4507_v13, %v466_v34  ;;  %873 = vmatpush.bf16.msra.mxu1 %v3766_v15  ;;  %v4033_v34 = vld [vmem:[%s6583_s3 + $0x34] sm:$0xf] }
  0x97   : > { %v4544_v40 = vsub.f32 %v448_v6, %v484_v36  ;;  %v3782_v6 = vor.u32 %v4044_v4, %v3781_v3  ;;  %v3739_v36 = vld [vmem:[%s6583_s3 + $0x3c] sm:$0xf0] }
  0x99   : > { %v502_v42 = vmul.f32 %v4544_v40, %v4544_v40  ;;  %905 = vmatpush.bf16.msra.mxu2 %v3782_v6  ;;  %874 = vmatpush.bf16.msra.mxu1 %v3754_v27 }
  0x9a   : > { %515 = vadd.xlane.f32.xlu2 %v501_v35  ;;  %469 = vadd.xlane.f32.xlu0 %v4539_v38  ;;  %v3738_v35 = vor.u32 %v4034_v31, %v3737_v30 }
  0x9b   : > { %509 = vadd.xlane.f32.xlu1 %v498_v39  ;;  %v4035_v39 = vld [vmem:[%s6583_s3 + $0x40] sm:$0xf0] }
  0x9c   : > { %842 = vmatpush.bf16.msra.mxu0 %v3738_v35 }
  0x9d   : > { %906 = vmatpush.bf16.msra.mxu2 %v3770_v16 }
  0xa0   : > { %843 = vmatpush.bf16.msra.mxu0 %v3726_v48 }
  0xa1   : > { %907 = vmatpush.bf16.msra.mxu2 %v3758_v28 }
  0xa2   : > { %517 = vadd.xlane.f32.xlu0 %v502_v42  ;;  %v3742_v42 = vor.u32 %v4033_v34, %v3739_v36 }
  0xa3   : > { %513 = vadd.xlane.f32.xlu1 %v500_v43  ;;  %v3746_v43 = vor.u32 %v4035_v39, %v3745_v37 }
  0xa4   : > { %875 = vmatpush.bf16.msra.mxu1 %v3742_v42  ;;  %844 = vmatpush.bf16.msra.mxu0 %v3714_v58 }
  0xa5   : > { %908 = vmatpush.bf16.msra.mxu2 %v3746_v43 }
  0xa8   : > { %876 = vmatpush.bf16.msra.mxu1 %v3730_v53 }
  0xa9   : > { %909 = vmatpush.bf16.msra.mxu2 %v3734_v54 }
  0xac   : > { %877 = vmatpush.bf16.msra.mxu1 %v3718_v62 }
  0xad   : > { %910 = vmatpush.bf16.msra.mxu2 %v3722_v0 }
  0xfd   : > { %v506_v47 = vpop.xlane.xlu0 %505 }
  0xfe   : > { %v523_v52 = vmul.f32 %v506_v47, %v4507_v13 }
 0x100   : > { %v532_v55 = vadd.f32 1e-06, %v523_v52 }
 0x102   : > { %4174 = vrsqrt.f32 %v532_v55  ;;  %vm547_vm2 = vweird.f32 %v532_v55 }
 0x105   : > { %v512_v1 = vpop.xlane.xlu2 %511  ;;  %v468_v2 = vpop.xlane.xlu0 %467 }
 0x106   : > { %v526_v3 = vmul.f32 %v512_v1, %v4507_v13  ;;  %v508_v4 = vpop.xlane.xlu1 %507  ;;  %v485_v5 = vmul.f32 %v4507_v13, %v468_v2 }
 0x107   : > { %v524_v6 = vmul.f32 %v508_v4, %v4507_v13 }
 0x108   : > { %v4175_v7 = vpop.eup %4174  ;;  %v4700_v8 = vadd.f32 1e-06, %v526_v3  ;;  %v4703_v9 = vsub.f32 %v4523_v29, %v485_v5 }
 0x109   : > { %v542_v10 = vmul.f32 %v4175_v7, %v532_v55  ;;  %v533_v11 = vadd.f32 1e-06, %v524_v6  ;;  %vm548_vm1 = vweird.f32 %v4175_v7 }
 0x10a   : > { %4176 = vrsqrt.f32 %v4700_v8  ;;  %v503_v12 = vmul.f32 %v4703_v9, %v4703_v9  ;;  %vm549_vm3 = vmor %vm547_vm2, %vm548_vm1  ;;  %vm577_vm9 = vweird.f32 %v4700_v8 }
 0x10b   : > { %v543_v14 = vmul.f32 %v4175_v7, %v542_v10  ;;  %4178 = vrsqrt.f32 %v533_v11  ;;  %vm557_vm4 = vweird.f32 %v533_v11 }
 0x10c   : > { %519 = vadd.xlane.f32.xlu1 %v503_v12 }
 0x10d   : > { %v544_v15 = vmul.f32 0.5, %v543_v14  ;;  %v470_v16 = vpop.xlane.xlu0 %469  ;;  %v516_v17 = vpop.xlane.xlu2 %515 }
 0x10e   : > { %v510_v19 = vpop.xlane.xlu1 %509  ;;  %v486_v20 = vmul.f32 %v4507_v13, %v470_v16  ;;  %v528_v27 = vmul.f32 %v516_v17, %v4507_v13 }
 0x10f   : > { %v545_v21 = vsub.f32 1.5, %v544_v15  ;;  %v525_v29 = vmul.f32 %v510_v19, %v4507_v13 }
 0x110   : > { %v4710_v22 = vpop.eup %4176  ;;  %v4713_v23 = vsub.f32 %v4539_v38, %v486_v20  ;;  %v4720_v38 = vadd.f32 1e-06, %v528_v27 }
 0x111   : > { %v4179_v24 = vpop.eup %4178  ;;  %v534_v28 = vadd.f32 1e-06, %v525_v29  ;;  %v546_v30 = vmul.f32 %v4175_v7, %v545_v21  ;;  %v572_v31 = vmul.f32 %v4710_v22, %v4700_v8  ;;  %vm578_vm10 = vweird.f32 %v4710_v22 }
 0x112   : > { %v552_v34 = vmul.f32 %v4179_v24, %v533_v11  ;;  %v504_v36 = vmul.f32 %v4713_v23, %v4713_v23  ;;  %vm558_vm5 = vweird.f32 %v4179_v24  ;;  %vm579_vm12 = vmor %vm577_vm9, %vm578_vm10  ;;  %vm597_vm15 = vweird.f32 %v4720_v38 }
 0x113   : > { %4180 = vrsqrt.f32 %v534_v28  ;;  %v550_v37 = vsel %vm549_vm3, %v4175_v7, %v546_v30  ;;  %v573_v39 = vmul.f32 %v4710_v22, %v572_v31  ;;  %vm559_vm6 = vmor %vm557_vm4, %vm558_vm5  ;;  %vm567_vm7 = vweird.f32 %v534_v28 }
 0x114   : > { %v553_v35 = vmul.f32 %v4179_v24, %v552_v34  ;;  %521 = vadd.xlane.f32.xlu2 %v504_v36  ;;  %4182 = vrsqrt.f32 %v4720_v38  ;;  %v631_v48 = vmul.f32 %v550_v37, %v4510_v18 }
 0x115   : > { %v574_v50 = vmul.f32 0.5, %v573_v39  ;;  %v518_v37 = vpop.xlane.xlu0 %517 }
 0x116   : > { %v554_v42 = vmul.f32 0.5, %v553_v35  ;;  %v514_v43 = vpop.xlane.xlu1 %513  ;;  %v643_v56 = vmul.f32 %v4729_v49, %v631_v48  ;;  %v529_v39 = vmul.f32 %v518_v37, %v4507_v13 }
 0x117   : > { %v527_v44 = vmul.f32 %v514_v43, %v4507_v13  ;;  %v575_v18 = vsub.f32 1.5, %v574_v50 }
 0x118   : > { %v555_v45 = vsub.f32 1.5, %v554_v42  ;;  %v655_v63 = vadd.f32 %v4736_v57, %v643_v56  ;;  %v538_v42 = vadd.f32 1e-06, %v529_v39 }
 0x119   : > { %v4181_v46 = vpop.eup %4180  ;;  %v536_v47 = vadd.f32 1e-06, %v527_v44  ;;  %v576_v1 = vmul.f32 %v4710_v22, %v575_v18 }
 0x11a   : > { %v556_v51 = vmul.f32 %v4179_v24, %v555_v45  ;;  %v562_v52 = vmul.f32 %v4181_v46, %v534_v28  ;;  %vm568_vm8 = vweird.f32 %v4181_v46  ;;  %v4183_v59 = vpop.eup %4182  ;;  %vm607_vm3 = vweird.f32 %v538_v42 }
 0x11b   : > { %4184 = vrsqrt.f32 %v536_v47  ;;  %vm4741_vm11 = vmor %vm567_vm7, %vm568_vm8  ;;  %v592_v2 = vmul.f32 %v4183_v59, %v4720_v38  ;;  %v580_v8 = vsel %vm579_vm12, %v4710_v22, %v576_v1  ;;  %vm587_vm13 = vweird.f32 %v536_v47 }
 0x11c   : > { %v560_v53 = vsel %vm559_vm6, %v4179_v24, %v556_v51  ;;  %v563_v54 = vmul.f32 %v4181_v46, %v562_v52  ;;  %v634_v14 = vmul.f32 %v580_v8, %v4516_v25  ;;  %vm598_vm0 = vweird.f32 %v4183_v59 }
 0x11d   : > { %v632_v55 = vmul.f32 %v560_v53, %v4518_v26  ;;  %v593_v10 = vmul.f32 %v4183_v59, %v592_v2  ;;  %vm599_vm2 = vmor %vm597_vm15, %vm598_vm0  ;;  %4186 = vrsqrt.f32 %v538_v42  ;;  %vm1246_vm12 = vcmask 1043456  }
 0x11e   : > { %v564_v58 = vmul.f32 0.5, %v563_v54  ;;  %v646_v19 = vmul.f32 %v4729_v49, %v634_v14  ;;  %vm1099_vm15 = vcmask 588800   ;;  %vm2117_vm0 = vcmask 523264  }
 0x11f   : > { %v644_v60 = vmul.f32 %v4729_v49, %v632_v55  ;;  %v594_v15 = vmul.f32 0.5, %v593_v10 }
 0x120   : > { %v565_v61 = vsub.f32 1.5, %v564_v58 }
 0x121   : > { %v4185_v26 = vpop.eup %4184  ;;  %v656_v0 = vadd.f32 %v4736_v57, %v644_v60  ;;  %v595_v20 = vsub.f32 1.5, %v594_v15 }
 0x122   : > { %v566_v3 = vmul.f32 %v4181_v46, %v565_v61  ;;  %v582_v4 = vmul.f32 %v4185_v26, %v536_v47  ;;  %vm588_vm14 = vweird.f32 %v4185_v26 }
 0x123   : > { %v664_v5 = vpack.c.bf16 %v656_v0, %v655_v63  ;;  %vm589_vm1 = vmor %vm587_vm13, %vm588_vm14  ;;  %v596_v22 = vmul.f32 %v4183_v59, %v595_v20  ;;  %vm1050_vm13 = vcmask 261120  }
 0x124   : > { %v570_v6 = vsel %vm4741_vm11, %v4181_v46, %v566_v3  ;;  %v583_v7 = vmul.f32 %v4185_v26, %v582_v4 }
 0x125   : > { %845 = vmatmul.bf16.vlgmr.msra.gmra.mxu0 %v664_v5  ;;  %878 = vmatmul.bf16.vlgmr.msra.gmra.mxu1 %v664_v5  ;;  %v633_v11 = vmul.f32 %v570_v6, %v4532_v33  ;;  %v658_v33 = vadd.f32 %v4736_v57, %v646_v19  ;;  %v600_v27 = vsel %vm599_vm2, %v4183_v59, %v596_v22 }
 0x126   : > { %911 = vmatmul.bf16.vlgmr.msra.gmra.mxu2 %v664_v5  ;;  %v584_v12 = vmul.f32 0.5, %v583_v7  ;;  %v636_v30 = vmul.f32 %v600_v27, %v4530_v32 }
 0x127   : > { %v645_v16 = vmul.f32 %v4729_v49, %v633_v11 }
 0x128   : > { %v585_v17 = vsub.f32 1.5, %v584_v12  ;;  %v648_v34 = vmul.f32 %v4729_v49, %v636_v30 }
 0x129   : > { %v657_v21 = vadd.f32 %v4736_v57, %v645_v16 }
 0x12a   : > { %v586_v29 = vmul.f32 %v4185_v26, %v585_v17  ;;  %v660_v36 = vadd.f32 %v4736_v57, %v648_v34 }
 0x12b   : > { %v665_v25 = vpack.c.bf16 %v658_v33, %v657_v21 }
 0x12c   : > { %v590_v24 = vsel %vm589_vm1, %v4185_v26, %v586_v29  ;;  %vm2127_vm1 = vcmask 785408  }
 0x12d   : > { %v635_v28 = vmul.f32 %v590_v24, %v4546_v41  ;;  %v4187_v41 = vpop.eup %4186 }
 0x12e   : > { %v602_v43 = vmul.f32 %v4187_v41, %v538_v42  ;;  %vm608_vm4 = vweird.f32 %v4187_v41 }
 0x12f   : > { %v647_v31 = vmul.f32 %v4729_v49, %v635_v28  ;;  %vm609_vm5 = vmor %vm607_vm3, %vm608_vm4 }
 0x130   : > { %v603_v32 = vmul.f32 %v4187_v41, %v602_v43 }
 0x131   : > { %v659_v35 = vadd.f32 %v4736_v57, %v647_v31 }
 0x132   : > { %v604_v47 = vmul.f32 0.5, %v603_v32 }
 0x133   : > { %v666_v38 = vpack.c.bf16 %v660_v36, %v659_v35 }
 0x134   : > { %v605_v48 = vsub.f32 1.5, %v604_v47 }
 0x135   : > { %850 = vmatmul.bf16.gmra.mxu0 %v665_v25  ;;  %883 = vmatmul.bf16.gmra.mxu1 %v665_v25 }
 0x136   : > { %916 = vmatmul.bf16.gmra.mxu2 %v665_v25  ;;  %v606_v53 = vmul.f32 %v4187_v41, %v605_v48 }
 0x138   : > { %v610_v18 = vsel %vm609_vm5, %v4187_v41, %v606_v53 }
 0x139   : > { %v637_v60 = vmul.f32 %v610_v18, %v4544_v40 }
 0x13b   : > { %v649_v1 = vmul.f32 %v4729_v49, %v637_v60 }
 0x13d   : > { %v661_v5 = vadd.f32 %v4736_v57, %v649_v1 }
 0x145   : > { %855 = vmatmul.bf16.gmra.mxu0 %v666_v38  ;;  %888 = vmatmul.bf16.gmra.mxu1 %v666_v38 }
 0x146   : > { %921 = vmatmul.bf16.gmra.mxu2 %v666_v38 }
 0x17f   : > { %v520_v44 = vpop.xlane.xlu1 %519 }
 0x180   : > { %v530_v45 = vmul.f32 %v520_v44, %v4507_v13 }
 0x182   : > { %v539_v46 = vadd.f32 1e-06, %v530_v45 }
 0x184   : > { %4188 = vrsqrt.f32 %v539_v46  ;;  %vm617_vm7 = vweird.f32 %v539_v46 }
 0x187   : > { %v522_v50 = vpop.xlane.xlu2 %521 }
 0x188   : > { %v531_v52 = vmul.f32 %v522_v50, %v4507_v13 }
 0x18a   : > { %v4189_v51 = vpop.eup %4188  ;;  %v540_v55 = vadd.f32 1e-06, %v531_v52 }
 0x18b   : > { %v612_v54 = vmul.f32 %v4189_v51, %v539_v46  ;;  %vm618_vm6 = vweird.f32 %v4189_v51 }
 0x18c   : > { %4190 = vrsqrt.f32 %v540_v55  ;;  %vm619_vm8 = vmor %vm617_vm7, %vm618_vm6  ;;  %vm627_vm9 = vweird.f32 %v540_v55 }
 0x18d   : > { %v613_v56 = vmul.f32 %v4189_v51, %v612_v54 }
 0x18f   : > { %v614_v58 = vmul.f32 0.5, %v613_v56 }
 0x191   : > { %v615_v59 = vsub.f32 1.5, %v614_v58 }
 0x192   : > { %v4191_v26 = vpop.eup %4190 }
 0x193   : > { %v616_v61 = vmul.f32 %v4189_v51, %v615_v59  ;;  %v622_v63 = vmul.f32 %v4191_v26, %v540_v55  ;;  %vm628_vm10 = vweird.f32 %v4191_v26 }
 0x194   : > { %vm629_vm11 = vmor %vm627_vm9, %vm628_vm10 }
 0x195   : > { %v620_v62 = vsel %vm619_vm8, %v4189_v51, %v616_v61  ;;  %v623_v2 = vmul.f32 %v4191_v26, %v622_v63 }
 0x196   : > { %v638_v0 = vmul.f32 %v620_v62, %v4703_v9  ;;  %v4777_v9 = vld [vmem:[%s6584_s4] sm:$0x7] }
 0x197   : > { %v624_v4 = vmul.f32 0.5, %v623_v2  ;;  %v4781_v12 = vperm.slane %v4777_v9, 0  ;;  %v4787_v21 = vperm.slane %v4777_v9, 2 }
 0x198   : > { %v650_v3 = vmul.f32 %v4729_v49, %v638_v0 }
 0x199   : > { %v625_v7 = vsub.f32 1.5, %v624_v4 }
 0x19a   : > { %v662_v6 = vadd.f32 %v4736_v57, %v650_v3 }
 0x19b   : > { %v626_v8 = vmul.f32 %v4191_v26, %v625_v7 }
 0x19c   : > { %v667_v40 = vpack.c.bf16 %v662_v6, %v661_v5 }
 0x19d   : > { %v630_v10 = vsel %vm629_vm11, %v4191_v26, %v626_v8 }
 0x19e   : > { %860 = vmatmul.bf16.gmra.mxu0 %v667_v40  ;;  %893 = vmatmul.bf16.gmra.mxu1 %v667_v40  ;;  %v639_v11 = vmul.f32 %v630_v10, %v4713_v23 }
 0x19f   : > { %926 = vmatmul.bf16.gmra.mxu2 %v667_v40 }
 0x1a0   : > { %v651_v15 = vmul.f32 %v4729_v49, %v639_v11 }
 0x1a2   : > { %v846_v14 = vpop.f32.mrf.mxu0  ;;  %v663_v17 = vadd.f32 %v4736_v57, %v651_v15  ;;  %v879_v1 = vpop.f32.mrf.mxu1  ;;  %v704_v15 = vperm.slane %v4777_v9, 1 }
 0x1a3   : > { %v847_v16 = vadd.f32 %v846_v14, %v4781_v12 }
 0x1a4   : > { %v668_v22 = vpack.c.bf16 %v663_v17, %v663_v17 }
 0x1a5   : > { %v936_v19 = vmul.f32 0.17677669, %v847_v16 }
 0x1a7   : > { %v945_v23 = vpack.c.bf16 %v936_v19, %v936_v19 }
 0x1a9   : > { %v912_v20 = vpop.f32.mrf.mxu2  ;;  %v1024_v27 = vunpack.c.l.b16 %v945_v23 }
 0x1aa   : > { %v848_v29 = vpop.f32.mrf.mxu0  ;;  %v913_v24 = vadd.f32 %v912_v20, %v4787_v21  ;;  %v881_v16 = vpop.f32.mrf.mxu1  ;;  %v880_v20 = vadd.f32 %v879_v1, %v704_v15 }
 0x1ab   : > { %v849_v33 = vadd.f32 %v848_v29, %v4781_v12 }
 0x1ac   : > { %v1002_v30 = vpack.c.bf16 %v913_v24, %v913_v24 }
 0x1ad   : > { %v937_v25 = vmul.f32 0.17677669, %v849_v33 }
 0x1ae   : > { %865 = vmatmul.bf16.gmra.mxu0 %v668_v22  ;;  %898 = vmatmul.bf16.gmra.mxu1 %v668_v22  ;;  %v1213_v37 = vunpack.c.l.b16 %v1002_v30 }
 0x1af   : > { %v946_v49 = vpack.c.bf16 %v937_v25, %v937_v25  ;;  %931 = vmatmul.bf16.gmra.mxu2 %v668_v22  ;;  %v882_v22 = vadd.f32 %v881_v16, %v704_v15 }
 0x1b1   : > { %v1025_v28 = vunpack.c.l.b16 %v946_v49  ;;  %v914_v57 = vpop.f32.mrf.mxu2 }
 0x1b2   : > { %v915_v31 = vadd.f32 %v914_v57, %v4787_v21  ;;  %v851_v34 = vpop.f32.mrf.mxu0  ;;  %v884_v33 = vpop.f32.mrf.mxu1 }
 0x1b3   : > { %v4792_v35 = vpack.c.b16 %v1025_v28, %v1024_v27  ;;  %v852_v38 = vadd.f32 %v851_v34, %v4781_v12  ;;  %v885_v9 = vadd.f32 %v884_v33, %v704_v15 }
 0x1b4   : > { %v1003_v36 = vpack.c.bf16 %v915_v31, %v915_v31 }
 0x1b5   : > { %1283 = vrot.lane.b32.xlu1 %v4792_v35, %s4408_s28  ;;  %1761 = vrot.lane.b32.xlu2 %v4792_v35, %s4409_s29  ;;  %v938_v41 = vmul.f32 0.17677669, %v852_v38 }
 0x1b6   : > { %v1214_v39 = vunpack.c.l.b16 %v1003_v36 }
 0x1b7   : > { %v947_v45 = vpack.c.bf16 %v938_v41, %v938_v41 }
 0x1b8   : > { %v4799_v42 = vpack.c.b16 %v1214_v39, %v1213_v37 }
 0x1b9   : > { %v917_v43 = vpop.f32.mrf.mxu2  ;;  %v1026_v48 = vunpack.c.l.b16 %v947_v45 }
 0x1ba   : > { %1457 = vrot.lane.b32.xlu0 %v4799_v42, %s4408_s28  ;;  %v853_v32 = vpop.f32.mrf.mxu0  ;;  %v918_v50 = vadd.f32 %v917_v43, %v4787_v21  ;;  %v886_v23 = vpop.f32.mrf.mxu1 }
 0x1bb   : > { %v854_v44 = vadd.f32 %v853_v32, %v4781_v12  ;;  %v887_v25 = vadd.f32 %v886_v23, %v704_v15 }
 0x1bc   : > { %v1004_v18 = vpack.c.bf16 %v918_v50, %v918_v50 }
 0x1bd   : > { %v939_v46 = vmul.f32 0.17677669, %v854_v44  ;;  %1522 = vrot.lane.b32.xlu1 %v4792_v35, %s4410_s14 }
 0x1be   : > { %v1215_v60 = vunpack.c.l.b16 %v1004_v18 }
 0x1bf   : > { %v948_v47 = vpack.c.bf16 %v939_v46, %v939_v46 }
 0x1c1   : > { %v1027_v51 = vunpack.c.l.b16 %v948_v47  ;;  %v919_v52 = vpop.f32.mrf.mxu2 }
 0x1c2   : > { %v920_v53 = vadd.f32 %v919_v52, %v4787_v21  ;;  %v856_v54 = vpop.f32.mrf.mxu0  ;;  %v889_v24 = vpop.f32.mrf.mxu1 }
 0x1c3   : > { %v4808_v55 = vpack.c.b16 %v1027_v51, %v1026_v48  ;;  %v857_v58 = vadd.f32 %v856_v54, %v4781_v12  ;;  %v890_v49 = vadd.f32 %v889_v24, %v704_v15 }
 0x1c4   : > { %v1005_v56 = vpack.c.bf16 %v920_v53, %v920_v53 }
 0x1c5   : > { %1524 = vrot.lane.b32.xlu1 %v4808_v55, %s4410_s14  ;;  %1285 = vrot.lane.b32.xlu2 %v4808_v55, %s4408_s28  ;;  %v940_v61 = vmul.f32 0.17677669, %v857_v58 }
 0x1c6   : > { %v1216_v59 = vunpack.c.l.b16 %v1005_v56 }
 0x1c7   : > { %v949_v2 = vpack.c.bf16 %v940_v61, %v940_v61 }
 0x1c8   : > { %v4815_v63 = vpack.c.b16 %v1216_v59, %v1215_v60 }
 0x1c9   : > { %v922_v26 = vpop.f32.mrf.mxu2  ;;  %v1028_v5 = vunpack.c.l.b16 %v949_v2 }
 0x1ca   : > { %v858_v62 = vpop.f32.mrf.mxu0  ;;  %v923_v6 = vadd.f32 %v922_v26, %v4787_v21  ;;  %v891_v27 = vpop.f32.mrf.mxu1 }
 0x1cb   : > { %v859_v0 = vadd.f32 %v858_v62, %v4781_v12  ;;  %v892_v28 = vadd.f32 %v891_v27, %v704_v15 }
 0x1cc   : > { %v1006_v14 = vpack.c.bf16 %v923_v6, %v923_v6 }
 0x1cd   : > { %v941_v3 = vmul.f32 0.17677669, %v859_v0  ;;  %1459 = vrot.lane.b32.xlu1 %v4815_v63, %s4408_s28  ;;  %1763 = vrot.lane.b32.xlu2 %v4808_v55, %s4409_s29 }
 0x1ce   : > { %v1217_v19 = vunpack.c.l.b16 %v1006_v14 }
 0x1cf   : > { %v950_v4 = vpack.c.bf16 %v941_v3, %v941_v3 }
 0x1d1   : > { %v1029_v7 = vunpack.c.l.b16 %v950_v4  ;;  %v924_v40 = vpop.f32.mrf.mxu2 }
 0x1d2   : > { %v925_v8 = vadd.f32 %v924_v40, %v4787_v21 }
 0x1d3   : > { %v4824_v10 = vpack.c.b16 %v1029_v7, %v1028_v5 }
 0x1d4   : > { %v1007_v11 = vpack.c.bf16 %v925_v8, %v925_v8 }
 0x1d5   : > { %1526 = vrot.lane.b32.xlu1 %v4824_v10, %s4410_s14  ;;  %1698 = vrot.lane.b32.xlu2 %v4815_v63, %s4410_s14 }
 0x1d6   : > { %v1218_v17 = vunpack.c.l.b16 %v1007_v11 }
 0x1d8   : > { %v4831_v29 = vpack.c.b16 %v1218_v17, %v1217_v19 }
 0x1dc   : > { %954 = vxpose.xlu0.b32.start [1/9] (short) %v880_v20, 128 }
 0x1dd   : > { %1700 = vrot.lane.b32.xlu1 %v4831_v29, %s4410_s14  ;;  %1287 = vrot.lane.b32.xlu2 %v4824_v10, %s4408_s28 }
 0x1e4   : > { %955 = vxpose.xlu0.b32.cont [2/9] (short) %v882_v22, 128 }
 0x1e5   : > { %1765 = vrot.lane.b32.xlu2 %v4824_v10, %s4409_s29 }
 0x1ec   : > { %956 = vxpose.xlu0.b32.cont [3/9] (short) %v885_v9, 128 }
 0x1ed   : > { %1461 = vrot.lane.b32.xlu2 %v4831_v29, %s4408_s28 }
 0x1f4   : > { %957 = vxpose.xlu0.b32.cont [4/9] (short) %v887_v25, 128 }
 0x1fc   : > { %958 = vxpose.xlu0.b32.cont [5/9] (short) %v890_v49, 128 }
 0x204   : > { %959 = vxpose.xlu0.b32.cont [6/9] (short) %v892_v28, 128 }
 0x20f   : > { %v4867_v11 = vpop.permute.xlu2 %1761 }
 0x21b   : > { %v861_v57 = vpop.f32.mrf.mxu0  ;;  %v894_v30 = vpop.f32.mrf.mxu1 }
 0x21c   : > { %v895_v31 = vadd.f32 %v894_v30, %v704_v15  ;;  %v862_v34 = vadd.f32 %v861_v57, %v4781_v12 }
 0x21e   : > { %960 = vxpose.xlu0.b32.cont [7/9] (short) %v895_v31, 128  ;;  %v942_v36 = vmul.f32 0.17677669, %v862_v34 }
 0x220   : > { %v951_v32 = vpack.c.bf16 %v942_v36, %v942_v36 }
 0x222   : > { %v927_v38 = vpop.f32.mrf.mxu2  ;;  %v1030_v46 = vunpack.c.l.b16 %v951_v32 }
 0x223   : > { %v863_v37 = vpop.f32.mrf.mxu0  ;;  %v896_v39 = vpop.f32.mrf.mxu1  ;;  %v928_v47 = vadd.f32 %v927_v38, %v4787_v21 }
 0x224   : > { %v864_v41 = vadd.f32 %v863_v37, %v4781_v12  ;;  %v897_v43 = vadd.f32 %v896_v39, %v704_v15 }
 0x225   : > { %v1008_v59 = vpack.c.bf16 %v928_v47, %v928_v47 }
 0x226   : > { %v943_v44 = vmul.f32 0.17677669, %v864_v41  ;;  %961 = vxpose.xlu0.b32.cont [8/9] (short) %v897_v43, 128 }
 0x227   : > { %v1219_v26 = vunpack.c.l.b16 %v1008_v59  ;;  %v4883_v16 = vpop.permute.xlu1 %1283 }
 0x228   : > { %v952_v45 = vpack.c.bf16 %v943_v44, %v943_v44 }
 0x22a   : > { %v1031_v48 = vunpack.c.l.b16 %v952_v45  ;;  %v929_v50 = vpop.f32.mrf.mxu2 }
 0x22b   : > { %v930_v51 = vadd.f32 %v929_v50, %v4787_v21  ;;  %v866_v52 = vpop.f32.mrf.mxu0  ;;  %v899_v53 = vpop.f32.mrf.mxu1 }
 0x22c   : > { %v4845_v54 = vpack.c.b16 %v1031_v48, %v1030_v46  ;;  %v867_v56 = vadd.f32 %v866_v52, %v4781_v12  ;;  %v900_v18 = vadd.f32 %v899_v53, %v704_v15  ;;  %v1458_v25 = vpop.permute.xlu0 %1457 }
 0x22d   : > { %v1009_v58 = vpack.c.bf16 %v930_v51, %v930_v51 }
 0x22e   : > { %962 = vxpose.xlu0.b32.end [9/9] (short) %v900_v18, 128  ;;  %1767 = vrot.lane.b32.xlu2 %v4845_v54, %s4409_s29  ;;  %v944_v61 = vmul.f32 0.17677669, %v867_v56 }
 0x22f   : > { %1289 = vrot.lane.b32.xlu1 %v4845_v54, %s4408_s28  ;;  %v1220_v60 = vunpack.c.l.b16 %v1009_v58  ;;  %v4887_v19 = vpop.permute.xlu1 %1522 }
 0x230   : > { %v953_v3 = vpack.c.bf16 %v944_v61, %v944_v61 }
 0x231   : > { %v4852_v2 = vpack.c.b16 %v1220_v60, %v1219_v26 }
 0x232   : > { %v932_v62 = vpop.f32.mrf.mxu2  ;;  %v1032_v12 = vunpack.c.l.b16 %v953_v3 }
 0x233   : > { %v868_v0 = vpop.f32.mrf.mxu0  ;;  %v901_v1 = vpop.f32.mrf.mxu1  ;;  %v933_v4 = vadd.f32 %v932_v62, %v4787_v21 }
 0x234   : > { %v4859_v6 = vpack.c.b16 %v1032_v12, %v1032_v12  ;;  %v4873_v21 = vpop.permute.xlu2 %1285 }
 0x235   : > { %v1010_v7 = vpack.c.bf16 %v933_v4, %v933_v4 }
 0x236   : > { %1702 = vrot.lane.b32.xlu2 %v4852_v2, %s4410_s14 }
 0x237   : > { %1528 = vrot.lane.b32.xlu1 %v4845_v54, %s4410_s14  ;;  %v1221_v40 = vunpack.c.l.b16 %v1010_v7  ;;  %v4891_v33 = vpop.permute.xlu1 %1524 }
 0x239   : > { %v4865_v8 = vpack.c.b16 %v1221_v40, %v1221_v40 }
 0x23a   : > { %v934_v5 = vpop.f32.mrf.mxu2 }
 0x23b   : > { %v1248_v56 = vsel %vm1246_vm12, %v4865_v8, 0 }
 0x23c   : > { %v4879_v14 = vpop.permute.xlu2 %1763 }
 0x23e   : > { %1291 = vrot.lane.b32.xlu2 %v4859_v6, %s4408_s28 }
 0x23f   : > { %1463 = vrot.lane.b32.xlu1 %v4852_v2, %s4408_s28  ;;  %v1460_v9 = vpop.permute.xlu1 %1459 }
 0x244   : > { %v4881_v15 = vpop.permute.xlu2 %1698 }
 0x246   : > { %1465 = vrot.lane.b32.xlu2 %v4865_v8, %s4408_s28 }
 0x247   : > { %1530 = vrot.lane.b32.xlu1 %v4859_v6, %s4410_s14  ;;  %v4895_v24 = vpop.permute.xlu1 %1526 }
 0x24c   : > { %v4885_v17 = vpop.permute.xlu2 %1287 }
 0x24f   : > { %1769 = vrot.lane.b32.xlu1 %v4859_v6, %s4409_s29  ;;  %v4901_v57 = vpop.permute.xlu1 %1700 }
 0x254   : > { %v4889_v20 = vpop.permute.xlu2 %1765 }
 0x257   : > { %1943 = vrot.lane.b32.xlu1 %v4865_v8, %s4409_s29 }
 0x25c   : > { %v1462_v22 = vpop.permute.xlu2 %1461 }
 0x288   : > { %v4893_v23 = vpop.permute.xlu2 %1767 }
 0x290   : > { %v4897_v49 = vpop.permute.xlu2 %1702 }
 0x292   : > { %v970_v27 = vpop.trf.xlu0 }
 0x293   : > { %v986_v44 = vpack.c.bf16 %v970_v27, %v970_v27 }
 0x295   : > { %v1042_v50 = vunpack.c.l.b16 %v986_v44 }
 0x298   : > { %v4899_v28 = vpop.permute.xlu2 %1291 }
 0x29a   : > { %v971_v30 = vpop.trf.xlu0 }
 0x29b   : > { %v987_v43 = vpack.c.bf16 %v971_v30, %v971_v30 }
 0x29d   : > { %v1043_v47 = vunpack.c.l.b16 %v987_v43 }
 0x29f   : > { %v1046_v53 = vpack.c.b16 %v1043_v47, %v1042_v50 }
 0x2a0   : > { %v1466_v31 = vpop.permute.xlu2 %1465 }
 0x2a1   : > { %v4903_v34 = vpop.permute.xlu1 %1289  ;;  %v1487_v36 = vsel %vm1246_vm12, %v1466_v31, 0 }
 0x2a2   : > { %1492 = vmatpush.bf16.msrb.mxu1 %v1487_v36  ;;  %v972_v38 = vpop.trf.xlu0 }
 0x2a3   : > { %v988_v37 = vpack.c.bf16 %v972_v38, %v972_v38 }
 0x2a5   : > { %v1044_v45 = vunpack.c.l.b16 %v988_v37 }
 0x2a9   : > { %v4906_v39 = vpop.permute.xlu1 %1528 }
 0x2aa   : > { %v973_v41 = vpop.trf.xlu0 }
 0x2ab   : > { %v989_v32 = vpack.c.bf16 %v973_v41, %v973_v41 }
 0x2ad   : > { %v1045_v46 = vunpack.c.l.b16 %v989_v32 }
 0x2af   : > { %v1047_v48 = vpack.c.b16 %v1045_v46, %v1044_v45 }
 0x2b1   : > { %v1464_v51 = vpop.permute.xlu1 %1463  ;;  %1072 = vmatpush.bf16.msra.mxu3 %v1047_v48 }
 0x2b2   : > { %1493 = vmatpush.bf16.msrb.mxu1 %v1464_v51  ;;  %v974_v52 = vpop.trf.xlu0 }
 0x2b3   : > { %v990_v3 = vpack.c.bf16 %v974_v52, %v974_v52 }
 0x2b5   : > { %1073 = vmatpush.bf16.msra.mxu3 %v1046_v53  ;;  %v1297_v40 = vunpack.c.l.b16 %v990_v3 }
 0x2b6   : > { %1494 = vmatpush.bf16.msrb.mxu1 %v1462_v22 }
 0x2b8   : > { %3807 = vmatmul.msk.bf16.vlgmr.msra.gmra.mxu3 %vm1050_vm13, %v4792_v35 }
 0x2b9   : > { %1253 = vmatpush.bf16.msrb.mxu3 %v1248_v56  ;;  %v4912_v18 = vpop.permute.xlu1 %1530 }
 0x2ba   : > { %1495 = vmatpush.bf16.msrb.mxu1 %v1460_v9  ;;  %v975_v58 = vpop.trf.xlu0 }
 0x2bb   : > { %v991_v0 = vpack.c.bf16 %v975_v58, %v975_v58 }
 0x2bd   : > { %1254 = vmatpush.bf16.msrb.mxu3 %v4852_v2  ;;  %v1298_v5 = vunpack.c.l.b16 %v991_v0 }
 0x2be   : > { %1496 = vmatpush.bf16.msrb.mxu1 %v1458_v25 }
 0x2bf   : > { %v1301_v9 = vpack.c.b16 %v1298_v5, %v1297_v40 }
 0x2c1   : > { %1255 = vmatpush.bf16.msrb.mxu3 %v4831_v29  ;;  %v4916_v59 = vpop.permute.xlu1 %1769 }
 0x2c2   : > { %v976_v60 = vpop.trf.xlu0 }
 0x2c3   : > { %v992_v35 = vpack.c.bf16 %v976_v60, %v976_v60 }
 0x2c5   : > { %1256 = vmatpush.bf16.msrb.mxu3 %v4815_v63  ;;  %v1299_v12 = vunpack.c.l.b16 %v992_v35 }
 0x2c8   : > { %3808 = vmatmul.msk.bf16.gmra.mxu3 %vm1050_vm13, %v4808_v55 }
 0x2c9   : > { %1257 = vmatpush.bf16.msrb.mxu3 %v4799_v42  ;;  %v1944_v61 = vpop.permute.xlu1 %1943 }
 0x2ca   : > { %v1965_v26 = vsel %vm1246_vm12, %v1944_v61, 0  ;;  %v977_v62 = vpop.trf.xlu0 }
 0x2cb   : > { %1970 = vmatpush.bf16.msra.mxu1 %v1965_v26  ;;  %v993_v1 = vpack.c.bf16 %v977_v62, %v977_v62 }
 0x2cd   : > { %v1300_v4 = vunpack.c.l.b16 %v993_v1 }
 0x2cf   : > { %v1302_v7 = vpack.c.b16 %v1300_v4, %v1299_v12 }
 0x2d1   : > { %1326 = vmatpush.bf16.msrb.mxu0 %v1302_v7 }
 0x2d2   : > { %v978_v22 = vpop.trf.xlu0 }
 0x2d3   : > { %v994_v30 = vpack.c.bf16 %v978_v22, %v978_v22 }
 0x2d4   : > { %1941 = vrot.lane.b32.xlu0 %v4852_v2, %s4409_s29 }
 0x2d5   : > { %1327 = vmatpush.bf16.msrb.mxu0 %v1301_v9  ;;  %v1536_v37 = vunpack.c.l.b16 %v994_v30 }
 0x2d8   : > { %3809 = vmatmul.msk.bf16.gmra.mxu3 %vm1050_vm13, %v4824_v10  ;;  %3817 = vmatmul.msk.bf16.vlgmr.msrb.gmra.mxu0 %vm1050_vm13, %v4883_v16 }
 0x2da   : > { %v979_v55 = vpop.trf.xlu0 }
 0x2db   : > { %v995_v31 = vpack.c.bf16 %v979_v55, %v979_v55 }
 0x2dc   : > { %1704 = vrot.lane.b32.xlu0 %v4865_v8, %s4410_s14 }
 0x2dd   : > { %v1537_v16 = vunpack.c.l.b16 %v995_v31 }
 0x2df   : > { %v1540_v8 = vpack.c.b16 %v1537_v16, %v1536_v37 }
 0x2e2   : > { %v980_v25 = vpop.trf.xlu0 }
 0x2e3   : > { %v996_v27 = vpack.c.bf16 %v980_v25, %v980_v25 }
 0x2e5   : > { %v1538_v36 = vunpack.c.l.b16 %v996_v27 }
 0x2e8   : > { %3810 = vmatmul.msk.bf16.gmra.mxu3 %vm1050_vm13, %v4845_v54  ;;  %3818 = vmatmul.msk.bf16.gmra.mxu0 %vm1050_vm13, %v4873_v21 }
 0x2ea   : > { %v981_v2 = vpop.trf.xlu0 }
 0x2eb   : > { %v997_v10 = vpack.c.bf16 %v981_v2, %v981_v2 }
 0x2ed   : > { %v1539_v38 = vunpack.c.l.b16 %v997_v10 }
 0x2ef   : > { %v1541_v41 = vpack.c.b16 %v1539_v38, %v1538_v36 }
 0x2f1   : > { %1565 = vmatpush.bf16.msrb.mxu2 %v1541_v41 }
 0x2f2   : > { %v982_v43 = vpop.trf.xlu0 }
 0x2f3   : > { %v998_v44 = vpack.c.bf16 %v982_v43, %v982_v43 }
 0x2f5   : > { %1566 = vmatpush.bf16.msrb.mxu2 %v1540_v8  ;;  %v1775_v48 = vunpack.c.l.b16 %v998_v44 }
 0x2f8   : > { %3811 = vmatmul.msk.bf16.gmra.mxu3 %vm1050_vm13, %v4859_v6  ;;  %3819 = vmatmul.msk.bf16.gmra.mxu0 %vm1050_vm13, %v4885_v17 }
 0x2f9   : > { %3827 = vmatmul.msk.bf16.vlgmr.msrb.gmra.mxu2 %vm1050_vm13, %v4887_v19  ;;  %v1011_v19 = vlaneseq }
 0x2fa   : > { %v983_v54 = vpop.trf.xlu0 }
 0x2fb   : > { %v999_v45 = vpack.c.bf16 %v983_v54, %v983_v54 }
 0x2fd   : > { %v1776_v50 = vunpack.c.l.b16 %v999_v45 }
 0x2ff   : > { %v1779_v52 = vpack.c.b16 %v1776_v50, %v1775_v48 }
 0x302   : > { %v984_v21 = vpop.trf.xlu0 }
 0x303   : > { %v1000_v32 = vpack.c.bf16 %v984_v21, %v984_v21 }
 0x305   : > { %v1777_v47 = vunpack.c.l.b16 %v1000_v32 }
 0x308   : > { %3820 = vmatmul.msk.bf16.gmra.mxu0 %vm1050_vm13, %v4903_v34  ;;  %v4411_v34 = vmov -1e+30  }
 0x309   : > { %3828 = vmatmul.msk.bf16.gmra.mxu2 %vm1050_vm13, %v4891_v33  ;;  %v1012_v33 = vand.u32 127, %v1011_v19 }
 0x30a   : > { %v985_v46 = vpop.trf.xlu0 }
 0x30b   : > { %v1001_v6 = vpack.c.bf16 %v985_v46, %v985_v46  ;;  %vm1013_vm14 = vcmp.lt.s32.totalorder %v1012_v33, 65 }
 0x30d   : > { %v1778_v17 = vunpack.c.l.b16 %v1001_v6 }
 0x30f   : > { %v1780_v51 = vpack.c.b16 %v1778_v17, %v1777_v47 }
 0x311   : > { %1804 = vmatpush.bf16.msra.mxu0 %v1780_v51 }
 0x315   : > { %1805 = vmatpush.bf16.msra.mxu0 %v1779_v52 }
 0x318   : > { %3821 = vmatmul.msk.bf16.gmra.mxu0 %vm1050_vm13, %v4899_v28  ;;  %v4957_v28 = vsel %vm1013_vm14, 0.0, %v4411_v34 }
 0x319   : > { %3829 = vmatmul.msk.bf16.gmra.mxu2 %vm1050_vm13, %v4895_v24 }
 0x328   : > { %3837 = vmatmul.msk.bf16.vlgmr.msra.gmra.mxu0 %vm1050_vm13, %v4867_v11 }
 0x329   : > { %3830 = vmatmul.msk.bf16.gmra.mxu2 %vm1050_vm13, %v4906_v39 }
 0x338   : > { %3838 = vmatmul.msk.bf16.gmra.mxu0 %vm1050_vm13, %v4879_v14 }
 0x339   : > { %3831 = vmatmul.msk.bf16.gmra.mxu2 %vm1050_vm13, %v4912_v18 }
 0x33b   : > { %v1075_v53 = vpop.f32.mrf.mxu3 }
 0x33c   : > { %v4960_v24 = vadd.f32 %v1075_v53, %v4957_v28 }
 0x33e   : > { %v1100_v11 = vsel %vm1099_vm15, %v4960_v24, -inf }
 0x33f   : > { %1101 = vmax.xlane.f32.xlu2 %v1100_v11 }
 0x343   : > { %v1077_v39 = vpop.f32.mrf.mxu3 }
 0x344   : > { %v4965_v56 = vadd.f32 %v1077_v39, %v4957_v28 }
 0x346   : > { %v1942_v14 = vpop.permute.xlu0 %1941  ;;  %v1103_v18 = vsel %vm1099_vm15, %v4965_v56, -inf }
 0x347   : > { %1104 = vmax.xlane.f32.xlu1 %v1103_v18  ;;  %1971 = vmatpush.bf16.msra.mxu1 %v1942_v14 }
 0x348   : > { %3839 = vmatmul.msk.bf16.gmra.mxu0 %vm1050_vm13, %v4889_v20 }
 0x34b   : > { %v1080_v58 = vpop.f32.mrf.mxu3 }
 0x34c   : > { %v4972_v60 = vadd.f32 %v1080_v58, %v4957_v28 }
 0x34e   : > { %v1705_v35 = vpop.permute.xlu0 %1704  ;;  %v1106_v61 = vsel %vm1099_vm15, %v4972_v60, -inf }
 0x34f   : > { %v1726_v26 = vsel %vm1246_vm12, %v1705_v35, 0  ;;  %1107 = vmax.xlane.f32.xlu2 %v1106_v61 }
 0x350   : > { %1731 = vmatpush.bf16.msra.mxu3 %v1726_v26 }
 0x353   : > { %v1082_v62 = vpop.f32.mrf.mxu3 }
 0x354   : > { %v4978_v0 = vadd.f32 %v1082_v62, %v4957_v28  ;;  %1732 = vmatpush.bf16.msra.mxu3 %v4897_v49 }
 0x355   : > { %v1329_v1 = vpop.f32.mrf.mxu0 }
 0x356   : > { %v4982_v20 = vadd.f32 %v1329_v1, %v4957_v28  ;;  %v1109_v3 = vsel %vm1099_vm15, %v4978_v0, -inf }
 0x357   : > { %1110 = vmax.xlane.f32.xlu2 %v1109_v3 }
 0x358   : > { %1733 = vmatpush.bf16.msra.mxu3 %v4901_v57  ;;  %3840 = vmatmul.msk.bf16.gmra.mxu0 %vm1050_vm13, %v4893_v23  ;;  %v1353_v12 = vsel %vm1099_vm15, %v4982_v20, -inf }
 0x359   : > { %1354 = vmax.xlane.f32.xlu0 %v1353_v12 }
 0x35b   : > { %v1085_v4 = vpop.f32.mrf.mxu3 }
 0x35c   : > { %v4992_v49 = vadd.f32 %v1085_v4, %v4957_v28  ;;  %1734 = vmatpush.bf16.msra.mxu3 %v4881_v15 }
 0x35d   : > { %v1331_v5 = vpop.f32.mrf.mxu0 }
 0x35e   : > { %v1112_v7 = vsel %vm1099_vm15, %v4992_v49, -inf  ;;  %v4998_v57 = vadd.f32 %v1331_v5, %v4957_v28 }
 0x35f   : > { %1113 = vmax.xlane.f32.xlu2 %v1112_v7 }
 0x360   : > { %v1356_v22 = vsel %vm1099_vm15, %v4998_v57, -inf }
 0x363   : > { %v1087_v40 = vpop.f32.mrf.mxu3 }
 0x364   : > { %v5005_v9 = vadd.f32 %v1087_v40, %v4957_v28 }
 0x365   : > { %v1334_v23 = vpop.f32.mrf.mxu0 }
 0x366   : > { %v1115_v27 = vsel %vm1099_vm15, %v5005_v9, -inf  ;;  %v5015_v30 = vadd.f32 %v1334_v23, %v4957_v28 }
 0x367   : > { %1357 = vmax.xlane.f32.xlu2 %v1356_v22 }
 0x368   : > { %3841 = vmatmul.msk.bf16.gmra.mxu0 %vm1050_vm13, %v4916_v59  ;;  %v1359_v10 = vsel %vm1099_vm15, %v5015_v30, -inf }
 0x36b   : > { %v1090_v15 = vpop.f32.mrf.mxu3 }
 0x36c   : > { %v5025_v37 = vadd.f32 %v1090_v15, %v4957_v28 }
 0x36d   : > { %v1336_v55 = vpop.f32.mrf.mxu0 }
 0x36e   : > { %v5008_v25 = vadd.f32 %v1336_v55, %v4957_v28  ;;  %v1118_v54 = vsel %vm1099_vm15, %v5025_v37, -inf }
 0x36f   : > { %1116 = vmax.xlane.f32.xlu2 %v1115_v27 }
 0x370   : > { %v1362_v2 = vsel %vm1099_vm15, %v5008_v25, -inf }
 0x371   : > { %1363 = vmax.xlane.f32.xlu1 %v1362_v2 }
 0x373   : > { %v1092_v59 = vpop.f32.mrf.mxu3 }
 0x374   : > { %v5018_v31 = vadd.f32 %v1092_v59, %v4957_v28 }
 0x375   : > { %v1339_v36 = vpop.f32.mrf.mxu0 }
 0x376   : > { %v1121_v38 = vsel %vm1099_vm15, %v5018_v31, -inf  ;;  %v5035_v32 = vadd.f32 %v1339_v36, %v4957_v28 }
 0x377   : > { %1360 = vmax.xlane.f32.xlu2 %v1359_v10 }
 0x378   : > { %v1365_v6 = vsel %vm1099_vm15, %v5035_v32, -inf }
 0x379   : > { %1122 = vmax.xlane.f32.xlu1 %v1121_v38 }
 0x37b   : > { %v1095_v16 = vpop.f32.mrf.mxu3 }
 0x37c   : > { %v5028_v41 = vadd.f32 %v1095_v16, %v4957_v28  ;;  %v1568_v43 = vpop.f32.mrf.mxu2 }
 0x37d   : > { %v1341_v8 = vpop.f32.mrf.mxu0  ;;  %v5045_v50 = vadd.f32 %v1568_v43, %v4957_v28 }
 0x37e   : > { %v1124_v21 = vsel %vm1099_vm15, %v5028_v41, -inf  ;;  %v5050_v19 = vadd.f32 %v1341_v8, %v4957_v28 }
 0x37f   : > { %1119 = vmax.xlane.f32.xlu2 %v1118_v54  ;;  %1125 = vmax.xlane.f32.xlu0 %v1124_v21  ;;  %v1592_v52 = vsel %vm1099_vm15, %v5045_v50, -inf }
 0x380   : > { %v1368_v11 = vsel %vm1099_vm15, %v5050_v19, -inf }
 0x383   : > { %v1097_v44 = vpop.f32.mrf.mxu3 }
 0x384   : > { %v1570_v45 = vpop.f32.mrf.mxu2 }
 0x385   : > { %v1344_v46 = vpop.f32.mrf.mxu0  ;;  %v5060_v14 = vadd.f32 %v1570_v45, %v4957_v28 }
 0x386   : > { %v5038_v47 = vadd.f32 %v1344_v46, %v4957_v28 }
 0x387   : > { %1366 = vmax.xlane.f32.xlu2 %v1365_v6  ;;  %v1595_v26 = vsel %vm1099_vm15, %v5060_v14, -inf }
 0x388   : > { %v1371_v48 = vsel %vm1099_vm15, %v5038_v47, -inf }
 0x389   : > { %1372 = vmax.xlane.f32.xlu1 %v1371_v48 }
 0x38c   : > { %v1573_v17 = vpop.f32.mrf.mxu2 }
 0x38d   : > { %v1346_v51 = vpop.f32.mrf.mxu0  ;;  %v5075_v3 = vadd.f32 %v1573_v17, %v4957_v28 }
 0x38e   : > { %v5085_v23 = vadd.f32 %v1346_v51, %v4957_v28 }
 0x38f   : > { %1593 = vmax.xlane.f32.xlu2 %v1592_v52  ;;  %v1598_v7 = vsel %vm1099_vm15, %v5075_v3, -inf }
 0x390   : > { %v1374_v55 = vsel %vm1099_vm15, %v5085_v23, -inf }
 0x394   : > { %v1575_v33 = vpop.f32.mrf.mxu2 }
 0x395   : > { %v5053_v34 = vadd.f32 %v1575_v33, %v4957_v28  ;;  %v1349_v53 = vpop.f32.mrf.mxu0 }
 0x396   : > { %v5063_v18 = vadd.f32 %v1349_v53, %v4957_v28 }
 0x397   : > { %v1601_v39 = vsel %vm1099_vm15, %v5053_v34, -inf  ;;  %1369 = vmax.xlane.f32.xlu2 %v1368_v11 }
 0x398   : > { %1602 = vmax.xlane.f32.xlu1 %v1601_v39  ;;  %v1377_v1 = vsel %vm1099_vm15, %v5063_v18, -inf }
 0x39c   : > { %v1578_v58 = vpop.f32.mrf.mxu2 }
 0x39d   : > { %v5066_v35 = vadd.f32 %v1578_v58, %v4957_v28  ;;  %v1351_v61 = vpop.f32.mrf.mxu0 }
 0x39f   : > { %v1604_v62 = vsel %vm1099_vm15, %v5066_v35, -inf  ;;  %1596 = vmax.xlane.f32.xlu2 %v1595_v26 }
 0x3a0   : > { %1605 = vmax.xlane.f32.xlu0 %v1604_v62  ;;  %1378 = vmax.xlane.f32.xlu1 %v1377_v1 }
 0x3a4   : > { %v1580_v12 = vpop.f32.mrf.mxu2 }
 0x3a5   : > { %v1807_v4 = vpop.f32.mrf.mxu0  ;;  %v5090_v27 = vadd.f32 %v1580_v12, %v4957_v28 }
 0x3a6   : > { %v5078_v5 = vadd.f32 %v1807_v4, %v4957_v28 }
 0x3a7   : > { %1599 = vmax.xlane.f32.xlu2 %v1598_v7  ;;  %v1607_v16 = vsel %vm1099_vm15, %v5090_v27, -inf }
 0x3a8   : > { %v1831_v40 = vsel %vm1099_vm15, %v5078_v5, -inf }
 0x3a9   : > { %1832 = vmax.xlane.f32.xlu0 %v1831_v40 }
 0x3ac   : > { %v1583_v22 = vpop.f32.mrf.mxu2 }
 0x3ad   : > { %v1809_v15 = vpop.f32.mrf.mxu0  ;;  %v5101_v8 = vadd.f32 %v1583_v22, %v4957_v28 }
 0x3ae   : > { %v5119_v52 = vadd.f32 %v1809_v15, %v4957_v28 }
 0x3af   : > { %1375 = vmax.xlane.f32.xlu2 %v1374_v55  ;;  %v1610_v48 = vsel %vm1099_vm15, %v5101_v8, -inf }
 0x3b0   : > { %v1834_v62 = vsel %vm1099_vm15, %v5119_v52, -inf }
 0x3b2   : > { %v1102_v2 = vpop.xlane.xlu2 %1101 }
 0x3b3   : > { %v1127_v38 = vsub.f32 %v4960_v24, %v1102_v2 }
 0x3b4   : > { %v1585_v59 = vpop.f32.mrf.mxu2 }
 0x3b5   : > { %v5093_v36 = vadd.f32 %v1585_v59, %v4957_v28  ;;  %v1812_v10 = vpop.f32.mrf.mxu0  ;;  %v1136_v54 = vmul.f32 1.442695, %v1127_v38 }
 0x3b6   : > { %v5104_v21 = vadd.f32 %v1812_v10, %v4957_v28 }
 0x3b7   : > { %v1613_v43 = vsel %vm1099_vm15, %v5093_v36, -inf  ;;  %1608 = vmax.xlane.f32.xlu2 %v1607_v16  ;;  %4192 = vpow2.f32 %v1136_v54 }
 0x3b8   : > { %1614 = vmax.xlane.f32.xlu1 %v1613_v43  ;;  %v1837_v17 = vsel %vm1099_vm15, %v5104_v21, -inf }
 0x3ba   : > { %v1105_v44 = vpop.xlane.xlu1 %1104 }
 0x3bb   : > { %v1128_v24 = vsub.f32 %v4965_v56, %v1105_v44 }
 0x3bc   : > { %v5106_v45 = vpop.f32.mrf.mxu2 }
 0x3bd   : > { %v1814_v46 = vpop.f32.mrf.mxu0  ;;  %v1138_v33 = vmul.f32 1.442695, %v1128_v24  ;;  %v5122_v11 = vpop.eup %4192 }
 0x3be   : > { %v5110_v6 = vadd.f32 %v1814_v46, %v4957_v28  ;;  %v1154_v1 = vsel %vm1099_vm15, %v5122_v11, 0.0 }
 0x3bf   : > { %1611 = vmax.xlane.f32.xlu2 %v1610_v48  ;;  %4194 = vpow2.f32 %v1138_v33 }
 0x3c0   : > { %1838 = vmax.xlane.f32.xlu1 %v1837_v17  ;;  %v1840_v51 = vsel %vm1099_vm15, %v5110_v6, -inf }
 0x3c1   : > { %1841 = vmax.xlane.f32.xlu0 %v1840_v51 }
 0x3c2   : > { %v1108_v56 = vpop.xlane.xlu2 %1107 }
 0x3c3   : > { %v1129_v53 = vsub.f32 %v4972_v60, %v1108_v56 }
 0x3c4   : > { %v1590_v39 = vpop.f32.mrf.mxu2 }
 0x3c5   : > { %v1140_v58 = vmul.f32 1.442695, %v1129_v53  ;;  %v1817_v61 = vpop.f32.mrf.mxu0  ;;  %v5134_v7 = vpop.eup %4194 }
 0x3c6   : > { %v5125_v26 = vadd.f32 %v1817_v61, %v4957_v28  ;;  %v1157_v38 = vsel %vm1099_vm15, %v5134_v7, 0.0 }
 0x3c7   : > { %4196 = vpow2.f32 %v1140_v58  ;;  %1835 = vmax.xlane.f32.xlu2 %v1834_v62 }
 0x3c8   : > { %1155 = vadd.xlane.f32.xlu1 %v1154_v1  ;;  %v1843_v60 = vsel %vm1099_vm15, %v5125_v26, -inf }
 0x3c9   : > { %1844 = vmax.xlane.f32.xlu0 %v1843_v60 }
 0x3ca   : > { %v1111_v12 = vpop.xlane.xlu2 %1110 }
 0x3cb   : > { %v1130_v4 = vsub.f32 %v4978_v0, %v1111_v12 }
 0x3cc   : > { %v1355_v40 = vpop.xlane.xlu0 %1354 }
 0x3cd   : > { %v5136_v22 = vpop.eup %4196  ;;  %v1142_v15 = vmul.f32 1.442695, %v1130_v4  ;;  %v1380_v55 = vsub.f32 %v4982_v20, %v1355_v40  ;;  %v1819_v2 = vpop.f32.mrf.mxu0 }
 0x3ce   : > { %v5140_v59 = vadd.f32 %v1819_v2, %v4957_v28  ;;  %v1160_v16 = vsel %vm1099_vm15, %v5136_v22, 0.0 }
 0x3cf   : > { %4198 = vpow2.f32 %v1142_v15  ;;  %v1389_v10 = vmul.f32 1.442695, %v1380_v55 }
 0x3d0   : > { %1158 = vadd.xlane.f32.xlu1 %v1157_v38  ;;  %v1846_v0 = vsel %vm1099_vm15, %v5140_v59, -inf }
 0x3d1   : > { %4200 = vpow2.f32 %v1389_v10  ;;  %1847 = vmax.xlane.f32.xlu2 %v1846_v0  ;;  %1161 = vadd.xlane.f32.xlu0 %v1160_v16 }
 0x3d2   : > { %v1114_v20 = vpop.xlane.xlu2 %1113 }
 0x3d3   : > { %v1131_v43 = vsub.f32 %v4992_v49, %v1114_v20 }
 0x3d5   : > { %v5149_v54 = vpop.eup %4198  ;;  %v1144_v44 = vmul.f32 1.442695, %v1131_v43  ;;  %v1822_v46 = vpop.f32.mrf.mxu0 }
 0x3d6   : > { %v1163_v48 = vsel %vm1099_vm15, %v5149_v54, 0.0  ;;  %v5161_v49 = vadd.f32 %v1822_v46, %v4957_v28 }
 0x3d7   : > { %v5151_v24 = vpop.eup %4200  ;;  %4202 = vpow2.f32 %v1144_v44 }
 0x3d8   : > { %v1407_v17 = vsel %vm1099_vm15, %v5151_v24, 0.0 }
 0x3d9   : > { %1164 = vadd.xlane.f32.xlu2 %v1163_v48  ;;  %1408 = vadd.xlane.f32.xlu1 %v1407_v17 }
 0x3da   : > { %v1358_v51 = vpop.xlane.xlu2 %1357 }
 0x3db   : > { %v1381_v33 = vsub.f32 %v4998_v57, %v1358_v51  ;;  %v1849_v57 = vsel %vm1099_vm15, %v5161_v49, -inf }
 0x3dd   : > { %v5158_v56 = vpop.eup %4202  ;;  %v1391_v53 = vmul.f32 1.442695, %v1381_v33  ;;  %v1824_v39 = vpop.f32.mrf.mxu0 }
 0x3de   : > { %v5164_v58 = vadd.f32 %v1824_v39, %v4957_v28  ;;  %v1166_v61 = vsel %vm1099_vm15, %v5158_v56, 0.0 }
 0x3df   : > { %4204 = vpow2.f32 %v1391_v53 }
 0x3e0   : > { %v1852_v62 = vsel %vm1099_vm15, %v5164_v58, -inf }
 0x3e1   : > { %1167 = vadd.xlane.f32.xlu2 %v1166_v61  ;;  %1853 = vmax.xlane.f32.xlu0 %v1852_v62 }
 0x3e2   : > { %1850 = vmax.xlane.f32.xlu1 %v1849_v57  ;;  %v1117_v1 = vpop.xlane.xlu2 %1116 }
 0x3e3   : > { %v1132_v60 = vsub.f32 %v5005_v9, %v1117_v1 }
 0x3e4   : > { %v1364_v12 = vpop.xlane.xlu1 %1363 }
 0x3e5   : > { %v5173_v4 = vpop.eup %4204  ;;  %v1146_v40 = vmul.f32 1.442695, %v1132_v60  ;;  %v1383_v15 = vsub.f32 %v5008_v25, %v1364_v12  ;;  %v5176_v55 = vpop.f32.mrf.mxu0 }
 0x3e6   : > { %v1410_v10 = vsel %vm1099_vm15, %v5173_v4, 0.0 }
 0x3e7   : > { %4206 = vpow2.f32 %v1146_v40  ;;  %v1395_v2 = vmul.f32 1.442695, %v1383_v15 }
 0x3e9   : > { %4208 = vpow2.f32 %v1395_v2  ;;  %1411 = vadd.xlane.f32.xlu2 %v1410_v10 }
 0x3ea   : > { %v1361_v38 = vpop.xlane.xlu2 %1360 }
 0x3eb   : > { %v1382_v0 = vsub.f32 %v5015_v30, %v1361_v38 }
 0x3ec   : > { %v1123_v16 = vpop.xlane.xlu1 %1122 }
 0x3ed   : > { %v5181_v9 = vpop.eup %4206  ;;  %v1393_v20 = vmul.f32 1.442695, %v1382_v0  ;;  %v1134_v43 = vsub.f32 %v5018_v31, %v1123_v16  ;;  %v1829_v44 = vpop.f32.mrf.mxu0 }
 0x3ee   : > { %v1169_v25 = vsel %vm1099_vm15, %v5181_v9, 0.0 }
 0x3ef   : > { %v5186_v46 = vpop.eup %4208  ;;  %4210 = vpow2.f32 %v1393_v20  ;;  %v1150_v48 = vmul.f32 1.442695, %v1134_v43  ;;  %1170 = vadd.xlane.f32.xlu1 %v1169_v25 }
 0x3f0   : > { %v1416_v17 = vsel %vm1099_vm15, %v5186_v46, 0.0 }
 0x3f1   : > { %4212 = vpow2.f32 %v1150_v48  ;;  %1417 = vadd.xlane.f32.xlu2 %v1416_v17 }
 0x3f2   : > { %v1120_v30 = vpop.xlane.xlu2 %1119  ;;  %v1126_v62 = vpop.xlane.xlu0 %1125 }
 0x3f3   : > { %v1133_v51 = vsub.f32 %v5025_v37, %v1120_v30  ;;  %v1135_v37 = vsub.f32 %v5028_v41, %v1126_v62 }
 0x3f5   : > { %v5191_v33 = vpop.eup %4210  ;;  %v1148_v31 = vmul.f32 1.442695, %v1133_v51  ;;  %v1152_v15 = vmul.f32 1.442695, %v1135_v37 }
 0x3f6   : > { %v1413_v53 = vsel %vm1099_vm15, %v5191_v33, 0.0 }
 0x3f7   : > { %v5195_v39 = vpop.eup %4212  ;;  %4214 = vpow2.f32 %v1148_v31  ;;  %1414 = vadd.xlane.f32.xlu0 %v1413_v53 }
 0x3f8   : > { %v1175_v61 = vsel %vm1099_vm15, %v5195_v39, 0.0 }
 0x3f9   : > { %1176 = vadd.xlane.f32.xlu2 %v1175_v61 }
 0x3fa   : > { %v1367_v57 = vpop.xlane.xlu2 %1366 }
 0x3fb   : > { %v1384_v1 = vsub.f32 %v5035_v32, %v1367_v57 }
 0x3fc   : > { %v1373_v48 = vpop.xlane.xlu1 %1372 }
 0x3fd   : > { %v5200_v60 = vpop.eup %4214  ;;  %v1397_v12 = vmul.f32 1.442695, %v1384_v1 }
 0x3fe   : > { %v1172_v40 = vsel %vm1099_vm15, %v5200_v60, 0.0 }
 0x3ff   : > { %4216 = vpow2.f32 %v1397_v12  ;;  %1173 = vadd.xlane.f32.xlu0 %v1172_v40 }
 0x400   : > { %4218 = vpow2.f32 %v1152_v15 }
 0x402   : > { %v1594_v2 = vpop.xlane.xlu2 %1593 }
 0x403   : > { %v1619_v10 = vsub.f32 %v5045_v50, %v1594_v2 }
 0x405   : > { %v5206_v38 = vpop.eup %4216  ;;  %v1628_v0 = vmul.f32 1.442695, %v1619_v10 }
 0x406   : > { %v1419_v32 = vsel %vm1099_vm15, %v5206_v38, 0.0  ;;  %v5210_v16 = vpop.eup %4218 }
 0x407   : > { %4220 = vpow2.f32 %v1628_v0  ;;  %1420 = vadd.xlane.f32.xlu1 %v1419_v32  ;;  %v1178_v25 = vsel %vm1099_vm15, %v5210_v16, 0.0 }
 0x40a   : > { %v1370_v41 = vpop.xlane.xlu2 %1369 }
 0x40b   : > { %v1385_v20 = vsub.f32 %v5050_v19, %v1370_v41  ;;  %v1386_v19 = vsub.f32 %v5038_v47, %v1373_v48  ;;  %v5225_v61 = vpop.xlane.xlu1 %1602 }
 0x40d   : > { %v5213_v43 = vpop.eup %4220  ;;  %v1399_v44 = vmul.f32 1.442695, %v1385_v20  ;;  %v1401_v62 = vmul.f32 1.442695, %v1386_v19 }
 0x40e   : > { %v1646_v50 = vsel %vm1099_vm15, %v5213_v43, 0.0 }
 0x40f   : > { %4222 = vpow2.f32 %v1399_v44  ;;  %1647 = vadd.xlane.f32.xlu0 %v1646_v50  ;;  %1179 = vadd.xlane.f32.xlu1 %v1178_v25 }
 0x412   : > { %v1597_v17 = vpop.xlane.xlu2 %1596 }
 0x413   : > { %v1620_v30 = vsub.f32 %v5060_v14, %v1597_v17  ;;  %v1379_v37 = vpop.xlane.xlu1 %1378  ;;  %v5241_v41 = vpop.xlane.xlu0 %1605 }
 0x414   : > { %v1388_v15 = vsub.f32 %v5063_v18, %v1379_v37 }
 0x415   : > { %v5220_v51 = vpop.eup %4222  ;;  %v1630_v31 = vmul.f32 1.442695, %v1620_v30 }
 0x416   : > { %v1422_v53 = vsel %vm1099_vm15, %v5220_v51, 0.0  ;;  %v1405_v0 = vmul.f32 1.442695, %v1388_v15 }
 0x417   : > { %4224 = vpow2.f32 %v1630_v31  ;;  %1423 = vadd.xlane.f32.xlu0 %v1422_v53 }
 0x418   : > { %4226 = vpow2.f32 %v1401_v62 }
 0x41a   : > { %v5227_v57 = vpop.xlane.xlu2 %1599 }
 0x41c   : > { %v5253_v25 = vpop.xlane.xlu0 %1832 }
 0x41d   : > { %v5229_v1 = vpop.eup %4224 }
 0x41e   : > { %v1649_v14 = vsel %vm1099_vm15, %v5229_v1, 0.0  ;;  %v5233_v12 = vpop.eup %4226 }
 0x41f   : > { %1650 = vadd.xlane.f32.xlu2 %v1649_v14  ;;  %v1425_v10 = vsel %vm1099_vm15, %v5233_v12, 0.0 }
 0x422   : > { %v1376_v47 = vpop.xlane.xlu2 %1375 }
 0x423   : > { %v1387_v40 = vsub.f32 %v5085_v23, %v1376_v47 }
 0x425   : > { %v1403_v2 = vmul.f32 1.442695, %v1387_v40 }
 0x427   : > { %4228 = vpow2.f32 %v1403_v2  ;;  %1426 = vadd.xlane.f32.xlu2 %v1425_v10 }
 0x428   : > { %4230 = vpow2.f32 %v1405_v0 }
 0x42a   : > { %v5239_v32 = vpop.xlane.xlu2 %1608 }
 0x42b   : > { %v5243_v20 = vpop.xlane.xlu1 %1614 }
 0x42d   : > { %v5245_v44 = vpop.eup %4228 }
 0x42e   : > { %v1428_v23 = vsel %vm1099_vm15, %v5245_v44, 0.0  ;;  %v5251_v50 = vpop.eup %4230 }
 0x42f   : > { %1429 = vadd.xlane.f32.xlu1 %v1428_v23  ;;  %v1431_v17 = vsel %vm1099_vm15, %v5251_v50, 0.0 }
 0x432   : > { %v5249_v18 = vpop.xlane.xlu2 %1611 }
 0x433   : > { %v5255_v48 = vpop.xlane.xlu1 %1838 }
 0x434   : > { %v1842_v19 = vpop.xlane.xlu0 %1841 }
 0x437   : > { %1432 = vadd.xlane.f32.xlu1 %v1431_v17 }
 0x43a   : > { %v1836_v30 = vpop.xlane.xlu2 %1835 }
 0x43b   : > { %v1156_v31 = vpop.xlane.xlu1 %1155  ;;  %v1859_v53 = vsub.f32 %v5119_v52, %v1836_v30 }
 0x43c   : > { %v5266_v40 = vpop.xlane.xlu0 %1844 }
 0x43d   : > { %v1869_v62 = vmul.f32 1.442695, %v1859_v53 }
 0x43f   : > { %4232 = vpow2.f32 %v1869_v62  ;;  %1696 = vrot.lane.b32.xlu2 %v4799_v42, %s4410_s14 }
 0x440   : > { %4234 = vrcp.f32 %v1156_v31 }
 0x443   : > { %v1159_v14 = vpop.xlane.xlu1 %1158 }
 0x444   : > { %4236 = vrcp.f32 %v1159_v14  ;;  %v5262_v37 = vpop.xlane.xlu2 %1847  ;;  %v1162_v30 = vpop.xlane.xlu0 %1161 }
 0x445   : > { %v5264_v47 = vpop.eup %4232 }
 0x446   : > { %v1888_v15 = vsel %vm1099_vm15, %v5264_v47, 0.0  ;;  %v4235_v52 = vpop.eup %4234 }
 0x447   : > { %1937 = vrot.lane.b32.xlu2 %v4815_v63, %s4409_s29  ;;  %1889 = vadd.xlane.f32.xlu0 %v1888_v15  ;;  %v1190_v10 = vmul.f32 %v4235_v52, %v5122_v11 }
 0x44a   : > { %v4237_v2 = vpop.eup %4236 }
 0x44b   : > { %v1191_v0 = vmul.f32 %v4237_v2, %v5134_v7 }
 0x44c   : > { %v1165_v23 = vpop.xlane.xlu2 %1164  ;;  %v1409_v31 = vpop.xlane.xlu1 %1408 }
 0x44d   : > { %v1199_v17 = vpack.c.bf16 %v1191_v0, %v1190_v10  ;;  %4238 = vrcp.f32 %v1165_v23 }
 0x44e   : > { %4240 = vrcp.f32 %v1162_v30  ;;  %v1861_v30 = vsub.f32 %v5110_v6, %v1842_v19  ;;  %v1624_v19 = vsub.f32 %v5090_v27, %v5239_v32  ;;  %v1860_v27 = vsub.f32 %v5104_v21, %v5255_v48 }
 0x44f   : > { %3812 = vmatmul.msk.bf16.vlgmr.msrb.gmra.mxu3 %vm1099_vm15, %v1199_v17  ;;  %4242 = vrcp.f32 %v1409_v31  ;;  %v1623_v21 = vsub.f32 %v5066_v35, %v5241_v41 }
 0x450   : > { %1939 = vrot.lane.b32.xlu1 %v4831_v29, %s4409_s29  ;;  %v1621_v29 = vsub.f32 %v5075_v3, %v5227_v57  ;;  %v1858_v57 = vsub.f32 %v5078_v5, %v5253_v25 }
 0x451   : > { %v1636_v35 = vmul.f32 1.442695, %v1623_v21 }
 0x452   : > { %v1632_v10 = vmul.f32 1.442695, %v1621_v29 }
 0x453   : > { %v4239_v63 = vpop.eup %4238 }
 0x454   : > { %v1168_v53 = vpop.xlane.xlu2 %1167  ;;  %v4241_v62 = vpop.eup %4240  ;;  %v1193_v14 = vmul.f32 %v4239_v63, %v5149_v54  ;;  %v1873_v63 = vmul.f32 1.442695, %v1861_v30 }
 0x455   : > { %v5278_v15 = vpop.xlane.xlu1 %1850  ;;  %v1192_v11 = vmul.f32 %v4241_v62, %v5136_v22  ;;  %v4243_v2 = vpop.eup %4242 }
 0x456   : > { %v5286_v54 = vpop.xlane.xlu0 %1853 }
 0x457   : > { %v1200_v52 = vpack.c.bf16 %v1193_v14, %v1192_v11  ;;  %v1867_v11 = vmul.f32 1.442695, %v1858_v57 }
 0x45b   : > { %1935 = vrot.lane.b32.xlu0 %v4799_v42, %s4409_s29  ;;  %v1443_v42 = vmul.f32 %v4243_v2, %v5151_v24 }
 0x45c   : > { %v1412_v7 = vpop.xlane.xlu2 %1411 }
 0x45d   : > { %4244 = vrcp.f32 %v1412_v7 }
 0x45e   : > { %4246 = vrcp.f32 %v1168_v53 }
 0x45f   : > { %3813 = vmatmul.msk.bf16.gmra.mxu3 %vm1099_vm15, %v1200_v52  ;;  %v1638_v52 = vmul.f32 1.442695, %v1624_v19 }
 0x462   : > { %v1171_v0 = vpop.xlane.xlu1 %1170 }
 0x463   : > { %v4245_v23 = vpop.eup %4244  ;;  %4248 = vrcp.f32 %v1171_v0 }
 0x464   : > { %v1444_v22 = vmul.f32 %v4245_v23, %v5173_v4  ;;  %v1418_v17 = vpop.xlane.xlu2 %1417  ;;  %4250 = vpow2.f32 %v1632_v10  ;;  %v4247_v3 = vpop.eup %4246 }
 0x465   : > { %4252 = vrcp.f32 %v1418_v17  ;;  %v1194_v14 = vmul.f32 %v4247_v3, %v5158_v56  ;;  %v1622_v56 = vsub.f32 %v5053_v34, %v5225_v61  ;;  %v1862_v34 = vsub.f32 %v5125_v26, %v5266_v40 }
 0x466   : > { %v1452_v31 = vpack.c.bf16 %v1444_v22, %v1443_v42  ;;  %v1871_v22 = vmul.f32 1.442695, %v1860_v27  ;;  %v1864_v26 = vsub.f32 %v5161_v49, %v5278_v15 }
 0x467   : > { %v1634_v10 = vmul.f32 1.442695, %v1622_v56  ;;  %v1875_v17 = vmul.f32 1.442695, %v1862_v34 }
 0x468   : > { %3822 = vmatmul.msk.bf16.vlgmr.msrb.gmra.mxu1 %vm1099_vm15, %v1452_v31 }
 0x469   : > { %v4249_v53 = vpop.eup %4248 }
 0x46a   : > { %v1415_v62 = vpop.xlane.xlu0 %1414  ;;  %v1195_v24 = vmul.f32 %v4249_v53, %v5181_v9  ;;  %v5296_v4 = vpop.eup %4250  ;;  %v1879_v53 = vmul.f32 1.442695, %v1864_v26 }
 0x46b   : > { %4254 = vrcp.f32 %v1415_v62  ;;  %v1652_v25 = vsel %vm1099_vm15, %v5296_v4, 0.0  ;;  %v4253_v7 = vpop.eup %4252 }
 0x46c   : > { %v1201_v6 = vpack.c.bf16 %v1195_v24, %v1194_v14  ;;  %4256 = vpow2.f32 %v1873_v63  ;;  %v1177_v5 = vpop.xlane.xlu2 %1176  ;;  %v1446_v0 = vmul.f32 %v4253_v7, %v5186_v46 }
 0x46d   : > { %4258 = vpow2.f32 %v1867_v11  ;;  %v1626_v11 = vsub.f32 %v5093_v36, %v5243_v20  ;;  %v5356_v36 = vadd.f32 %v5176_v55, %v4957_v28  ;;  %v1625_v55 = vsub.f32 %v5101_v8, %v5249_v18 }
 0x46e   : > { %4260 = vrcp.f32 %v1177_v5  ;;  %v1863_v5 = vsub.f32 %v5140_v59, %v5262_v37  ;;  %v1865_v18 = vsub.f32 %v5164_v58, %v5286_v54 }
 0x46f   : > { %3814 = vmatmul.msk.bf16.gmra.mxu3 %vm1099_vm15, %v1201_v6  ;;  %v1642_v56 = vmul.f32 1.442695, %v1626_v11 }
 0x470   : > { %1653 = vadd.xlane.f32.xlu2 %v1652_v25  ;;  %v1877_v20 = vmul.f32 1.442695, %v1863_v5 }
 0x471   : > { %v4255_v9 = vpop.eup %4254 }
 0x472   : > { %v1174_v29 = vpop.xlane.xlu0 %1173  ;;  %v1445_v2 = vmul.f32 %v4255_v9, %v5191_v33  ;;  %v5308_v32 = vpop.eup %4256 }
 0x473   : > { %4262 = vrcp.f32 %v1174_v29  ;;  %v5311_v23 = vpop.eup %4258  ;;  %v1894_v33 = vsel %vm1099_vm15, %v5308_v32, 0.0  ;;  %v5362_v29 = vadd.f32 %v5106_v45, %v4957_v28 }
 0x474   : > { %4264 = vpow2.f32 %v1638_v52  ;;  %v1453_v61 = vpack.c.bf16 %v1446_v0, %v1445_v2  ;;  %v4261_v42 = vpop.eup %4260  ;;  %v1885_v48 = vsel %vm1099_vm15, %v5311_v23, 0.0 }
 0x475   : > { %4266 = vpow2.f32 %v1634_v10  ;;  %v1197_v31 = vmul.f32 %v4261_v42, %v5195_v39  ;;  %v1616_v10 = vsel %vm1099_vm15, %v5362_v29, -inf }
 0x476   : > { %4268 = vpow2.f32 %v1871_v22 }
 0x477   : > { %4270 = vpow2.f32 %v1875_v17 }
 0x478   : > { %1895 = vadd.xlane.f32.xlu2 %v1894_v33  ;;  %3823 = vmatmul.msk.bf16.gmra.mxu1 %vm1099_vm15, %v1453_v61  ;;  %4272 = vpow2.f32 %v1636_v35  ;;  %v1640_v61 = vmul.f32 1.442695, %v1625_v55  ;;  %v1881_v33 = vmul.f32 1.442695, %v1865_v18 }
 0x479   : > { %v4263_v46 = vpop.eup %4262  ;;  %4274 = vpow2.f32 %v1879_v53 }
 0x47a   : > { %v1421_v40 = vpop.xlane.xlu1 %1420  ;;  %1886 = vadd.xlane.f32.xlu1 %v1885_v48  ;;  %v1196_v30 = vmul.f32 %v4263_v46, %v5200_v60  ;;  %v5326_v3 = vpop.eup %4264 }
 0x47b   : > { %v5328_v57 = vpop.eup %4266  ;;  %v1661_v49 = vsel %vm1099_vm15, %v5326_v3, 0.0 }
 0x47c   : > { %v1202_v41 = vpack.c.bf16 %v1197_v31, %v1196_v30  ;;  %v5333_v15 = vpop.eup %4268  ;;  %v1655_v39 = vsel %vm1099_vm15, %v5328_v57, 0.0 }
 0x47d   : > { %v5337_v62 = vpop.eup %4270  ;;  %v1891_v14 = vsel %vm1099_vm15, %v5333_v15, 0.0 }
 0x47e   : > { %v5341_v24 = vpop.eup %4272  ;;  %v1897_v6 = vsel %vm1099_vm15, %v5337_v62, 0.0 }
 0x47f   : > { %3815 = vmatmul.msk.bf16.gmra.mxu3 %vm1099_vm15, %v1202_v41  ;;  %v5347_v19 = vpop.eup %4274  ;;  %v1658_v7 = vsel %vm1099_vm15, %v5341_v24, 0.0 }
 0x480   : > { %1662 = vadd.xlane.f32.xlu2 %v1661_v49  ;;  %v1903_v59 = vsel %vm1099_vm15, %v5347_v19, 0.0 }
 0x482   : > { %v1180_v60 = vpop.xlane.xlu1 %1179  ;;  %1656 = vadd.xlane.f32.xlu1 %v1655_v39  ;;  %v1648_v63 = vpop.xlane.xlu0 %1647 }
 0x483   : > { %4276 = vrcp.f32 %v1180_v60 }
 0x484   : > { %4278 = vrcp.f32 %v1421_v40 }
 0x485   : > { %1892 = vadd.xlane.f32.xlu0 %v1891_v14 }
 0x488   : > { %1898 = vadd.xlane.f32.xlu2 %v1897_v6 }
 0x489   : > { %v4277_v25 = vpop.eup %4276 }
 0x48a   : > { %1659 = vadd.xlane.f32.xlu1 %v1658_v7  ;;  %v1424_v9 = vpop.xlane.xlu0 %1423  ;;  %v1198_v52 = vmul.f32 %v4277_v25, %v5210_v16  ;;  %v4279_v2 = vpop.eup %4278  ;;  %v1855_v16 = vsel %vm1099_vm15, %v5356_v36, -inf }
 0x48b   : > { %4280 = vrcp.f32 %v1424_v9  ;;  %v1447_v28 = vmul.f32 %v4279_v2, %v5206_v38 }
 0x48c   : > { %v1203_v37 = vpack.c.bf16 %v1198_v52, %v1198_v52  ;;  %4282 = vpow2.f32 %v1642_v56 }
 0x48d   : > { %1904 = vadd.xlane.f32.xlu0 %v1903_v59  ;;  %4284 = vpow2.f32 %v1877_v20 }
 0x48f   : > { %3816 = vmatmul.msk.bf16.gmra.mxu3 %vm1099_vm15, %v1203_v37 }
 0x490   : > { %1856 = vmax.xlane.f32.xlu2 %v1855_v16 }
 0x491   : > { %v4281_v27 = vpop.eup %4280 }
 0x492   : > { %v1651_v0 = vpop.xlane.xlu2 %1650  ;;  %1617 = vmax.xlane.f32.xlu1 %v1616_v10  ;;  %v1448_v45 = vmul.f32 %v4281_v27, %v5220_v51  ;;  %v5373_v34 = vpop.eup %4282 }
 0x493   : > { %v5375_v22 = vpop.eup %4284  ;;  %4286 = vrcp.f32 %v1651_v0  ;;  %v1667_v8 = vsel %vm1099_vm15, %v5373_v34, 0.0 }
 0x494   : > { %v1454_v42 = vpack.c.bf16 %v1448_v45, %v1447_v28  ;;  %4288 = vpow2.f32 %v1640_v61  ;;  %v1900_v38 = vsel %vm1099_vm15, %v5375_v22, 0.0 }
 0x495   : > { %4290 = vrcp.f32 %v1648_v63 }
 0x496   : > { %3824 = vmatmul.msk.bf16.gmra.mxu1 %vm1099_vm15, %v1454_v42  ;;  %4292 = vpow2.f32 %v1881_v33 }
 0x498   : > { %1668 = vadd.xlane.f32.xlu2 %v1667_v8 }
 0x499   : > { %v4287_v21 = vpop.eup %4286 }
 0x49a   : > { %v1427_v51 = vpop.xlane.xlu2 %1426  ;;  %1901 = vadd.xlane.f32.xlu1 %v1900_v38  ;;  %v5384_v46 = vpop.eup %4288  ;;  %v1683_v17 = vmul.f32 %v4287_v21, %v5229_v1 }
 0x49b   : > { %v4291_v48 = vpop.eup %4290  ;;  %4294 = vrcp.f32 %v1427_v51  ;;  %v1664_v26 = vsel %vm1099_vm15, %v5384_v46, 0.0 }
 0x49c   : > { %v1682_v58 = vmul.f32 %v4291_v48, %v5213_v43  ;;  %v5390_v31 = vpop.eup %4292 }
 0x49d   : > { %v1906_v1 = vsel %vm1099_vm15, %v5390_v31, 0.0 }
 0x49e   : > { %v1691_v30 = vpack.c.bf16 %v1683_v17, %v1682_v58 }
 0x4a1   : > { %v4295_v35 = vpop.eup %4294 }
 0x4a2   : > { %v1697_v54 = vpop.permute.xlu2 %1696  ;;  %v1430_v40 = vpop.xlane.xlu1 %1429  ;;  %1665 = vadd.xlane.f32.xlu1 %v1664_v26  ;;  %v1449_v53 = vmul.f32 %v4295_v35, %v5233_v12 }
 0x4a3   : > { %4296 = vrcp.f32 %v1430_v40  ;;  %1735 = vmatpush.bf16.msra.mxu3 %v1697_v54 }
 0x4a6   : > { %3832 = vmatmul.msk.bf16.vlgmr.msra.gmra.mxu3 %vm1099_vm15, %v1691_v30 }
 0x4a9   : > { %v4297_v41 = vpop.eup %4296 }
 0x4aa   : > { %1907 = vadd.xlane.f32.xlu1 %v1906_v1  ;;  %v1450_v43 = vmul.f32 %v4297_v41, %v5245_v44  ;;  %v1433_v49 = vpop.xlane.xlu1 %1432  ;;  %v1938_v5 = vpop.permute.xlu2 %1937 }
 0x4ab   : > { %4298 = vrcp.f32 %v1433_v49 }
 0x4ac   : > { %v1455_v39 = vpack.c.bf16 %v1450_v43, %v1449_v53 }
 0x4ae   : > { %3825 = vmatmul.msk.bf16.gmra.mxu1 %vm1099_vm15, %v1455_v39 }
 0x4b1   : > { %v4299_v60 = vpop.eup %4298 }
 0x4b2   : > { %v1451_v63 = vmul.f32 %v4299_v60, %v5251_v50 }
 0x4b4   : > { %v1456_v14 = vpack.c.bf16 %v1451_v63, %v1451_v63 }
 0x4ba   : > { %v1890_v6 = vpop.xlane.xlu0 %1889 }
 0x4bb   : > { %4300 = vrcp.f32 %v1890_v6 }
 0x4be   : > { %3826 = vmatmul.msk.bf16.gmra.mxu1 %vm1099_vm15, %v1456_v14 }
 0x4c1   : > { %v4301_v2 = vpop.eup %4300 }
 0x4c2   : > { %v1940_v11 = vpop.permute.xlu1 %1939  ;;  %v1922_v10 = vmul.f32 %v4301_v2, %v5264_v47 }
 0x4c3   : > { %1972 = vmatpush.bf16.msra.mxu1 %v1940_v11 }
 0x4c7   : > { %1973 = vmatpush.bf16.msra.mxu1 %v1938_v5 }
 0x4cd   : > { %v1936_v25 = vpop.permute.xlu0 %1935 }
 0x4ce   : > { %1974 = vmatpush.bf16.msra.mxu1 %v1936_v25 }
 0x4d2   : > { %v5400_v12 = vpop.f32.mrf.mxu3 }
 0x4da   : > { %v5402_v44 = vpop.f32.mrf.mxu3 }
 0x4e2   : > { %v5404_v7 = vpop.f32.mrf.mxu3 }
 0x4e3   : > { %v1654_v56 = vpop.xlane.xlu2 %1653 }
 0x4e5   : > { %v1498_v9 = vpop.f32.mrf.mxu1 }
 0x4ea   : > { %v5406_v52 = vpop.f32.mrf.mxu3 }
 0x4eb   : > { %v1896_v50 = vpop.xlane.xlu2 %1895 }
 0x4ed   : > { %v1500_v20 = vpop.f32.mrf.mxu1  ;;  %v1887_v59 = vpop.xlane.xlu1 %1886 }
 0x4ee   : > { %v4106_v37 = vpack.i.bf16 %v1500_v20, %v1498_v9  ;;  %4302 = vrcp.f32 %v1887_v59 }
 0x4ef   : > { %4304 = vrcp.f32 %v1654_v56 }
 0x4f0   : > { %4107 = vrot.lane.b32.xlu1 %v4106_v37, %s4409_s29 }
 0x4f2   : > { %v5409_v16 = vpop.f32.mrf.mxu3 }
 0x4f3   : > { %v1663_v55 = vpop.xlane.xlu2 %1662 }
 0x4f4   : > { %v4303_v27 = vpop.eup %4302 }
 0x4f5   : > { %v1921_v0 = vmul.f32 %v4303_v27, %v5311_v23  ;;  %v1657_v28 = vpop.xlane.xlu1 %1656  ;;  %v1503_v45 = vpop.f32.mrf.mxu1 }
 0x4f6   : > { %4306 = vrcp.f32 %v1657_v28  ;;  %v4305_v8 = vpop.eup %4304 }
 0x4f7   : > { %v1930_v61 = vpack.c.bf16 %v1922_v10, %v1921_v0  ;;  %v1684_v47 = vmul.f32 %v4305_v8, %v5296_v4 }
 0x4f8   : > { %v1893_v42 = vpop.xlane.xlu0 %1892 }
 0x4f9   : > { %3842 = vmatmul.msk.bf16.vlgmr.msra.gmra.mxu1 %vm1099_vm15, %v1930_v61  ;;  %4308 = vrcp.f32 %v1893_v42 }
 0x4fa   : > { %v5414_v18 = vpop.f32.mrf.mxu3  ;;  %4310 = vrcp.f32 %v1896_v50 }
 0x4fb   : > { %v1899_v38 = vpop.xlane.xlu2 %1898 }
 0x4fc   : > { %v4307_v51 = vpop.eup %4306 }
 0x4fd   : > { %v1660_v33 = vpop.xlane.xlu1 %1659  ;;  %v1505_v21 = vpop.f32.mrf.mxu1  ;;  %v1685_v23 = vmul.f32 %v4307_v51, %v5328_v57 }
 0x4fe   : > { %v4121_v48 = vpack.i.bf16 %v1505_v21, %v1503_v45  ;;  %4312 = vrcp.f32 %v1660_v33 }
 0x4ff   : > { %v1692_v17 = vpack.c.bf16 %v1685_v23, %v1684_v47  ;;  %v4309_v26 = vpop.eup %4308  ;;  %4314 = vrcp.f32 %v1663_v55 }
 0x500   : > { %4122 = vrot.lane.b32.xlu1 %v4121_v48, %s4409_s29  ;;  %v4311_v58 = vpop.eup %4310  ;;  %v1923_v30 = vmul.f32 %v4309_v26, %v5333_v15  ;;  %v1905_v37 = vpop.xlane.xlu0 %1904 }
 0x501   : > { %3833 = vmatmul.msk.bf16.gmra.mxu3 %vm1099_vm15, %v1692_v17  ;;  %v1924_v57 = vmul.f32 %v4311_v58, %v5308_v32 }
 0x502   : > { %v5420_v54 = vpop.f32.mrf.mxu3 }
 0x503   : > { %v1857_v40 = vpop.xlane.xlu2 %1856  ;;  %v1931_v53 = vpack.c.bf16 %v1924_v57, %v1923_v30 }
 0x504   : > { %v1866_v35 = vsub.f32 %v5356_v36, %v1857_v40  ;;  %v4313_v43 = vpop.eup %4312 }
 0x505   : > { %v1618_v4 = vpop.xlane.xlu1 %1617  ;;  %v4315_v39 = vpop.eup %4314  ;;  %v1686_v15 = vmul.f32 %v4313_v43, %v5341_v24 }
 0x506   : > { %v1883_v41 = vmul.f32 1.442695, %v1866_v35  ;;  %v1627_v1 = vsub.f32 %v5362_v29, %v1618_v4  ;;  %v1687_v36 = vmul.f32 %v4315_v39, %v5326_v3 }
 0x508   : > { %4316 = vpow2.f32 %v1883_v41  ;;  %v1644_v49 = vmul.f32 1.442695, %v1627_v1  ;;  %v1693_v14 = vpack.c.bf16 %v1687_v36, %v1686_v15 }
 0x509   : > { %3843 = vmatmul.msk.bf16.gmra.mxu1 %vm1099_vm15, %v1931_v53 }
 0x50a   : > { %4318 = vpow2.f32 %v1644_v49  ;;  %v5427_v60 = vpop.f32.mrf.mxu3 }
 0x50b   : > { %4320 = vrcp.f32 %v1899_v38  ;;  %v1669_v6 = vpop.xlane.xlu2 %1668 }
 0x50d   : > { %v1902_v63 = vpop.xlane.xlu1 %1901 }
 0x50e   : > { %v5431_v32 = vpop.eup %4316  ;;  %4322 = vrcp.f32 %v1902_v63  ;;  %v4058_v63 = vld [vmem:[%s6585_s5 + $0x38] sm:$0xff] }
 0x50f   : > { %v1909_v29 = vsel %vm1099_vm15, %v5431_v32, 0.0  ;;  %4324 = vrcp.f32 %v1669_v6  ;;  %2210 = vmatpush.bf16.msra.mxu2 %v4058_v63  ;;  %v4055_v6 = vld [vmem:[%s6585_s5 + $0x20] sm:$0xff] }
 0x510   : > { %v4319_v11 = vpop.eup %4318  ;;  %1910 = vadd.xlane.f32.xlu0 %v1909_v29 }
 0x511   : > { %3834 = vmatmul.msk.bf16.gmra.mxu3 %vm1099_vm15, %v1693_v14  ;;  %v1670_v5 = vsel %vm1099_vm15, %v4319_v11, 0.0  ;;  %v4321_v25 = vpop.eup %4320 }
 0x512   : > { %v5437_v24 = vpop.f32.mrf.mxu3  ;;  %1671 = vadd.xlane.f32.xlu2 %v1670_v5  ;;  %v1925_v9 = vmul.f32 %v4321_v25, %v5337_v62 }
 0x513   : > { %v1508_v3 = vpop.f32.mrf.mxu1 }
 0x514   : > { %v4323_v56 = vpop.eup %4322 }
 0x515   : > { %v1926_v50 = vmul.f32 %v4323_v56, %v5375_v22  ;;  %v1666_v20 = vpop.xlane.xlu1 %1665  ;;  %v4325_v2 = vpop.eup %4324 }
 0x516   : > { %4326 = vrcp.f32 %v1666_v20  ;;  %v1689_v28 = vmul.f32 %v4325_v2, %v5373_v34 }
 0x517   : > { %v1932_v59 = vpack.c.bf16 %v1926_v50, %v1925_v9  ;;  %4328 = vrcp.f32 %v1905_v37 }
 0x519   : > { %3844 = vmatmul.msk.bf16.gmra.mxu1 %vm1099_vm15, %v1932_v59 }
 0x51a   : > { %v1281_v55 = vpop.f32.mrf.mxu3 }
 0x51b   : > { %v1510_v27 = vpop.f32.mrf.mxu1  ;;  %v4054_v55 = vld [vmem:[%s6585_s5 + $0x18] sm:$0xff] }
 0x51c   : > { %v4327_v10 = vpop.eup %4326  ;;  %v4136_v0 = vpack.i.bf16 %v1510_v27, %v1508_v3  ;;  %v4053_v27 = vld [vmem:[%s6585_s5 + $0x10] sm:$0xff] }
 0x51d   : > { %v1688_v45 = vmul.f32 %v4327_v10, %v5384_v46  ;;  %v1908_v61 = vpop.xlane.xlu1 %1907  ;;  %v4329_v22 = vpop.eup %4328  ;;  %v4052_v10 = vld [vmem:[%s6585_s5 + $0x8] sm:$0xff] }
 0x51e   : > { %4330 = vrcp.f32 %v1908_v61  ;;  %4137 = vrot.lane.b32.xlu1 %v4136_v0, %s4409_s29  ;;  %v1927_v8 = vmul.f32 %v4329_v22, %v5347_v19  ;;  %v4051_v0 = vld [vmem:[%s6585_s5] sm:$0xff] }
 0x51f   : > { %v1694_v62 = vpack.c.bf16 %v1689_v28, %v1688_v45 }
 0x521   : > { %3835 = vmatmul.msk.bf16.gmra.mxu3 %vm1099_vm15, %v1694_v62 }
 0x524   : > { %v4331_v42 = vpop.eup %4330 }
 0x525   : > { %v1928_v38 = vmul.f32 %v4331_v42, %v5390_v31 }
 0x527   : > { %v1933_v51 = vpack.c.bf16 %v1928_v38, %v1927_v8 }
 0x529   : > { %v1737_v33 = vpop.f32.mrf.mxu3  ;;  %3845 = vmatmul.msk.bf16.gmra.mxu1 %vm1099_vm15, %v1933_v51 }
 0x52b   : > { %v1513_v34 = vpop.f32.mrf.mxu1 }
 0x531   : > { %v1739_v21 = vpop.f32.mrf.mxu3 }
 0x532   : > { %v4111_v46 = vpack.i.bf16 %v1739_v21, %v1737_v33 }
 0x533   : > { %v1515_v47 = vpop.f32.mrf.mxu1 }
 0x534   : > { %v4151_v23 = vpack.i.bf16 %v1515_v47, %v1513_v34  ;;  %4112 = vrot.lane.b32.xlu2 %v4111_v46, %s4410_s14 }
 0x536   : > { %4152 = vrot.lane.b32.xlu1 %v4151_v23, %s4409_s29 }
 0x53b   : > { %v1518_v48 = vpop.f32.mrf.mxu1 }
 0x53e   : > { %2025 = vrot.lane.b32.xlu1 %v1518_v48, %s4409_s29 }
 0x543   : > { %v1520_v17 = vpop.f32.mrf.mxu1 }
 0x562   : > { %v4108_v28 = vpop.permute.xlu1 %4107 }
 0x563   : > { %v4110_v61 = vunpack.i.h.bf16 %v4108_v28  ;;  %v4109_v62 = vunpack.i.l.bf16 %v4108_v28 }
 0x565   : > { %v2109_v38 = vsel %vm1050_vm13, %v5402_v44, %v4110_v61  ;;  %v2108_v51 = vsel %vm1050_vm13, %v5400_v12, %v4109_v62 }
 0x572   : > { %v4123_v17 = vpop.permute.xlu1 %4122 }
 0x576   : > { %v1976_v19 = vpop.f32.mrf.mxu1 }
 0x57e   : > { %v1978_v26 = vpop.f32.mrf.mxu1 }
 0x57f   : > { %v4116_v31 = vpack.i.bf16 %v1978_v26, %v1976_v19  ;;  %v4125_v26 = vunpack.i.h.bf16 %v4123_v17 }
 0x581   : > { %4117 = vrot.lane.b32.xlu0 %v4116_v31, %s4408_s28  ;;  %v4124_v31 = vunpack.i.l.bf16 %v4123_v17  ;;  %v2111_v12 = vsel %vm1050_vm13, %v5406_v52, %v4125_v26 }
 0x583   : > { %v1911_v58 = vpop.xlane.xlu0 %1910 }
 0x584   : > { %4332 = vrcp.f32 %v1911_v58  ;;  %v1742_v40 = vpop.f32.mrf.mxu3 }
 0x585   : > { %v1672_v30 = vpop.xlane.xlu2 %1671 }
 0x586   : > { %4334 = vrcp.f32 %v1672_v30  ;;  %v1981_v35 = vpop.f32.mrf.mxu1  ;;  %v2110_v30 = vsel %vm1050_vm13, %v5404_v7, %v4124_v31 }
 0x58a   : > { %v4333_v4 = vpop.eup %4332 }
 0x58b   : > { %v1929_v57 = vmul.f32 %v4333_v4, %v5431_v32  ;;  %v4057_v32 = vld [vmem:[%s6585_s5 + $0x30] sm:$0xff] }
 0x58c   : > { %v4335_v41 = vpop.eup %4334  ;;  %v1744_v1 = vpop.f32.mrf.mxu3  ;;  %2211 = vmatpush.bf16.msra.mxu2 %v4057_v32 }
 0x58d   : > { %v1690_v53 = vmul.f32 %v4335_v41, %v4319_v11  ;;  %v4126_v43 = vpack.i.bf16 %v1744_v1, %v1742_v40  ;;  %v1934_v49 = vpack.c.bf16 %v1929_v57, %v1929_v57  ;;  %v4056_v11 = vld [vmem:[%s6585_s5 + $0x28] sm:$0xff] }
 0x58e   : > { %v1983_v39 = vpop.f32.mrf.mxu1  ;;  %v4113_v45 = vpop.permute.xlu2 %4112 }
 0x58f   : > { %v4131_v15 = vpack.i.bf16 %v1983_v39, %v1981_v35  ;;  %4127 = vrot.lane.b32.xlu2 %v4126_v43, %s4410_s14  ;;  %3846 = vmatmul.msk.bf16.gmra.mxu1 %vm1099_vm15, %v1934_v49  ;;  %v1695_v36 = vpack.c.bf16 %v1690_v53, %v1690_v53  ;;  %v4115_v22 = vunpack.i.h.bf16 %v4113_v45  ;;  %v4114_v42 = vunpack.i.l.bf16 %v4113_v45 }
 0x590   : > { %2212 = vmatpush.bf16.msra.mxu2 %v4056_v11  ;;  %v4138_v39 = vpop.permute.xlu1 %4137 }
 0x591   : > { %3836 = vmatmul.msk.bf16.gmra.mxu3 %vm1099_vm15, %v1695_v36  ;;  %4132 = vrot.lane.b32.xlu0 %v4131_v15, %s4408_s28  ;;  %v2119_v21 = vsel %vm2117_vm0, %v2109_v38, %v4115_v22  ;;  %v2118_v46 = vsel %vm2117_vm0, %v2108_v51, %v4114_v42  ;;  %v4140_v15 = vunpack.i.h.bf16 %v4138_v39  ;;  %v4139_v36 = vunpack.i.l.bf16 %v4138_v39 }
 0x594   : > { %v1747_v29 = vpop.f32.mrf.mxu3  ;;  %2213 = vmatpush.bf16.msra.mxu2 %v4055_v6 }
 0x596   : > { %v1986_v14 = vpop.f32.mrf.mxu1 }
 0x598   : > { %2214 = vmatpush.bf16.msra.mxu2 %v4054_v55 }
 0x59c   : > { %v1749_v5 = vpop.f32.mrf.mxu3  ;;  %2215 = vmatpush.bf16.msra.mxu2 %v4053_v27 }
 0x59d   : > { %v4141_v25 = vpack.i.bf16 %v1749_v5, %v1747_v29  ;;  %v2113_v29 = vsel %vm1050_vm13, %v5414_v18, %v4140_v15  ;;  %v4395_v15 = vld [vmem:[%s4498_s30 + $0x28] sm:$0xff] }
 0x59e   : > { %v1988_v3 = vpop.f32.mrf.mxu1 }
 0x59f   : > { %v4146_v56 = vpack.i.bf16 %v1988_v3, %v1986_v14  ;;  %4142 = vrot.lane.b32.xlu2 %v4141_v25, %s4410_s14  ;;  %v2112_v14 = vsel %vm1050_vm13, %v5409_v16, %v4139_v36 }
 0x5a0   : > { %2216 = vmatpush.bf16.msra.mxu2 %v4052_v10 }
 0x5a1   : > { %4147 = vrot.lane.b32.xlu0 %v4146_v56, %s4408_s28 }
 0x5a4   : > { %v1752_v9 = vpop.f32.mrf.mxu3  ;;  %2217 = vmatpush.bf16.msra.mxu2 %v4051_v0 }
 0x5a6   : > { %v1991_v50 = vpop.f32.mrf.mxu1 }
 0x5ac   : > { %v1754_v20 = vpop.f32.mrf.mxu3 }
 0x5ad   : > { %v4156_v59 = vpack.i.bf16 %v1754_v20, %v1752_v9 }
 0x5ae   : > { %v1993_v37 = vpop.f32.mrf.mxu1 }
 0x5af   : > { %v4161_v2 = vpack.i.bf16 %v1993_v37, %v1991_v50  ;;  %4157 = vrot.lane.b32.xlu2 %v4156_v59, %s4410_s14  ;;  %v4153_v59 = vpop.permute.xlu1 %4152 }
 0x5b0   : > { %v4155_v16 = vunpack.i.h.bf16 %v4153_v59 }
 0x5b1   : > { %4162 = vrot.lane.b32.xlu0 %v4161_v2, %s4408_s28  ;;  %v4154_v2 = vunpack.i.l.bf16 %v4153_v59 }
 0x5b2   : > { %v2115_v0 = vsel %vm1050_vm13, %v5427_v60, %v4155_v16  ;;  %v5523_v60 = vld [vmem:[%s6586_s6] ss:$0 sm:$0xff] }
 0x5b3   : > { %v2114_v28 = vsel %vm1050_vm13, %v5420_v54, %v4154_v2 }
 0x5b7   : > { %v2026_v54 = vpop.permute.xlu1 %2025 }
 0x5e9   : > { %v4128_v19 = vpop.permute.xlu2 %4127 }
 0x5ea   : > { %v4130_v44 = vunpack.i.h.bf16 %v4128_v19  ;;  %v4129_v58 = vunpack.i.l.bf16 %v4128_v19 }
 0x5ec   : > { %v2120_v57 = vsel %vm2117_vm0, %v2110_v30, %v4129_v58  ;;  %v2121_v41 = vsel %vm2117_vm0, %v2111_v12, %v4130_v44  ;;  %v4391_v44 = vld [vmem:[%s4498_s30 + $0x8] sm:$0xff]  ;;  %v4392_v12 = vld [vmem:[%s4498_s30 + $0x10] sm:$0xff] }
 0x5f3   : > { %v4118_v8 = vpop.permute.xlu0 %4117 }
 0x5f4   : > { %v4120_v33 = vunpack.i.h.bf16 %v4118_v8  ;;  %v4119_v34 = vunpack.i.l.bf16 %v4118_v8 }
 0x5f6   : > { %v2129_v47 = vsel %vm2127_vm1, %v2119_v21, %v4120_v33  ;;  %v2128_v23 = vsel %vm2127_vm1, %v2118_v46, %v4119_v34  ;;  %v2116_v21 = vsel %vm1050_vm13, %v5437_v24, %v2026_v54 }
 0x5f7   : > { %v2137_v48 = vpack.c.bf16 %v2129_v47, %v2128_v23  ;;  %v4390_v47 = vld [vmem:[%s4498_s30] sm:$0xff] }
 0x5f9   : > { %2218 = vmatmul.bf16.vlgmr.msra.gmra.mxu2 %v2137_v48  ;;  %v4143_v52 = vpop.permute.xlu2 %4142 }
 0x5fa   : > { %v4145_v7 = vunpack.i.h.bf16 %v4143_v52  ;;  %v4144_v63 = vunpack.i.l.bf16 %v4143_v52 }
 0x5fc   : > { %v2122_v3 = vsel %vm2117_vm0, %v2112_v14, %v4144_v63  ;;  %v2123_v56 = vsel %vm2117_vm0, %v2113_v29, %v4145_v7 }
 0x603   : > { %v4133_v40 = vpop.permute.xlu0 %4132 }
 0x604   : > { %v4135_v35 = vunpack.i.h.bf16 %v4133_v40  ;;  %v4134_v4 = vunpack.i.l.bf16 %v4133_v40 }
 0x606   : > { %v2130_v1 = vsel %vm2127_vm1, %v2120_v57, %v4134_v4  ;;  %v2131_v53 = vsel %vm2127_vm1, %v2121_v41, %v4135_v35  ;;  %v4393_v57 = vld [vmem:[%s4498_s30 + $0x18] sm:$0xff] }
 0x607   : > { %v2138_v43 = vpack.c.bf16 %v2131_v53, %v2130_v1 }
 0x609   : > { %2223 = vmatmul.bf16.gmra.mxu2 %v2138_v43  ;;  %v4158_v37 = vpop.permute.xlu2 %4157  ;;  %v4394_v43 = vld [vmem:[%s4498_s30 + $0x20] sm:$0xff] }
 0x60a   : > { %v4160_v55 = vunpack.i.h.bf16 %v4158_v37  ;;  %v4159_v27 = vunpack.i.l.bf16 %v4158_v37 }
 0x60c   : > { %v1996_v49 = vpop.f32.mrf.mxu1  ;;  %v2124_v62 = vsel %vm2117_vm0, %v2114_v28, %v4159_v27  ;;  %v2125_v22 = vsel %vm2117_vm0, %v2115_v0, %v4160_v55 }
 0x60d   : > { %2097 = vrot.lane.b32.xlu0 %v1996_v49, %s4408_s28 }
 0x613   : > { %v4148_v32 = vpop.permute.xlu0 %4147 }
 0x614   : > { %v4150_v11 = vunpack.i.h.bf16 %v4148_v32  ;;  %v4149_v6 = vunpack.i.l.bf16 %v4148_v32  ;;  %v1757_v5 = vpop.f32.mrf.mxu3  ;;  %v1998_v25 = vpop.f32.mrf.mxu1  ;;  %v4396_v32 = vld [vmem:[%s4498_s30 + $0x30] sm:$0xff] }
 0x615   : > { %2061 = vrot.lane.b32.xlu2 %v1757_v5, %s4410_s14 }
 0x616   : > { %v2132_v9 = vsel %vm2127_vm1, %v2122_v3, %v4149_v6  ;;  %v2133_v50 = vsel %vm2127_vm1, %v2123_v56, %v4150_v11 }
 0x617   : > { %v2139_v20 = vpack.c.bf16 %v2133_v50, %v2132_v9 }
 0x619   : > { %2228 = vmatmul.bf16.gmra.mxu2 %v2139_v20  ;;  %v4397_v20 = vld [vmem:[%s4498_s30 + $0x38] sm:$0xff] }
 0x61c   : > { %v1759_v18 = vpop.f32.mrf.mxu3 }
 0x623   : > { %v4163_v10 = vpop.permute.xlu0 %4162 }
 0x624   : > { %v4165_v45 = vunpack.i.h.bf16 %v4163_v10  ;;  %v4164_v61 = vunpack.i.l.bf16 %v4163_v10  ;;  %v4398_v10 = vld [vmem:[%s4498_s30 + $0x40] sm:$0xff] }
 0x626   : > { %v2134_v42 = vsel %vm2127_vm1, %v2124_v62, %v4164_v61  ;;  %v2135_v8 = vsel %vm2127_vm1, %v2125_v22, %v4165_v45 }
 0x627   : > { %v2140_v38 = vpack.c.bf16 %v2135_v8, %v2134_v42 }
 0x629   : > { %2233 = vmatmul.bf16.gmra.mxu2 %v2140_v38 }
 0x66f   : > { %v2062_v51 = vpop.permute.xlu2 %2061 }
 0x670   : > { %v2126_v46 = vsel %vm2117_vm0, %v2116_v21, %v2062_v51 }
 0x67c   : > { %v2219_v33 = vpop.f32.mrf.mxu2 }
 0x67d   : > { %v2220_v34 = vadd.f32 %v5523_v60, %v2219_v33 }
 0x67f   : > { %v5530_v23 = vadd.f32 %v4390_v47, %v2220_v34  ;;  %v2098_v48 = vpop.permute.xlu0 %2097 }
 0x680   : > { %v2136_v17 = vsel %vm2127_vm1, %v2126_v46, %v2098_v48 }
 0x681   : > { %v2141_v19 = vpack.c.bf16 %v2136_v17, %v2136_v17  ;;  %2254 = vadd.xlane.f32.xlu1 %v5530_v23 }
 0x683   : > { %2238 = vmatmul.bf16.gmra.mxu2 %v2141_v19  ;;  %v3937_v19 = vld [vmem:[%s6589_s9 + $0x70] sm:$0xf] }
 0x684   : > { %v2221_v26 = vpop.f32.mrf.mxu2 }
 0x685   : > { %v2222_v31 = vadd.f32 %v5523_v60, %v2221_v26  ;;  %v4074_v26 = vld [vmem:[%s6589_s9 + $0x74] sm:$0xf0] }
 0x687   : > { %v5536_v24 = vadd.f32 %v4391_v44, %v2222_v31  ;;  %v4073_v31 = vld [vmem:[%s6589_s9 + $0x74] sm:$0xf]  ;;  %v3938_v44 = vor.u32 %v4074_v26, %v3937_v19  ;;  %v4059_v26 = vld [vmem:[%s6589_s9 + $0x4] sm:$0xf] }
 0x689   : > { %2256 = vadd.xlane.f32.xlu2 %v5536_v24  ;;  %2565 = vmatpush.bf16.msrb.mxu3 %v3938_v44 }
 0x68c   : > { %v2224_v58 = vpop.f32.mrf.mxu2 }
 0x68d   : > { %v2225_v40 = vadd.f32 %v5523_v60, %v2224_v58  ;;  %v3939_v58 = vld [vmem:[%s6589_s9 + $0x78] sm:$0xf0] }
 0x68f   : > { %v5541_v30 = vadd.f32 %v4392_v12, %v2225_v40  ;;  %v3942_v40 = vor.u32 %v4073_v31, %v3939_v58  ;;  %v3929_v12 = vld [vmem:[%s6589_s9 + $0x60] sm:$0xf]  ;;  %v3883_v31 = vld [vmem:[%s6589_s9 + $0x8] sm:$0xf0] }
 0x690   : > { %v3886_v44 = vor.u32 %v4059_v26, %v3883_v31 }
 0x691   : > { %2258 = vadd.xlane.f32.xlu0 %v5541_v30  ;;  %2598 = vmatpush.bf16.msrb.mxu0 %v3942_v40 }
 0x694   : > { %v2226_v35 = vpop.f32.mrf.mxu2 }
 0x695   : > { %v2227_v4 = vadd.f32 %v5523_v60, %v2226_v35  ;;  %v4072_v35 = vld [vmem:[%s6589_s9 + $0x64] sm:$0xf0] }
 0x697   : > { %v5546_v41 = vadd.f32 %v4393_v57, %v2227_v4  ;;  %v4071_v4 = vld [vmem:[%s6589_s9 + $0x64] sm:$0xf]  ;;  %v3930_v57 = vor.u32 %v4072_v35, %v3929_v12 }
 0x699   : > { %2260 = vadd.xlane.f32.xlu1 %v5546_v41  ;;  %2566 = vmatpush.bf16.msrb.mxu3 %v3930_v57 }
 0x69c   : > { %v2229_v1 = vpop.f32.mrf.mxu2 }
 0x69d   : > { %v2230_v53 = vadd.f32 %v5523_v60, %v2229_v1  ;;  %v3931_v1 = vld [vmem:[%s6589_s9 + $0x68] sm:$0xf0] }
 0x69f   : > { %v5551_v49 = vadd.f32 %v4394_v43, %v2230_v53  ;;  %v3934_v53 = vor.u32 %v4071_v4, %v3931_v1  ;;  %v3921_v43 = vld [vmem:[%s6589_s9 + $0x50] sm:$0xf] }
 0x6a1   : > { %2262 = vadd.xlane.f32.xlu2 %v5551_v49  ;;  %2599 = vmatpush.bf16.msrb.mxu0 %v3934_v53 }
 0x6a4   : > { %v2231_v39 = vpop.f32.mrf.mxu2 }
 0x6a5   : > { %v2232_v52 = vadd.f32 %v5523_v60, %v2231_v39  ;;  %v4070_v39 = vld [vmem:[%s6589_s9 + $0x54] sm:$0xf0] }
 0x6a7   : > { %v5556_v36 = vadd.f32 %v4395_v15, %v2232_v52  ;;  %v4069_v52 = vld [vmem:[%s6589_s9 + $0x54] sm:$0xf]  ;;  %v3922_v15 = vor.u32 %v4070_v39, %v3921_v43 }
 0x6a9   : > { %2264 = vadd.xlane.f32.xlu0 %v5556_v36  ;;  %2567 = vmatpush.bf16.msrb.mxu3 %v3922_v15 }
 0x6ac   : > { %v2234_v7 = vpop.f32.mrf.mxu2 }
 0x6ad   : > { %v2235_v63 = vadd.f32 %v5523_v60, %v2234_v7  ;;  %v3923_v7 = vld [vmem:[%s6589_s9 + $0x58] sm:$0xf0] }
 0x6af   : > { %v5561_v29 = vadd.f32 %v4396_v32, %v2235_v63  ;;  %v3926_v63 = vor.u32 %v4069_v52, %v3923_v7  ;;  %v3913_v32 = vld [vmem:[%s6589_s9 + $0x40] sm:$0xf] }
 0x6b1   : > { %2266 = vadd.xlane.f32.xlu0 %v5561_v29  ;;  %2600 = vmatpush.bf16.msrb.mxu0 %v3926_v63 }
 0x6b4   : > { %v2236_v25 = vpop.f32.mrf.mxu2 }
 0x6b5   : > { %v2237_v56 = vadd.f32 %v5523_v60, %v2236_v25  ;;  %v3915_v25 = vld [vmem:[%s6589_s9 + $0x48] sm:$0xf0] }
 0x6b7   : > { %v5576_v18 = vadd.f32 %v4397_v20, %v2237_v56  ;;  %v3905_v56 = vld [vmem:[%s6589_s9 + $0x30] sm:$0xf]  ;;  %v4065_v20 = vld [vmem:[%s6589_s9 + $0x34] sm:$0xf] }
 0x6f4   : > { %v2255_v14 = vpop.xlane.xlu1 %2254 }
 0x6f5   : > { %v2272_v11 = vmul.f32 %v2255_v14, %v4507_v13  ;;  %v4068_v14 = vld [vmem:[%s6589_s9 + $0x44] sm:$0xf0] }
 0x6f7   : > { %v5566_v6 = vsub.f32 %v5530_v23, %v2272_v11  ;;  %v4067_v11 = vld [vmem:[%s6589_s9 + $0x44] sm:$0xf] }
 0x6f9   : > { %v2290_v5 = vmul.f32 %v5566_v6, %v5566_v6 }
 0x6fb   : > { %2299 = vadd.xlane.f32.xlu1 %v2290_v5  ;;  %v3914_v5 = vor.u32 %v4068_v14, %v3913_v32 }
 0x6fc   : > { %v2257_v3 = vpop.xlane.xlu2 %2256 }
 0x6fd   : > { %v2273_v9 = vmul.f32 %v2257_v3, %v4507_v13  ;;  %v3918_v3 = vor.u32 %v4067_v11, %v3915_v25  ;;  %2568 = vmatpush.bf16.msrb.mxu3 %v3914_v5 }
 0x6ff   : > { %v5573_v50 = vsub.f32 %v5536_v24, %v2273_v9  ;;  %2601 = vmatpush.bf16.msrb.mxu0 %v3918_v3  ;;  %v4066_v9 = vld [vmem:[%s6589_s9 + $0x34] sm:$0xf0] }
 0x701   : > { %v2291_v59 = vmul.f32 %v5573_v50, %v5573_v50 }
 0x703   : > { %2301 = vadd.xlane.f32.xlu2 %v2291_v59  ;;  %2268 = vadd.xlane.f32.xlu1 %v5576_v18  ;;  %v3906_v59 = vor.u32 %v4066_v9, %v3905_v56 }
 0x704   : > { %v2259_v37 = vpop.xlane.xlu0 %2258 }
 0x705   : > { %v2274_v16 = vmul.f32 %v2259_v37, %v4507_v13  ;;  %v3907_v37 = vld [vmem:[%s6589_s9 + $0x38] sm:$0xf0]  ;;  %2569 = vmatpush.bf16.msrb.mxu3 %v3906_v59 }
 0x706   : > { %v2239_v2 = vpop.f32.mrf.mxu2 }
 0x707   : > { %v5583_v55 = vsub.f32 %v5541_v30, %v2274_v16  ;;  %v2240_v27 = vadd.f32 %v5523_v60, %v2239_v2  ;;  %v3910_v16 = vor.u32 %v4065_v20, %v3907_v37  ;;  %v3897_v2 = vld [vmem:[%s6589_s9 + $0x20] sm:$0xf] }
 0x709   : > { %v5587_v0 = vadd.f32 %v4398_v10, %v2240_v27  ;;  %v2292_v28 = vmul.f32 %v5583_v55, %v5583_v55  ;;  %2602 = vmatpush.bf16.msrb.mxu0 %v3910_v16  ;;  %v4064_v27 = vld [vmem:[%s6589_s9 + $0x24] sm:$0xf0]  ;;  %v4063_v10 = vld [vmem:[%s6589_s9 + $0x24] sm:$0xf] }
 0x70b   : > { %2303 = vadd.xlane.f32.xlu2 %v2292_v28  ;;  %2270 = vadd.xlane.f32.xlu1 %v5587_v0  ;;  %v3898_v28 = vor.u32 %v4064_v27, %v3897_v2 }
 0x70c   : > { %v2261_v45 = vpop.xlane.xlu1 %2260 }
 0x70d   : > { %v2275_v61 = vmul.f32 %v2261_v45, %v4507_v13  ;;  %v3899_v45 = vld [vmem:[%s6589_s9 + $0x28] sm:$0xf0]  ;;  %2570 = vmatpush.bf16.msrb.mxu3 %v3898_v28  ;;  %v5731_v28 = vld [vmem:[%s6587_s7] ss:$0 sm:$0xff] }
 0x70e   : > { %v2241_v62 = vpop.f32.mrf.mxu2 }
 0x70f   : > { %v5594_v22 = vsub.f32 %v5546_v41, %v2275_v61  ;;  %v3902_v61 = vor.u32 %v4063_v10, %v3899_v45  ;;  %v3889_v62 = vld [vmem:[%s6589_s9 + $0x10] sm:$0xf] }
 0x711   : > { %v2293_v42 = vmul.f32 %v5594_v22, %v5594_v22  ;;  %2603 = vmatpush.bf16.msrb.mxu0 %v3902_v61 }
 0x713   : > { %2305 = vadd.xlane.f32.xlu0 %v2293_v42  ;;  %v4062_v42 = vld [vmem:[%s6589_s9 + $0x14] sm:$0xf0] }
 0x714   : > { %v2263_v8 = vpop.xlane.xlu2 %2262 }
 0x715   : > { %v2276_v38 = vmul.f32 %v2263_v8, %v4507_v13  ;;  %v4061_v8 = vld [vmem:[%s6589_s9 + $0x14] sm:$0xf] }
 0x717   : > { %v5600_v60 = vsub.f32 %v5551_v49, %v2276_v38 }
 0x719   : > { %v2294_v54 = vmul.f32 %v5600_v60, %v5600_v60 }
 0x71b   : > { %2307 = vadd.xlane.f32.xlu2 %v2294_v54  ;;  %v3890_v54 = vor.u32 %v4062_v42, %v3889_v62 }
 0x71c   : > { %v2265_v51 = vpop.xlane.xlu0 %2264 }
 0x71d   : > { %v2277_v33 = vmul.f32 %v2265_v51, %v4507_v13  ;;  %v3891_v51 = vld [vmem:[%s6589_s9 + $0x18] sm:$0xf0]  ;;  %2571 = vmatpush.bf16.msrb.mxu3 %v3890_v54  ;;  %v5737_v54 = vld [vmem:[%s6588_s8] ss:$0 sm:$0xff] }
 0x71f   : > { %v5606_v34 = vsub.f32 %v5556_v36, %v2277_v33 }
 0x721   : > { %v2295_v21 = vmul.f32 %v5606_v34, %v5606_v34 }
 0x723   : > { %2309 = vadd.xlane.f32.xlu0 %v2295_v21  ;;  %v3894_v21 = vor.u32 %v4061_v8, %v3891_v51 }
 0x724   : > { %v2267_v46 = vpop.xlane.xlu0 %2266 }
 0x725   : > { %v2278_v47 = vmul.f32 %v2267_v46, %v4507_v13  ;;  %2604 = vmatpush.bf16.msrb.mxu0 %v3894_v21 }
 0x727   : > { %v5612_v48 = vsub.f32 %v5561_v29, %v2278_v47  ;;  %v3881_v47 = vld [vmem:[%s6589_s9] sm:$0xf] }
 0x729   : > { %v2296_v17 = vmul.f32 %v5612_v48, %v5612_v48  ;;  %2605 = vmatpush.bf16.msrb.mxu0 %v3886_v44 }
 0x72b   : > { %2311 = vadd.xlane.f32.xlu1 %v2296_v17  ;;  %v4060_v17 = vld [vmem:[%s6589_s9 + $0x4] sm:$0xf0] }
 0x72c   : > { %v3882_v19 = vor.u32 %v4060_v17, %v3881_v47 }
 0x72e   : > { %2572 = vmatpush.bf16.msrb.mxu3 %v3882_v19 }
 0x76e   : > { %v2300_v38 = vpop.xlane.xlu1 %2299 }
 0x76f   : > { %v2317_v33 = vmul.f32 %v2300_v38, %v4507_v13 }
 0x771   : > { %v2326_v46 = vadd.f32 1e-06, %v2317_v33 }
 0x773   : > { %4336 = vrsqrt.f32 %v2326_v46  ;;  %vm2341_vm3 = vweird.f32 %v2326_v46 }
 0x776   : > { %v2302_v58 = vpop.xlane.xlu2 %2301  ;;  %v2269_v40 = vpop.xlane.xlu1 %2268 }
 0x777   : > { %v2318_v12 = vmul.f32 %v2302_v58, %v4507_v13  ;;  %v2279_v35 = vmul.f32 %v2269_v40, %v4507_v13 }
 0x779   : > { %v4337_v4 = vpop.eup %4336  ;;  %v2327_v57 = vadd.f32 1e-06, %v2318_v12  ;;  %v5716_v1 = vsub.f32 %v5576_v18, %v2279_v35 }
 0x77a   : > { %v2336_v53 = vmul.f32 %v4337_v4, %v2326_v46  ;;  %vm2342_vm2 = vweird.f32 %v4337_v4 }
 0x77b   : > { %4338 = vrsqrt.f32 %v2327_v57  ;;  %v2297_v43 = vmul.f32 %v5716_v1, %v5716_v1  ;;  %vm2343_vm4 = vmor %vm2341_vm3, %vm2342_vm2  ;;  %vm2351_vm6 = vweird.f32 %v2327_v57 }
 0x77c   : > { %v2337_v39 = vmul.f32 %v4337_v4, %v2336_v53 }
 0x77d   : > { %2313 = vadd.xlane.f32.xlu2 %v2297_v43 }
 0x77e   : > { %v2338_v52 = vmul.f32 0.5, %v2337_v39  ;;  %v2304_v15 = vpop.xlane.xlu2 %2303  ;;  %v2271_v7 = vpop.xlane.xlu1 %2270 }
 0x77f   : > { %v2319_v63 = vmul.f32 %v2304_v15, %v4507_v13  ;;  %v2280_v32 = vmul.f32 %v2271_v7, %v4507_v13 }
 0x780   : > { %v2339_v14 = vsub.f32 1.5, %v2338_v52 }
 0x781   : > { %v4339_v11 = vpop.eup %4338  ;;  %v2328_v5 = vadd.f32 1e-06, %v2319_v63  ;;  %v5723_v25 = vsub.f32 %v5587_v0, %v2280_v32 }
 0x782   : > { %v2340_v3 = vmul.f32 %v4337_v4, %v2339_v14  ;;  %v2346_v56 = vmul.f32 %v4339_v11, %v2327_v57  ;;  %vm2352_vm5 = vweird.f32 %v4339_v11 }
 0x783   : > { %4340 = vrsqrt.f32 %v2328_v5  ;;  %v2298_v9 = vmul.f32 %v5723_v25, %v5723_v25  ;;  %vm2353_vm7 = vmor %vm2351_vm6, %vm2352_vm5  ;;  %vm2361_vm9 = vweird.f32 %v2328_v5 }
 0x784   : > { %v2347_v20 = vmul.f32 %v4339_v11, %v2346_v56  ;;  %v2344_v59 = vsel %vm2343_vm4, %v4337_v4, %v2340_v3 }
 0x785   : > { %2315 = vadd.xlane.f32.xlu0 %v2298_v9  ;;  %v2425_v45 = vmul.f32 %v2344_v59, %v5566_v6 }
 0x786   : > { %v2348_v37 = vmul.f32 0.5, %v2347_v20  ;;  %v2306_v16 = vpop.xlane.xlu0 %2305 }
 0x787   : > { %v2320_v2 = vmul.f32 %v2306_v16, %v4507_v13  ;;  %v2437_v51 = vmul.f32 %v5731_v28, %v2425_v45 }
 0x788   : > { %v2349_v27 = vsub.f32 1.5, %v2348_v37 }
 0x789   : > { %v4341_v10 = vpop.eup %4340  ;;  %v2329_v61 = vadd.f32 1e-06, %v2320_v2  ;;  %v2449_v26 = vadd.f32 %v5737_v54, %v2437_v51 }
 0x78a   : > { %v2350_v62 = vmul.f32 %v4339_v11, %v2349_v27  ;;  %v2356_v42 = vmul.f32 %v4341_v10, %v2328_v5  ;;  %vm2362_vm8 = vweird.f32 %v4341_v10 }
 0x78b   : > { %4342 = vrsqrt.f32 %v2329_v61  ;;  %vm2363_vm10 = vmor %vm2361_vm9, %vm2362_vm8  ;;  %vm2371_vm12 = vweird.f32 %v2329_v61 }
 0x78c   : > { %v2354_v8 = vsel %vm2353_vm7, %v4339_v11, %v2350_v62  ;;  %v2357_v38 = vmul.f32 %v4341_v10, %v2356_v42 }
 0x78d   : > { %v2426_v33 = vmul.f32 %v2354_v8, %v5573_v50 }
 0x78e   : > { %v2358_v21 = vmul.f32 0.5, %v2357_v38  ;;  %v2308_v46 = vpop.xlane.xlu2 %2307 }
 0x78f   : > { %v2438_v6 = vmul.f32 %v5731_v28, %v2426_v33  ;;  %v2321_v47 = vmul.f32 %v2308_v46, %v4507_v13 }
 0x790   : > { %v2359_v17 = vsub.f32 1.5, %v2358_v21 }
 0x791   : > { %v4343_v19 = vpop.eup %4342  ;;  %v2450_v31 = vadd.f32 %v5737_v54, %v2438_v6  ;;  %v2330_v44 = vadd.f32 1e-06, %v2321_v47 }
 0x792   : > { %v2360_v58 = vmul.f32 %v4341_v10, %v2359_v17  ;;  %v2366_v40 = vmul.f32 %v4343_v19, %v2329_v61  ;;  %vm2372_vm11 = vweird.f32 %v4343_v19 }
 0x793   : > { %4344 = vrsqrt.f32 %v2330_v44  ;;  %v2458_v12 = vpack.c.bf16 %v2450_v31, %v2449_v26  ;;  %vm2373_vm13 = vmor %vm2371_vm12, %vm2372_vm11  ;;  %vm2381_vm15 = vweird.f32 %v2330_v44 }
 0x794   : > { %v2367_v50 = vmul.f32 %v4343_v19, %v2366_v40  ;;  %v2364_v35 = vsel %vm2363_vm10, %v4341_v10, %v2360_v58 }
 0x795   : > { %2573 = vmatmul.bf16.vlgmr.msrb.gmra.mxu3 %v2458_v12  ;;  %2606 = vmatmul.bf16.vlgmr.msrb.gmra.mxu0 %v2458_v12  ;;  %v2427_v52 = vmul.f32 %v2364_v35, %v5583_v55 }
 0x796   : > { %v2368_v4 = vmul.f32 0.5, %v2367_v50  ;;  %v2310_v57 = vpop.xlane.xlu0 %2309 }
 0x797   : > { %v2322_v53 = vmul.f32 %v2310_v57, %v4507_v13  ;;  %v2439_v5 = vmul.f32 %v5731_v28, %v2427_v52 }
 0x798   : > { %v2369_v43 = vsub.f32 1.5, %v2368_v4 }
 0x799   : > { %v4345_v39 = vpop.eup %4344  ;;  %v2331_v15 = vadd.f32 1e-06, %v2322_v53  ;;  %v2451_v59 = vadd.f32 %v5737_v54, %v2439_v5 }
 0x79a   : > { %v2370_v7 = vmul.f32 %v4343_v19, %v2369_v43  ;;  %v2376_v63 = vmul.f32 %v4345_v39, %v2330_v44  ;;  %vm2382_vm14 = vweird.f32 %v4345_v39 }
 0x79b   : > { %4346 = vrsqrt.f32 %v2331_v15  ;;  %vm2383_vm0 = vmor %vm2381_vm15, %vm2382_vm14  ;;  %vm2391_vm2 = vweird.f32 %v2331_v15 }
 0x79c   : > { %v2374_v32 = vsel %vm2373_vm13, %v4343_v19, %v2370_v7  ;;  %v2377_v14 = vmul.f32 %v4345_v39, %v2376_v63 }
 0x79d   : > { %v2428_v11 = vmul.f32 %v2374_v32, %v5594_v22 }
 0x79e   : > { %v2378_v3 = vmul.f32 0.5, %v2377_v14  ;;  %v2312_v6 = vpop.xlane.xlu1 %2311 }
 0x79f   : > { %v2440_v56 = vmul.f32 %v5731_v28, %v2428_v11 }
 0x7a0   : > { %v2379_v9 = vsub.f32 1.5, %v2378_v3 }
 0x7a1   : > { %v4347_v20 = vpop.eup %4346  ;;  %v2452_v55 = vadd.f32 %v5737_v54, %v2440_v56 }
 0x7a2   : > { %v2380_v37 = vmul.f32 %v4345_v39, %v2379_v9  ;;  %v2386_v16 = vmul.f32 %v4347_v20, %v2331_v15  ;;  %vm2392_vm1 = vweird.f32 %v4347_v20 }
 0x7a3   : > { %v2459_v2 = vpack.c.bf16 %v2452_v55, %v2451_v59  ;;  %vm2393_vm3 = vmor %vm2391_vm2, %vm2392_vm1 }
 0x7a4   : > { %v2387_v27 = vmul.f32 %v4347_v20, %v2386_v16  ;;  %v2384_v22 = vsel %vm2383_vm0, %v4345_v39, %v2380_v37  ;;  %v2479_v37 = vld [vmem:[%s6590_s10] sm:$0x3] }
 0x7a5   : > { %2578 = vmatmul.bf16.gmra.mxu3 %v2459_v2  ;;  %2611 = vmatmul.bf16.gmra.mxu0 %v2459_v2  ;;  %v2429_v61 = vmul.f32 %v2384_v22, %v5600_v60  ;;  %v2323_v60 = vmul.f32 %v2312_v6, %v4507_v13  ;;  %v5770_v2 = vperm.slane %v2479_v37, 1 }
 0x7a6   : > { %v2388_v10 = vmul.f32 0.5, %v2387_v27 }
 0x7a7   : > { %v2441_v38 = vmul.f32 %v5731_v28, %v2429_v61  ;;  %v2332_v47 = vadd.f32 1e-06, %v2323_v60  ;;  %v5779_v61 = vperm.slane %v2479_v37, 0 }
 0x7a8   : > { %v2389_v45 = vsub.f32 1.5, %v2388_v10 }
 0x7a9   : > { %v2453_v33 = vadd.f32 %v5737_v54, %v2441_v38  ;;  %4348 = vrsqrt.f32 %v2332_v47  ;;  %vm2401_vm5 = vweird.f32 %v2332_v47 }
 0x7aa   : > { %v2390_v62 = vmul.f32 %v4347_v20, %v2389_v45 }
 0x7ac   : > { %v2394_v42 = vsel %vm2393_vm3, %v4347_v20, %v2390_v62 }
 0x7ad   : > { %v2430_v8 = vmul.f32 %v2394_v42, %v5606_v34 }
 0x7af   : > { %v2442_v51 = vmul.f32 %v5731_v28, %v2430_v8  ;;  %v4349_v17 = vpop.eup %4348 }
 0x7b0   : > { %v2396_v19 = vmul.f32 %v4349_v17, %v2332_v47  ;;  %vm2402_vm4 = vweird.f32 %v4349_v17 }
 0x7b1   : > { %v2454_v21 = vadd.f32 %v5737_v54, %v2442_v51  ;;  %vm2403_vm6 = vmor %vm2401_vm5, %vm2402_vm4 }
 0x7b2   : > { %v2397_v26 = vmul.f32 %v4349_v17, %v2396_v19 }
 0x7b3   : > { %v2460_v46 = vpack.c.bf16 %v2454_v21, %v2453_v33 }
 0x7b4   : > { %v2398_v58 = vmul.f32 0.5, %v2397_v26 }
 0x7b5   : > { %2583 = vmatmul.bf16.gmra.mxu3 %v2460_v46  ;;  %2616 = vmatmul.bf16.gmra.mxu0 %v2460_v46 }
 0x7b6   : > { %v2399_v40 = vsub.f32 1.5, %v2398_v58 }
 0x7b8   : > { %v2400_v57 = vmul.f32 %v4349_v17, %v2399_v40 }
 0x7ba   : > { %v2404_v39 = vsel %vm2403_vm6, %v4349_v17, %v2400_v57 }
 0x7bb   : > { %v2431_v63 = vmul.f32 %v2404_v39, %v5612_v48 }
 0x7bd   : > { %v2443_v3 = vmul.f32 %v5731_v28, %v2431_v63 }
 0x7bf   : > { %v2455_v59 = vadd.f32 %v5737_v54, %v2443_v3 }
 0x7f0   : > { %v2314_v34 = vpop.xlane.xlu2 %2313 }
 0x7f1   : > { %v2324_v31 = vmul.f32 %v2314_v34, %v4507_v13 }
 0x7f3   : > { %v2333_v44 = vadd.f32 1e-06, %v2324_v31 }
 0x7f5   : > { %4350 = vrsqrt.f32 %v2333_v44  ;;  %vm2411_vm8 = vweird.f32 %v2333_v44 }
 0x7f8   : > { %v2316_v12 = vpop.xlane.xlu0 %2315 }
 0x7f9   : > { %v2325_v50 = vmul.f32 %v2316_v12, %v4507_v13 }
 0x7fb   : > { %v4351_v35 = vpop.eup %4350  ;;  %v2334_v4 = vadd.f32 1e-06, %v2325_v50 }
 0x7fc   : > { %v2406_v53 = vmul.f32 %v4351_v35, %v2333_v44  ;;  %vm2412_vm7 = vweird.f32 %v4351_v35 }
 0x7fd   : > { %4352 = vrsqrt.f32 %v2334_v4  ;;  %vm2413_vm9 = vmor %vm2411_vm8, %vm2412_vm7  ;;  %vm2421_vm11 = vweird.f32 %v2334_v4 }
 0x7fe   : > { %v2407_v43 = vmul.f32 %v4351_v35, %v2406_v53 }
 0x800   : > { %v2408_v52 = vmul.f32 0.5, %v2407_v43 }
 0x802   : > { %v2409_v15 = vsub.f32 1.5, %v2408_v52 }
 0x803   : > { %v4353_v7 = vpop.eup %4352 }
 0x804   : > { %v2410_v32 = vmul.f32 %v4351_v35, %v2409_v15  ;;  %v2416_v14 = vmul.f32 %v4353_v7, %v2334_v4  ;;  %vm2422_vm10 = vweird.f32 %v4353_v7 }
 0x805   : > { %vm2423_vm12 = vmor %vm2421_vm11, %vm2422_vm10 }
 0x806   : > { %v2414_v13 = vsel %vm2413_vm9, %v4351_v35, %v2410_v32  ;;  %v2417_v11 = vmul.f32 %v4353_v7, %v2416_v14 }
 0x807   : > { %v2432_v5 = vmul.f32 %v2414_v13, %v5716_v1 }
 0x808   : > { %v2418_v56 = vmul.f32 0.5, %v2417_v11 }
 0x809   : > { %v2444_v9 = vmul.f32 %v5731_v28, %v2432_v5 }
 0x80a   : > { %v2419_v20 = vsub.f32 1.5, %v2418_v56 }
 0x80b   : > { %v2456_v55 = vadd.f32 %v5737_v54, %v2444_v9 }
 0x80c   : > { %v2420_v48 = vmul.f32 %v4353_v7, %v2419_v20 }
 0x80d   : > { %v2461_v16 = vpack.c.bf16 %v2456_v55, %v2455_v59 }
 0x80e   : > { %v2424_v1 = vsel %vm2423_vm12, %v4353_v7, %v2420_v48 }
 0x80f   : > { %2588 = vmatmul.bf16.gmra.mxu3 %v2461_v16  ;;  %2621 = vmatmul.bf16.gmra.mxu0 %v2461_v16  ;;  %v2433_v27 = vmul.f32 %v2424_v1, %v5723_v25 }
 0x811   : > { %v2445_v62 = vmul.f32 %v5731_v28, %v2433_v27 }
 0x812   : > { %v2607_v22 = vpop.f32.mrf.mxu0 }
 0x813   : > { %v5774_v10 = vadd.f32 %v2607_v22, %v5770_v2  ;;  %v2457_v25 = vadd.f32 %v5737_v54, %v2445_v62 }
 0x815   : > { %v5777_v45 = vmul.f32 0.70710677, %v5774_v10  ;;  %v2462_v17 = vpack.c.bf16 %v2457_v25, %v2457_v25 }
 0x817   : > { %v2707_v42 = vmul.f32 %v5777_v45, %v5777_v45 }
 0x818   : > { %v2574_v8 = vpop.f32.mrf.mxu3 }
 0x819   : > { %v5784_v38 = vmin.f32 %v2707_v42, 16.0  ;;  %v5787_v51 = vadd.f32 %v2574_v8, %v5779_v61 }
 0x81a   : > { %v2609_v33 = vpop.f32.mrf.mxu0 }
 0x81b   : > { %v2709_v21 = vmul.f32 2.1237322e-06, %v5784_v38  ;;  %v2720_v46 = vmul.f32 3.8918573e-05, %v5784_v38  ;;  %v5793_v6 = vadd.f32 %v2609_v33, %v5770_v2  ;;  %v5796_v28 = vmul.f32 0.70710677, %v5787_v51 }
 0x81d   : > { %v2710_v60 = vadd.f32 0.00028619796, %v2709_v21  ;;  %v2721_v47 = vadd.f32 0.001143296, %v2720_v46  ;;  %v2667_v19 = vmul.f32 %v5796_v28, %v5796_v28  ;;  %v5801_v26 = vmul.f32 0.70710677, %v5793_v6 }
 0x81f   : > { %v2711_v54 = vmul.f32 %v2710_v60, %v5784_v38  ;;  %v2722_v34 = vmul.f32 %v2721_v47, %v5784_v38  ;;  %2593 = vmatmul.bf16.gmra.mxu3 %v2462_v17  ;;  %2626 = vmatmul.bf16.gmra.mxu0 %v2462_v17  ;;  %v5805_v31 = vmin.f32 %v2667_v19, 16.0  ;;  %v2787_v44 = vmul.f32 %v5801_v26, %v5801_v26 }
 0x820   : > { %v2576_v58 = vpop.f32.mrf.mxu3 }
 0x821   : > { %v2723_v40 = vadd.f32 0.014752088, %v2722_v34  ;;  %v5810_v12 = vadd.f32 %v2576_v58, %v5779_v61  ;;  %v2669_v50 = vmul.f32 2.1237322e-06, %v5805_v31  ;;  %v2680_v35 = vmul.f32 3.8918573e-05, %v5805_v31 }
 0x822   : > { %v5814_v4 = vmin.f32 %v2787_v44, 16.0  ;;  %v2712_v57 = vadd.f32 0.0036580483, %v2711_v54  ;;  %v2612_v5 = vpop.f32.mrf.mxu0 }
 0x823   : > { %v2724_v53 = vmul.f32 %v2723_v40, %v5784_v38  ;;  %v5818_v43 = vmul.f32 0.70710677, %v5810_v12  ;;  %v2670_v39 = vadd.f32 0.00028619796, %v2669_v50  ;;  %v2681_v52 = vadd.f32 0.001143296, %v2680_v35 }
 0x824   : > { %v2789_v15 = vmul.f32 2.1237322e-06, %v5814_v4  ;;  %v2800_v63 = vmul.f32 3.8918573e-05, %v5814_v4  ;;  %v2713_v3 = vmul.f32 %v2712_v57, %v5784_v38  ;;  %v5833_v1 = vadd.f32 %v2612_v5, %v5770_v2 }
 0x825   : > { %v2725_v7 = vadd.f32 0.112945676, %v2724_v53  ;;  %v2747_v32 = vmul.f32 %v5818_v43, %v5818_v43  ;;  %v2671_v14 = vmul.f32 %v2670_v39, %v5805_v31  ;;  %v2682_v13 = vmul.f32 %v2681_v52, %v5805_v31 }
 0x826   : > { %v2790_v11 = vadd.f32 0.00028619796, %v2789_v15  ;;  %v2801_v9 = vadd.f32 0.001143296, %v2800_v63  ;;  %v2714_v42 = vadd.f32 0.05243302, %v2713_v3 }
 0x827   : > { %v2726_v56 = vmul.f32 %v2725_v7, %v5784_v38  ;;  %v5828_v20 = vmin.f32 %v2747_v32, 16.0  ;;  %v2672_v59 = vadd.f32 0.0036580483, %v2671_v14  ;;  %v2683_v55 = vadd.f32 0.014752088, %v2682_v13 }
 0x828   : > { %v2802_v37 = vmul.f32 %v2801_v9, %v5814_v4  ;;  %v2791_v22 = vmul.f32 %v2790_v11, %v5814_v4  ;;  %v5844_v19 = vmul.f32 0.70710677, %v5833_v1  ;;  %v2715_v44 = vmul.f32 %v2714_v42, %v5784_v38 }
 0x829   : > { %v2727_v48 = vadd.f32 0.4994258, %v2726_v56  ;;  %v2749_v16 = vmul.f32 2.1237322e-06, %v5828_v20  ;;  %v2684_v27 = vmul.f32 %v2683_v55, %v5805_v31  ;;  %v2760_v62 = vmul.f32 3.8918573e-05, %v5828_v20  ;;  %v2579_v55 = vpop.f32.mrf.mxu3 }
 0x82a   : > { %v2803_v25 = vadd.f32 0.014752088, %v2802_v37  ;;  %v2673_v33 = vmul.f32 %v2672_v59, %v5805_v31  ;;  %v2792_v34 = vadd.f32 0.0036580483, %v2791_v22  ;;  %v2867_v53 = vmul.f32 %v5844_v19, %v5844_v19 }
 0x82b   : > { %v2728_v8 = vmul.f32 %v2727_v48, %v5784_v38  ;;  %v2685_v21 = vadd.f32 0.112945676, %v2684_v27  ;;  %v2761_v46 = vadd.f32 0.001143296, %v2760_v62  ;;  %v2750_v17 = vadd.f32 0.00028619796, %v2749_v16 }
 0x82c   : > { %v2804_v47 = vmul.f32 %v2803_v25, %v5814_v4  ;;  %v2674_v40 = vadd.f32 0.05243302, %v2673_v33  ;;  %v2793_v52 = vmul.f32 %v2792_v34, %v5814_v4  ;;  %v2716_v15 = vadd.f32 0.18741608, %v2715_v44 }
 0x82d   : > { %v5840_v60 = vadd.f32 1.0, %v2728_v8  ;;  %v2686_v54 = vmul.f32 %v2685_v21, %v5805_v31  ;;  %v2762_v58 = vmul.f32 %v2761_v46, %v5828_v20  ;;  %v2751_v57 = vmul.f32 %v2750_v17, %v5828_v20 }
 0x82e   : > { %v2805_v35 = vadd.f32 0.112945676, %v2804_v47  ;;  %v2675_v32 = vmul.f32 %v2674_v40, %v5805_v31  ;;  %v5862_v56 = vmin.f32 %v2867_v53, 16.0  ;;  %v2794_v59 = vadd.f32 0.05243302, %v2793_v52 }
 0x82f   : > { %4354 = vrcp.f32 %v5840_v60  ;;  %v2687_v50 = vadd.f32 0.4994258, %v2686_v54  ;;  %v2763_v63 = vadd.f32 0.014752088, %v2762_v58  ;;  %v2752_v5 = vadd.f32 0.0036580483, %v2751_v57 }
 0x830   : > { %v2806_v7 = vmul.f32 %v2805_v35, %v5814_v4  ;;  %v2717_v48 = vmul.f32 %v2716_v15, %v5784_v38  ;;  %v2676_v22 = vadd.f32 0.18741608, %v2675_v32  ;;  %v2869_v42 = vmul.f32 2.1237322e-06, %v5862_v56 }
 0x831   : > { %v2688_v39 = vmul.f32 %v2687_v50, %v5805_v31  ;;  %v2764_v3 = vmul.f32 %v2763_v63, %v5828_v20  ;;  %v2753_v62 = vmul.f32 %v2752_v5, %v5828_v20  ;;  %v5872_v8 = vadd.f32 %v2579_v55, %v5779_v61 }
 0x832   : > { %v2807_v11 = vadd.f32 0.4994258, %v2806_v7  ;;  %v2795_v25 = vmul.f32 %v2794_v59, %v5814_v4  ;;  %v5879_v38 = vmul.f32 0.5, %v5774_v10  ;;  %v2718_v46 = vadd.f32 1.1283791, %v2717_v48  ;;  %v2614_v48 = vpop.f32.mrf.mxu0 }
 0x833   : > { %v5857_v14 = vadd.f32 1.0, %v2688_v39  ;;  %v2765_v27 = vadd.f32 0.112945676, %v2764_v3  ;;  %v5882_v47 = vmul.f32 0.5, %v5787_v51  ;;  %v5885_v17 = vmul.f32 0.5, %v5793_v6 }
 0x834   : > { %v2808_v16 = vmul.f32 %v2807_v11, %v5814_v4  ;;  %v5892_v44 = vmul.f32 0.5, %v5810_v12  ;;  %v2880_v58 = vmul.f32 3.8918573e-05, %v5862_v56  ;;  %v2677_v10 = vmul.f32 %v2676_v22, %v5805_v31  ;;  %v4090_v12 = vld [vmem:[%s6591_s11 + $0x78] sm:$0xff] }
 0x835   : > { %v5859_v13 = vpop.eup %4354  ;;  %4356 = vrcp.f32 %v5857_v14  ;;  %v2766_v21 = vmul.f32 %v2765_v27, %v5828_v20  ;;  %v2754_v40 = vadd.f32 0.05243302, %v2753_v62  ;;  %v2870_v50 = vadd.f32 0.00028619796, %v2869_v42  ;;  %3598 = vmatpush.bf16.msrb.mxu2 %v4090_v12 }
 0x836   : > { %v2731_v9 = vmul.f32 %v5859_v13, %v5840_v60  ;;  %v5875_v33 = vadd.f32 1.0, %v2808_v16  ;;  %v5897_v51 = vmul.f32 0.70710677, %v5872_v8  ;;  %v2796_v35 = vadd.f32 0.18741608, %v2795_v25 }
 0x837   : > { %v2767_v57 = vadd.f32 0.4994258, %v2766_v21  ;;  %v5902_v53 = vmul.f32 0.5, %v5833_v1  ;;  %v2719_v39 = vmul.f32 %v2718_v46, %v5777_v45  ;;  %vm2735_vm13 = vweird.f32 %v5840_v60 }
 0x838   : > { %v2732_v37 = vsub.f32 1.0, %v2731_v9  ;;  %4358 = vrcp.f32 %v5875_v33  ;;  %v2739_v31 = vand.u32 2147483647, %v5840_v60  ;;  %v2741_v52 = vand.u32 2147483648, %v5840_v60 }
 0x839   : > { %vm2736_vm14 = vweird.f32 %v5859_v13  ;;  %v2768_v7 = vmul.f32 %v2767_v57, %v5828_v20  ;;  %v2881_v1 = vadd.f32 0.001143296, %v2880_v58  ;;  %v2678_v63 = vadd.f32 1.1283791, %v2677_v10 }
 0x83a   : > { %v2733_v34 = vmul.f32 %v5859_v13, %v2732_v37  ;;  %v2755_v32 = vmul.f32 %v2754_v40, %v5828_v20  ;;  %v2871_v11 = vmul.f32 %v2870_v50, %v5862_v56  ;;  %v2827_v45 = vmul.f32 %v5897_v51, %v5897_v51  ;;  %v4089_v37 = vld [vmem:[%s6591_s11 + $0x70] sm:$0xff]  ;;  %vm5931_vm15 = vmor %vm2735_vm13, %vm2736_vm14 }
 0x83b   : > { %v5887_v54 = vpop.eup %4356  ;;  %v2797_v9 = vmul.f32 %v2796_v35, %v5814_v4  ;;  %v5921_v59 = vadd.f32 1.0, %v2768_v7  ;;  %v2882_v55 = vmul.f32 %v2881_v1, %v5862_v56  ;;  %vm5935_vm0 = vcmp.eq.f32.partialorder %v2739_v31, 8.507059e+37  ;;  %3599 = vmatpush.bf16.msrb.mxu2 %v4089_v37 }
 0x83c   : > { %v2691_v6 = vmul.f32 %v5887_v54, %v5857_v14  ;;  %v2734_v15 = vadd.f32 %v5859_v13, %v2733_v34  ;;  %v2742_v4 = vor.u32 1.1754944e-38, %v2741_v52  ;;  %v2699_v22 = vand.u32 2147483647, %v5857_v14 }
 0x83d   : > { %v2701_v62 = vand.u32 2147483648, %v5857_v14  ;;  %4360 = vrcp.f32 %v5921_v59  ;;  %v5947_v25 = vmin.f32 %v2827_v45, 16.0  ;;  %v5950_v21 = vmul.f32 %v2678_v63, %v5796_v28 }
 0x83e   : > { %v5918_v5 = vpop.eup %4358  ;;  %v2692_v3 = vsub.f32 1.0, %v2691_v6  ;;  %v2738_v42 = vsel %vm5931_vm15, %v5859_v13, %v2734_v15  ;;  %v2756_v46 = vadd.f32 0.18741608, %v2755_v32  ;;  %v2872_v34 = vadd.f32 0.0036580483, %v2871_v11  ;;  %v2581_v32 = vpop.f32.mrf.mxu3 }
 0x83f   : > { %v2811_v60 = vmul.f32 %v5918_v5, %v5875_v33  ;;  %v5953_v58 = vadd.f32 %v2614_v48, %v5770_v2  ;;  %vm2695_vm1 = vweird.f32 %v5857_v14  ;;  %v2798_v13 = vadd.f32 1.1283791, %v2797_v9 }
 0x840   : > { %v2693_v10 = vmul.f32 %v5887_v54, %v2692_v3  ;;  %v2883_v40 = vadd.f32 0.014752088, %v2882_v55  ;;  %v2743_v50 = vsel %vm5935_vm0, %v2742_v4, %v2738_v42  ;;  %v2702_v6 = vor.u32 1.1754944e-38, %v2701_v62 }
 0x841   : > { %v2819_v35 = vand.u32 2147483647, %v5875_v33  ;;  %v2821_v28 = vand.u32 2147483648, %v5875_v33  ;;  %vm5961_vm2 = vcmp.eq.f32.partialorder %v2699_v22, 8.507059e+37  ;;  %v2812_v12 = vsub.f32 1.0, %v2811_v60 }
 0x842   : > { %v2884_v31 = vmul.f32 %v2883_v40, %v5862_v56  ;;  %v2829_v52 = vmul.f32 2.1237322e-06, %v5947_v25  ;;  %v2840_v15 = vmul.f32 3.8918573e-05, %v5947_v25  ;;  %vm2696_vm3 = vweird.f32 %v5887_v54 }
 0x843   : > { %v2757_v7 = vmul.f32 %v2756_v46, %v5828_v20  ;;  %v2873_v1 = vmul.f32 %v2872_v34, %v5862_v56  ;;  %v5972_v63 = vmul.f32 0.70710677, %v5953_v58  ;;  %v5974_v11 = vpop.eup %4360  ;;  %v2694_v45 = vadd.f32 %v5887_v54, %v2693_v10  ;;  %vm5992_vm5 = vmor %vm2695_vm1, %vm2696_vm3 }
 0x844   : > { %v2885_v3 = vadd.f32 0.112945676, %v2884_v31  ;;  %v2830_v9 = vadd.f32 0.00028619796, %v2829_v52  ;;  %v2841_v55 = vadd.f32 0.001143296, %v2840_v15  ;;  %v2744_v48 = vmul.f32 %v2743_v50, %v2719_v39 }
 0x845   : > { %v5978_v37 = vmul.f32 %v2798_v13, %v5801_v26  ;;  %vm2815_vm4 = vweird.f32 %v5875_v33  ;;  %v2771_v20 = vmul.f32 %v5974_v11, %v5921_v59  ;;  %v2813_v16 = vmul.f32 %v5918_v5, %v2812_v12 }
 0x846   : > { %v2822_v27 = vor.u32 1.1754944e-38, %v2821_v28  ;;  %v2886_v4 = vmul.f32 %v2885_v3, %v5862_v56  ;;  %v5986_v22 = vadd.f32 %v2581_v32, %v5779_v61  ;;  %v2758_v39 = vadd.f32 1.1283791, %v2757_v7 }
 0x847   : > { %v2772_v62 = vsub.f32 1.0, %v2771_v20  ;;  %v2874_v42 = vadd.f32 0.05243302, %v2873_v1  ;;  %v2842_v60 = vmul.f32 %v2841_v55, %v5947_v25  ;;  %v2698_v46 = vsel %vm5992_vm5, %v5887_v54, %v2694_v45  ;;  %v4082_v54 = vld [vmem:[%s6591_s11 + $0x38] sm:$0xff] }
 0x848   : > { %vm6000_vm6 = vcmp.eq.f32.partialorder %v2819_v35, 8.507059e+37  ;;  %v2887_v10 = vadd.f32 0.4994258, %v2886_v4  ;;  %v2831_v14 = vmul.f32 %v2830_v9, %v5947_v25  ;;  %v2947_v13 = vmul.f32 %v5972_v63, %v5972_v63  ;;  %3565 = vmatpush.bf16.msrb.mxu1 %v4082_v54 }
 0x849   : > { %v3944_v40 = vclamps-f32 %v2744_v48, 1.0  ;;  %vm2816_vm7 = vweird.f32 %v5918_v5  ;;  %v2773_v50 = vmul.f32 %v5974_v11, %v2772_v62  ;;  %v2843_v28 = vadd.f32 0.014752088, %v2842_v60  ;;  %v2617_v60 = vpop.f32.mrf.mxu0 }
 0x84a   : > { %v2814_v35 = vadd.f32 %v5918_v5, %v2813_v16  ;;  %v2888_v12 = vmul.f32 %v2887_v10, %v5862_v56  ;;  %v6014_v31 = vmin.f32 %v2947_v13, 16.0  ;;  %v6017_v52 = vmul.f32 0.70710677, %v5986_v22  ;;  %vm6032_vm9 = vmor %vm2815_vm4, %vm2816_vm7 }
 0x84b   : > { %v2703_v15 = vsel %vm5961_vm2, %v2702_v6, %v2698_v46  ;;  %v2781_v7 = vand.u32 2147483648, %v5921_v59  ;;  %v2875_v1 = vmul.f32 %v2874_v42, %v5862_v56  ;;  %v2844_v32 = vmul.f32 %v2843_v28, %v5947_v25 }
 0x84c   : > { %vm2776_vm8 = vweird.f32 %v5974_v11  ;;  %v6025_v45 = vadd.f32 1.0, %v2888_v12  ;;  %v2832_v3 = vadd.f32 0.0036580483, %v2831_v14  ;;  %v2949_v9 = vmul.f32 2.1237322e-06, %v6014_v31 }
 0x84d   : > { %v2774_v57 = vadd.f32 %v5974_v11, %v2773_v50  ;;  %v2845_v55 = vadd.f32 0.112945676, %v2844_v32  ;;  %v2960_v48 = vmul.f32 3.8918573e-05, %v6014_v31  ;;  %v2907_v20 = vmul.f32 %v6017_v52, %v6017_v52 }
 0x84e   : > { %v3388_v16 = vadd.f32 1.0, %v3944_v40  ;;  %v2818_v4 = vsel %vm6032_vm9, %v5918_v5, %v2814_v35  ;;  %v2759_v26 = vmul.f32 %v2758_v39, %v5818_v43  ;;  %4362 = vrcp.f32 %v6025_v45 }
 0x84f   : > { %v2704_v33 = vmul.f32 %v2703_v15, %v5950_v21  ;;  %vm2775_vm10 = vweird.f32 %v5921_v59  ;;  %v2779_v62 = vand.u32 2147483647, %v5921_v59  ;;  %v2876_v42 = vadd.f32 0.18741608, %v2875_v1  ;;  %v4088_v21 = vld [vmem:[%s6591_s11 + $0x68] sm:$0xff] }
 0x850   : > { %vm6050_vm11 = vmor %vm2775_vm10, %vm2776_vm8  ;;  %v2782_v10 = vor.u32 1.1754944e-38, %v2781_v7  ;;  %v2846_v5 = vmul.f32 %v2845_v55, %v5947_v25  ;;  %v2950_v43 = vadd.f32 0.00028619796, %v2949_v9  ;;  %v2961_v39 = vadd.f32 0.001143296, %v2960_v48  ;;  %3600 = vmatpush.bf16.msrb.mxu2 %v4088_v21  ;;  %v4087_v48 = vld [vmem:[%s6591_s11 + $0x60] sm:$0xff] }
 0x851   : > { %v2823_v59 = vsel %vm6000_vm6, %v2822_v27, %v2818_v4  ;;  %v2778_v14 = vsel %vm6050_vm11, %v5974_v11, %v2774_v57  ;;  %v2833_v13 = vmul.f32 %v2832_v3, %v5947_v25  ;;  %v6064_v40 = vmin.f32 %v2907_v20, 16.0  ;;  %v4081_v27 = vld [vmem:[%s6591_s11 + $0x30] sm:$0xff] }
 0x852   : > { %v2847_v50 = vadd.f32 0.4994258, %v2846_v5  ;;  %v2951_v28 = vmul.f32 %v2950_v43, %v6014_v31  ;;  %v2962_v54 = vmul.f32 %v2961_v39, %v6014_v31  ;;  %v6069_v35 = vadd.f32 %v2617_v60, %v5770_v2  ;;  %3566 = vmatpush.bf16.msrb.mxu1 %v4081_v27 }
 0x853   : > { %v3943_v34 = vclamps-f32 %v2704_v33, 1.0  ;;  %vm2780_vm12 = vcmp.eq.f32.partialorder %v2779_v62, 8.507059e+37  ;;  %v2909_v11 = vmul.f32 2.1237322e-06, %v6064_v40  ;;  %v2920_v12 = vmul.f32 3.8918573e-05, %v6064_v40 }
 0x854   : > { %v6076_v15 = vpop.eup %4362  ;;  %v2783_v7 = vsel %vm2780_vm12, %v2782_v10, %v2778_v14  ;;  %v2848_v1 = vmul.f32 %v2847_v50, %v5947_v25  ;;  %v2952_v32 = vadd.f32 0.0036580483, %v2951_v28  ;;  %v2963_v3 = vadd.f32 0.014752088, %v2962_v54  ;;  %3601 = vmatpush.bf16.msrb.mxu2 %v4087_v48 }
 0x855   : > { %v2824_v9 = vmul.f32 %v2823_v59, %v5978_v37  ;;  %v2877_v6 = vmul.f32 %v2876_v42, %v5862_v56  ;;  %v2891_v57 = vmul.f32 %v6076_v15, %v6025_v45  ;;  %v2834_v55 = vadd.f32 0.05243302, %v2833_v13 }
 0x856   : > { %v6086_v20 = vadd.f32 1.0, %v2848_v1  ;;  %v2964_v4 = vmul.f32 %v2963_v3, %v6014_v31  ;;  %v2910_v33 = vadd.f32 0.00028619796, %v2909_v11  ;;  %v6090_v62 = vmul.f32 0.70710677, %v6069_v35  ;;  %v4080_v11 = vld [vmem:[%s6591_s11 + $0x28] sm:$0xff] }
 0x857   : > { %v2784_v60 = vmul.f32 %v2783_v7, %v2759_v26  ;;  %v2892_v37 = vsub.f32 1.0, %v2891_v57  ;;  %v2953_v56 = vmul.f32 %v2952_v32, %v6014_v31  ;;  %v2921_v42 = vadd.f32 0.001143296, %v2920_v12  ;;  %3567 = vmatpush.bf16.msrb.mxu1 %v4080_v11 }
 0x858   : > { %v6094_v46 = vmul.f32 %v3388_v16, %v5879_v38  ;;  %v3387_v10 = vadd.f32 1.0, %v3943_v34  ;;  %4364 = vrcp.f32 %v6086_v20  ;;  %v6098_v5 = vmul.f32 0.5, %v5953_v58 }
 0x859   : > { %v3946_v43 = vclamps-f32 %v2824_v9, 1.0  ;;  %v2893_v39 = vmul.f32 %v6076_v15, %v2892_v37  ;;  %v2965_v21 = vadd.f32 0.112945676, %v2964_v4  ;;  %v2911_v26 = vmul.f32 %v2910_v33, %v6064_v40  ;;  %v4084_v33 = vld [vmem:[%s6591_s11 + $0x48] sm:$0xff] }
 0x85a   : > { %v2878_v59 = vadd.f32 1.1283791, %v2877_v6  ;;  %v2835_v14 = vmul.f32 %v2834_v55, %v5947_v25  ;;  %v2922_v13 = vmul.f32 %v2921_v42, %v6064_v40  ;;  %v3027_v38 = vmul.f32 %v6090_v62, %v6090_v62  ;;  %v4086_v55 = vld [vmem:[%s6591_s11 + $0x58] sm:$0xff] }
 0x85b   : > { %v3945_v16 = vclamps-f32 %v2784_v60, 1.0  ;;  %vm2896_vm13 = vweird.f32 %v6076_v15  ;;  %v2954_v50 = vadd.f32 0.05243302, %v2953_v56  ;;  %v2966_v58 = vmul.f32 %v2965_v21, %v6014_v31  ;;  %3602 = vmatpush.bf16.msrb.mxu2 %v4086_v55 }
 0x85c   : > { %v2894_v28 = vadd.f32 %v6076_v15, %v2893_v39  ;;  %v2912_v54 = vadd.f32 0.0036580483, %v2911_v26  ;;  %v2923_v27 = vadd.f32 0.014752088, %v2922_v13  ;;  %v6109_v34 = vmin.f32 %v3027_v38, 16.0  ;;  %v2584_v26 = vpop.f32.mrf.mxu3  ;;  %v4079_v38 = vld [vmem:[%s6591_s11 + $0x20] sm:$0xff] }
 0x85d   : > { %v3390_v12 = vadd.f32 1.0, %v3946_v43  ;;  %v2899_v7 = vand.u32 2147483647, %v6025_v45  ;;  %v2901_v1 = vand.u32 2147483648, %v6025_v45  ;;  %v2967_v32 = vadd.f32 0.4994258, %v2966_v58  ;;  %3568 = vmatpush.bf16.msrb.mxu1 %v4079_v38 }
 0x85e   : > { %v6116_v3 = vpop.eup %4364  ;;  %vm2895_vm14 = vweird.f32 %v6025_v45  ;;  %v2836_v9 = vadd.f32 0.18741608, %v2835_v14  ;;  %v2924_v6 = vmul.f32 %v2923_v27, %v6064_v40  ;;  %v3040_v57 = vmul.f32 3.8918573e-05, %v6109_v34 }
 0x85f   : > { %v6125_v48 = vmul.f32 %v3387_v10, %v5882_v47  ;;  %v3389_v4 = vadd.f32 1.0, %v3945_v16  ;;  %vm6129_vm15 = vmor %vm2895_vm14, %vm2896_vm13  ;;  %v2851_v45 = vmul.f32 %v6116_v3, %v6086_v20  ;;  %v2955_v60 = vmul.f32 %v2954_v50, %v6014_v31 }
 0x860   : > { %v2898_v37 = vsel %vm6129_vm15, %v6076_v15, %v2894_v28  ;;  %v2968_v56 = vmul.f32 %v2967_v32, %v6014_v31  ;;  %v2913_v47 = vmul.f32 %v2912_v54, %v6064_v40  ;;  %v2925_v42 = vadd.f32 0.112945676, %v2924_v6  ;;  %v2619_v28 = vpop.f32.mrf.mxu0 }
 0x861   : > { %v6142_v10 = vmul.f32 %v3390_v12, %v5885_v17  ;;  %v2902_v43 = vor.u32 1.1754944e-38, %v2901_v1  ;;  %v2852_v39 = vsub.f32 1.0, %v2851_v45  ;;  %v3041_v21 = vadd.f32 0.001143296, %v3040_v57  ;;  %v4085_v17 = vld [vmem:[%s6591_s11 + $0x50] sm:$0xff] }
 0x862   : > { %vm2900_vm0 = vcmp.eq.f32.partialorder %v2899_v7, 8.507059e+37  ;;  %v2837_v14 = vmul.f32 %v2836_v9, %v5947_v25  ;;  %v6145_v13 = vadd.f32 1.0, %v2968_v56  ;;  %v2926_v15 = vmul.f32 %v2925_v42, %v6064_v40  ;;  %3603 = vmatpush.bf16.msrb.mxu2 %v4085_v17 }
 0x863   : > { %v6155_v16 = vmul.f32 %v3389_v4, %v5892_v44  ;;  %v2879_v50 = vmul.f32 %v2878_v59, %v5844_v19  ;;  %v2903_v58 = vsel %vm2900_vm0, %v2902_v43, %v2898_v37  ;;  %v3042_v25 = vmul.f32 %v3041_v21, %v6109_v34  ;;  %v4078_v44 = vld [vmem:[%s6591_s11 + $0x18] sm:$0xff] }
 0x864   : > { %v2956_v54 = vadd.f32 0.18741608, %v2955_v60  ;;  %4366 = vrcp.f32 %v6145_v13  ;;  %v2914_v27 = vadd.f32 0.05243302, %v2913_v47  ;;  %v6161_v11 = vadd.f32 %v2584_v26, %v5779_v61  ;;  %3569 = vmatpush.bf16.msrb.mxu1 %v4078_v44  ;;  %v4077_v47 = vld [vmem:[%s6591_s11 + $0x10] sm:$0xff] }
 0x865   : > { %v3424_v19 = vpack.c.bf16 %v6142_v10, %v6094_v46  ;;  %v2853_v59 = vmul.f32 %v6116_v3, %v2852_v39  ;;  %v2927_v12 = vadd.f32 0.4994258, %v2926_v15  ;;  %v3029_v7 = vmul.f32 2.1237322e-06, %v6109_v34 }
 0x866   : > { %v2904_v1 = vmul.f32 %v2903_v58, %v2879_v50  ;;  %v2838_v32 = vadd.f32 1.1283791, %v2837_v14  ;;  %v3043_v9 = vadd.f32 0.014752088, %v3042_v25  ;;  %v6171_v6 = vadd.f32 %v2619_v28, %v5770_v2  ;;  %3604 = vmatpush.bf16.msrb.mxu2 %v4084_v33  ;;  %v4083_v50 = vld [vmem:[%s6591_s11 + $0x40] sm:$0xff] }
 0x867   : > { %v3423_v57 = vpack.c.bf16 %v6155_v16, %v6125_v48  ;;  %v2859_v55 = vand.u32 2147483647, %v6086_v20  ;;  %v2861_v4 = vand.u32 2147483648, %v6086_v20  ;;  %v2928_v46 = vmul.f32 %v2927_v12, %v6064_v40 }
 0x868   : > { %v2957_v45 = vmul.f32 %v2956_v54, %v6014_v31  ;;  %v2915_v60 = vmul.f32 %v2914_v27, %v6064_v40  ;;  %v3044_v37 = vmul.f32 %v3043_v9, %v6109_v34  ;;  %v6185_v56 = vmul.f32 0.70710677, %v6161_v11  ;;  %3570 = vmatpush.bf16.msrb.mxu1 %v4077_v47 }
 0x869   : > { %v2854_v42 = vadd.f32 %v6116_v3, %v2853_v59  ;;  %vm2856_vm1 = vweird.f32 %v6116_v3  ;;  %v6192_v10 = vadd.f32 1.0, %v2928_v46  ;;  %v3030_v43 = vadd.f32 0.00028619796, %v3029_v7 }
 0x86a   : > { %v4367_v31 = vpop.eup %4366  ;;  %v3948_v39 = vclamps-f32 %v2904_v1, 1.0  ;;  %v3045_v21 = vadd.f32 0.112945676, %v3044_v37  ;;  %v2987_v26 = vmul.f32 %v6185_v56, %v6185_v56  ;;  %v6197_v14 = vmul.f32 0.70710677, %v6171_v6  ;;  %3605 = vmatpush.bf16.msrb.mxu2 %v4083_v50 }
 0x86b   : > { %v2839_v15 = vmul.f32 %v2838_v32, %v5897_v51  ;;  %vm2855_vm2 = vweird.f32 %v6086_v20  ;;  %vm6201_vm3 = vcmp.eq.f32.partialorder %v2859_v55, 8.507059e+37  ;;  %v2971_v17 = vmul.f32 %v4367_v31, %v6145_v13  ;;  %v4076_v51 = vld [vmem:[%s6591_s11 + $0x8] sm:$0xff] }
 0x86c   : > { %vm6209_vm4 = vmor %vm2855_vm2, %vm2856_vm1  ;;  %v2862_v25 = vor.u32 1.1754944e-38, %v2861_v4  ;;  %v2958_v28 = vadd.f32 1.1283791, %v2957_v45  ;;  %v2916_v54 = vadd.f32 0.18741608, %v2915_v60  ;;  %4368 = vrcp.f32 %v6192_v10  ;;  %3571 = vmatpush.bf16.msrb.mxu1 %v4076_v51  ;;  %v4075_v60 = vld [vmem:[%s6591_s11] sm:$0xff] }
 0x86d   : > { %v2858_v20 = vsel %vm6209_vm4, %v6116_v3, %v2854_v42  ;;  %v2972_v27 = vsub.f32 1.0, %v2971_v17  ;;  %v3031_v44 = vmul.f32 %v3030_v43, %v6109_v34  ;;  %v3046_v59 = vmul.f32 %v3045_v21, %v6109_v34  ;;  %3606 = vmatmul.bf16.vlgmr.msrb.gmra.mxu2 %v3424_v19 }
 0x86e   : > { %v6222_v12 = vadd.f32 1.0, %v3948_v39  ;;  %v2981_v7 = vand.u32 2147483648, %v6145_v13  ;;  %v6225_v1 = vmin.f32 %v2987_v26, 16.0  ;;  %v3107_v32 = vmul.f32 %v6197_v14, %v6197_v14 }
 0x86f   : > { %v2973_v9 = vmul.f32 %v4367_v31, %v2972_v27  ;;  %vm2976_vm5 = vweird.f32 %v4367_v31  ;;  %v2979_v55 = vand.u32 2147483647, %v6145_v13  ;;  %v3047_v3 = vadd.f32 0.4994258, %v3046_v59 }
 0x870   : > { %v2863_v4 = vsel %vm6201_vm3, %v2862_v25, %v2858_v20  ;;  %v2917_v46 = vmul.f32 %v2916_v54, %v6064_v40  ;;  %v3000_v33 = vmul.f32 3.8918573e-05, %v6225_v1  ;;  %v6234_v45 = vmin.f32 %v3107_v32, 16.0  ;;  %3572 = vmatpush.bf16.msrb.mxu1 %v4075_v60  ;;  %v2586_v20 = vpop.f32.mrf.mxu3 }
 0x871   : > { %v2974_v37 = vadd.f32 %v4367_v31, %v2973_v9  ;;  %vm2975_vm6 = vweird.f32 %v6145_v13  ;;  %v3032_v47 = vadd.f32 0.0036580483, %v3031_v44  ;;  %v3048_v42 = vmul.f32 %v3047_v3, %v6109_v34 }
 0x872   : > { %v4369_v43 = vpop.eup %4368  ;;  %v2959_v39 = vmul.f32 %v2958_v28, %v5972_v63  ;;  %vm2977_vm7 = vmor %vm2975_vm6, %vm2976_vm5  ;;  %v2982_v40 = vor.u32 1.1754944e-38, %v2981_v7  ;;  %v3001_v21 = vadd.f32 0.001143296, %v3000_v33  ;;  %v3109_v26 = vmul.f32 2.1237322e-06, %v6234_v45 }
 0x873   : > { %v2864_v19 = vmul.f32 %v2863_v4, %v2839_v15  ;;  %v2978_v38 = vsel %vm2977_vm7, %v4367_v31, %v2974_v37  ;;  %vm2980_vm8 = vcmp.eq.f32.partialorder %v2979_v55, 8.507059e+37  ;;  %v2931_v17 = vmul.f32 %v4369_v43, %v6192_v10  ;;  %3573 = vmatmul.bf16.vlgmr.msrb.gmra.mxu1 %v3423_v57 }
 0x874   : > { %v2983_v50 = vsel %vm2980_vm8, %v2982_v40, %v2978_v38  ;;  %v2918_v58 = vadd.f32 1.1283791, %v2917_v46  ;;  %v6245_v13 = vadd.f32 1.0, %v3048_v42  ;;  %v3002_v25 = vmul.f32 %v3001_v21, %v6225_v1 }
 0x875   : > { %v2984_v54 = vmul.f32 %v2983_v50, %v2959_v39  ;;  %v2932_v63 = vsub.f32 1.0, %v2931_v17  ;;  %v2939_v28 = vand.u32 2147483647, %v6192_v10  ;;  %v3033_v51 = vmul.f32 %v3032_v47, %v6109_v34 }
 0x876   : > { %vm2936_vm9 = vweird.f32 %v4369_v43  ;;  %v2941_v31 = vand.u32 2147483648, %v6192_v10  ;;  %v2989_v15 = vmul.f32 2.1237322e-06, %v6225_v1  ;;  %v3110_v27 = vadd.f32 0.00028619796, %v3109_v26 }
 0x877   : > { %v3950_v44 = vclamps-f32 %v2984_v54, 1.0  ;;  %v2933_v59 = vmul.f32 %v4369_v43, %v2932_v63  ;;  %4370 = vrcp.f32 %v6245_v13  ;;  %v3003_v7 = vadd.f32 0.014752088, %v3002_v25 }
 0x878   : > { %v3947_v32 = vclamps-f32 %v2864_v19, 1.0  ;;  %v2919_v9 = vmul.f32 %v2918_v58, %v6017_v52  ;;  %v3120_v55 = vmul.f32 3.8918573e-05, %v6234_v45  ;;  %v6259_v3 = vadd.f32 %v2586_v20, %v5779_v61 }
 0x879   : > { %v3394_v4 = vadd.f32 1.0, %v3950_v44  ;;  %v2934_v46 = vadd.f32 %v4369_v43, %v2933_v59  ;;  %vm2935_vm10 = vweird.f32 %v6192_v10  ;;  %v3004_v33 = vmul.f32 %v3003_v7, %v6225_v1 }
 0x87a   : > { %vm2937_vm11 = vmor %vm2935_vm10, %vm2936_vm9  ;;  %vm2940_vm12 = vcmp.eq.f32.partialorder %v2939_v28, 8.507059e+37  ;;  %v2942_v60 = vor.u32 1.1754944e-38, %v2941_v31  ;;  %v2990_v48 = vadd.f32 0.00028619796, %v2989_v15  ;;  %v3121_v16 = vadd.f32 0.001143296, %v3120_v55 }
 0x87b   : > { %v3412_v57 = vmul.f32 %v3394_v4, %v6098_v5  ;;  %v2938_v52 = vsel %vm2937_vm11, %v4369_v43, %v2934_v46  ;;  %v3005_v37 = vadd.f32 0.112945676, %v3004_v33  ;;  %v3111_v47 = vmul.f32 %v3110_v27, %v6234_v45 }
 0x87c   : > { %v2943_v42 = vsel %vm2940_vm12, %v2942_v60, %v2938_v52  ;;  %v3122_v39 = vmul.f32 %v3121_v16, %v6234_v45  ;;  %v6268_v40 = vmul.f32 0.70710677, %v6259_v3  ;;  %v3410_v21 = vmul.f32 %v6222_v12, %v5902_v53 }
 0x87d   : > { %v6270_v10 = vpop.eup %4370  ;;  %v2944_v26 = vmul.f32 %v2943_v42, %v2919_v9  ;;  %v3034_v19 = vadd.f32 0.05243302, %v3033_v51  ;;  %v2991_v38 = vmul.f32 %v2990_v48, %v6225_v1  ;;  %v3006_v5 = vmul.f32 %v3005_v37, %v6225_v1 }
 0x87e   : > { %v3123_v43 = vadd.f32 0.014752088, %v3122_v39  ;;  %v3067_v17 = vmul.f32 %v6268_v40, %v6268_v40  ;;  %v3391_v50 = vadd.f32 1.0, %v3947_v32  ;;  %v3112_v25 = vadd.f32 0.0036580483, %v3111_v47 }
 0x87f   : > { %v3949_v58 = vclamps-f32 %v2944_v26, 1.0  ;;  %v3426_v54 = vpack.c.bf16 %v3412_v57, %v3410_v21  ;;  %v3051_v63 = vmul.f32 %v6270_v10, %v6245_v13  ;;  %v3007_v28 = vadd.f32 0.4994258, %v3006_v5 }
 0x880   : > { %v3124_v53 = vmul.f32 %v3123_v43, %v6234_v45  ;;  %v6281_v12 = vmin.f32 %v3067_v17, 16.0  ;;  %v2635_v51 = vmul.f32 0.5, %v5872_v8  ;;  %v2637_v20 = vmul.f32 0.5, %v5986_v22 }
 0x881   : > { %v3393_v31 = vadd.f32 1.0, %v3949_v58  ;;  %v3035_v15 = vmul.f32 %v3034_v19, %v6109_v34  ;;  %3611 = vmatmul.bf16.gmra.mxu2 %v3426_v54  ;;  %v2992_v27 = vadd.f32 0.0036580483, %v2991_v38  ;;  %v3008_v44 = vmul.f32 %v3007_v28, %v6225_v1 }
 0x882   : > { %v3125_v59 = vadd.f32 0.112945676, %v3124_v53  ;;  %v3069_v7 = vmul.f32 2.1237322e-06, %v6281_v12  ;;  %v3409_v32 = vmul.f32 %v3391_v50, %v2635_v51  ;;  %v3113_v55 = vmul.f32 %v3112_v25, %v6234_v45 }
 0x883   : > { %v3411_v9 = vmul.f32 %v3393_v31, %v2637_v20  ;;  %v3080_v4 = vmul.f32 3.8918573e-05, %v6281_v12  ;;  %v3052_v46 = vsub.f32 1.0, %v3051_v63  ;;  %v6290_v8 = vadd.f32 1.0, %v3008_v44 }
 0x884   : > { %v3126_v22 = vmul.f32 %v3125_v59, %v6234_v45  ;;  %v3070_v33 = vadd.f32 0.00028619796, %v3069_v7  ;;  %v2993_v16 = vmul.f32 %v2992_v27, %v6225_v1  ;;  %v3036_v57 = vadd.f32 0.18741608, %v3035_v15 }
 0x885   : > { %v3081_v60 = vadd.f32 0.001143296, %v3080_v4  ;;  %v3425_v48 = vpack.c.bf16 %v3411_v9, %v3409_v32  ;;  %4372 = vrcp.f32 %v6290_v8  ;;  %v3053_v37 = vmul.f32 %v6270_v10, %v3052_v46 }
 0x886   : > { %v3127_v52 = vadd.f32 0.4994258, %v3126_v22  ;;  %v3114_v47 = vadd.f32 0.05243302, %v3113_v55  ;;  %v3071_v42 = vmul.f32 %v3070_v33, %v6281_v12  ;;  %v2994_v26 = vadd.f32 0.05243302, %v2993_v16 }
 0x887   : > { %3578 = vmatmul.bf16.gmra.mxu1 %v3425_v48  ;;  %v3082_v39 = vmul.f32 %v3081_v60, %v6281_v12  ;;  %v3037_v38 = vmul.f32 %v3036_v57, %v6109_v34  ;;  %v3054_v50 = vadd.f32 %v6270_v10, %v3053_v37  ;;  %vm3056_vm13 = vweird.f32 %v6270_v10 }
 0x888   : > { %v3128_v21 = vmul.f32 %v3127_v52, %v6234_v45  ;;  %v3072_v43 = vadd.f32 0.0036580483, %v3071_v42  ;;  %v3115_v58 = vmul.f32 %v3114_v47, %v6234_v45  ;;  %v3061_v54 = vand.u32 2147483648, %v6245_v13 }
 0x889   : > { %v3083_v19 = vadd.f32 0.014752088, %v3082_v39  ;;  %vm3055_vm14 = vweird.f32 %v6245_v13  ;;  %v3059_v34 = vand.u32 2147483647, %v6245_v13  ;;  %v2995_v28 = vmul.f32 %v2994_v26, %v6225_v1 }
 0x88a   : > { %v6300_v5 = vadd.f32 1.0, %v3128_v21  ;;  %vm3057_vm15 = vmor %vm3055_vm14, %vm3056_vm13  ;;  %v3073_v53 = vmul.f32 %v3072_v43, %v6281_v12  ;;  %v3038_v20 = vadd.f32 1.1283791, %v3037_v38  ;;  %v3116_v15 = vadd.f32 0.18741608, %v3115_v58 }
 0x88b   : > { %v6302_v17 = vpop.eup %4372  ;;  %v3084_v25 = vmul.f32 %v3083_v19, %v6281_v12  ;;  %v3058_v31 = vsel %vm3057_vm15, %v6270_v10, %v3054_v50  ;;  %v3062_v27 = vor.u32 1.1754944e-38, %v3061_v54  ;;  %vm3060_vm0 = vcmp.eq.f32.partialorder %v3059_v34, 8.507059e+37 }
 0x88c   : > { %v3011_v63 = vmul.f32 %v6302_v17, %v6290_v8  ;;  %4374 = vrcp.f32 %v6300_v5  ;;  %v2996_v7 = vadd.f32 0.18741608, %v2995_v28  ;;  %v3074_v55 = vadd.f32 0.05243302, %v3073_v53  ;;  %v2622_v33 = vpop.f32.mrf.mxu0 }
 0x88d   : > { %v3085_v51 = vadd.f32 0.112945676, %v3084_v25  ;;  %v3063_v9 = vsel %vm3060_vm0, %v3062_v27, %v3058_v31  ;;  %v3039_v4 = vmul.f32 %v3038_v20, %v6090_v62  ;;  %v3117_v46 = vmul.f32 %v3116_v15, %v6234_v45 }
 0x88e   : > { %v3012_v44 = vsub.f32 1.0, %v3011_v63  ;;  %v6324_v48 = vadd.f32 %v2622_v33, %v5770_v2  ;;  %v2997_v57 = vmul.f32 %v2996_v7, %v6225_v1  ;;  %v3141_v37 = vand.u32 2147483648, %v6300_v5 }
 0x88f   : > { %v3086_v59 = vmul.f32 %v3085_v51, %v6281_v12  ;;  %v3064_v16 = vmul.f32 %v3063_v9, %v3039_v4  ;;  %v3075_v62 = vmul.f32 %v3074_v55, %v6281_v12  ;;  %v3118_v42 = vadd.f32 1.1283791, %v3117_v46 }
 0x890   : > { %v3013_v10 = vmul.f32 %v6302_v17, %v3012_v44  ;;  %v6332_v45 = vmul.f32 0.70710677, %v6324_v48  ;;  %v3139_v21 = vand.u32 2147483647, %v6300_v5  ;;  %vm3016_vm2 = vweird.f32 %v6302_v17 }
 0x891   : > { %v3087_v13 = vadd.f32 0.4994258, %v3086_v59  ;;  %v3021_v1 = vand.u32 2147483648, %v6290_v8  ;;  %v3952_v19 = vclamps-f32 %v3064_v16, 1.0  ;;  %vm3135_vm3 = vweird.f32 %v6300_v5 }
 0x892   : > { %v4375_v32 = vpop.eup %4374  ;;  %v3014_v26 = vadd.f32 %v6302_v17, %v3013_v10  ;;  %v3187_v43 = vmul.f32 %v6332_v45, %v6332_v45  ;;  %vm3015_vm4 = vweird.f32 %v6290_v8  ;;  %v3019_v50 = vand.u32 2147483647, %v6290_v8 }
 0x893   : > { %v3131_v22 = vmul.f32 %v4375_v32, %v6300_v5  ;;  %v3088_v60 = vmul.f32 %v3087_v13, %v6281_v12  ;;  %vm3136_vm1 = vweird.f32 %v4375_v32  ;;  %v3142_v58 = vor.u32 1.1754944e-38, %v3141_v37  ;;  %vm6344_vm6 = vmor %vm3015_vm4, %vm3016_vm2 }
 0x894   : > { %vm3137_vm5 = vmor %vm3135_vm3, %vm3136_vm1  ;;  %v3076_v25 = vadd.f32 0.18741608, %v3075_v62  ;;  %v3119_v63 = vmul.f32 %v3118_v42, %v6197_v14  ;;  %vm3140_vm7 = vcmp.eq.f32.partialorder %v3139_v21, 8.507059e+37  ;;  %v6349_v28 = vmin.f32 %v3187_v43, 16.0  ;;  %v2589_v43 = vpop.f32.mrf.mxu3 }
 0x895   : > { %v3132_v52 = vsub.f32 1.0, %v3131_v22  ;;  %v6329_v47 = vadd.f32 1.0, %v3088_v60  ;;  %v2998_v5 = vadd.f32 1.1283791, %v2997_v57  ;;  %v3018_v53 = vsel %vm6344_vm6, %v6302_v17, %v3014_v26 }
 0x896   : > { %v3396_v8 = vadd.f32 1.0, %v3952_v19  ;;  %v3022_v20 = vor.u32 1.1754944e-38, %v3021_v1  ;;  %v3200_v15 = vmul.f32 3.8918573e-05, %v6349_v28  ;;  %vm3020_vm8 = vcmp.eq.f32.partialorder %v3019_v50, 8.507059e+37 }
 0x897   : > { %v3133_v39 = vmul.f32 %v4375_v32, %v3132_v52  ;;  %4376 = vrcp.f32 %v6329_v47  ;;  %v3077_v44 = vmul.f32 %v3076_v25, %v6281_v12  ;;  %v2640_v14 = vmul.f32 0.5, %v6069_v35 }
 0x898   : > { %v3023_v59 = vsel %vm3020_vm8, %v3022_v20, %v3018_v53  ;;  %v2999_v9 = vmul.f32 %v2998_v5, %v6185_v56  ;;  %v3201_v55 = vadd.f32 0.001143296, %v3200_v15  ;;  %v2642_v13 = vmul.f32 0.5, %v6171_v6 }
 0x899   : > { %v3134_v38 = vadd.f32 %v4375_v32, %v3133_v39  ;;  %v3414_v17 = vmul.f32 %v3396_v8, %v2640_v14  ;;  %v3078_v33 = vadd.f32 1.1283791, %v3077_v44  ;;  %v3101_v10 = vand.u32 2147483648, %v6329_v47  ;;  %v2624_v14 = vpop.f32.mrf.mxu0 }
 0x89a   : > { %v3024_v22 = vmul.f32 %v3023_v59, %v2999_v9  ;;  %v3202_v12 = vmul.f32 %v3201_v55, %v6349_v28  ;;  %v3099_v16 = vand.u32 2147483647, %v6329_v47  ;;  %v3189_v57 = vmul.f32 2.1237322e-06, %v6349_v28 }
 0x89b   : > { %v3138_v34 = vsel %vm3137_vm5, %v4375_v32, %v3134_v38  ;;  %vm3095_vm10 = vweird.f32 %v6329_v47  ;;  %v3102_v37 = vor.u32 1.1754944e-38, %v3101_v10  ;;  %v3079_v39 = vmul.f32 %v3078_v33, %v6268_v40 }
 0x89c   : > { %v3143_v51 = vsel %vm3140_vm7, %v3142_v58, %v3138_v34  ;;  %v3203_v56 = vadd.f32 0.014752088, %v3202_v12  ;;  %v3951_v42 = vclamps-f32 %v3024_v22, 1.0  ;;  %vm3100_vm12 = vcmp.eq.f32.partialorder %v3099_v16, 8.507059e+37 }
 0x89d   : > { %v3144_v31 = vmul.f32 %v3143_v51, %v3119_v63  ;;  %v4377_v27 = vpop.eup %4376  ;;  %v3190_v1 = vadd.f32 0.00028619796, %v3189_v57  ;;  %v2639_v34 = vmul.f32 0.5, %v6161_v11  ;;  %v2641_v5 = vmul.f32 0.5, %v6259_v3 }
 0x89e   : > { %v3091_v32 = vmul.f32 %v4377_v27, %v6329_v47  ;;  %vm3096_vm9 = vweird.f32 %v4377_v27  ;;  %v3204_v62 = vmul.f32 %v3203_v56, %v6349_v28  ;;  %v6369_v47 = vadd.f32 %v2589_v43, %v5779_v61 }
 0x89f   : > { %v3954_v7 = vclamps-f32 %v3144_v31, 1.0  ;;  %vm3097_vm11 = vmor %vm3095_vm10, %vm3096_vm9  ;;  %v3395_v58 = vadd.f32 1.0, %v3951_v42  ;;  %v3191_v54 = vmul.f32 %v3190_v1, %v6349_v28 }
 0x8a0   : > { %v3092_v46 = vsub.f32 1.0, %v3091_v32  ;;  %v3205_v19 = vadd.f32 0.112945676, %v3204_v62  ;;  %v6373_v40 = vmul.f32 0.70710677, %v6369_v47 }
 0x8a1   : > { %v3398_v4 = vadd.f32 1.0, %v3954_v7  ;;  %v3413_v20 = vmul.f32 %v3395_v58, %v2639_v34  ;;  %v3192_v15 = vadd.f32 0.0036580483, %v3191_v54  ;;  %v6385_v7 = vadd.f32 %v2624_v14, %v5770_v2 }
 0x8a2   : > { %v3093_v35 = vmul.f32 %v4377_v27, %v3092_v46  ;;  %v3206_v50 = vmul.f32 %v3205_v19, %v6349_v28  ;;  %v3147_v8 = vmul.f32 %v6373_v40, %v6373_v40 }
 0x8a3   : > { %v3416_v60 = vmul.f32 %v3398_v4, %v2642_v13  ;;  %v3193_v32 = vmul.f32 %v3192_v15, %v6349_v28  ;;  %v6392_v9 = vmul.f32 0.70710677, %v6385_v7  ;;  %v2591_v4 = vpop.f32.mrf.mxu3 }
 0x8a4   : > { %v3094_v52 = vadd.f32 %v4377_v27, %v3093_v35  ;;  %v3207_v63 = vadd.f32 0.4994258, %v3206_v50  ;;  %v6382_v44 = vmin.f32 %v3147_v8, 16.0  ;;  %v6398_v22 = vadd.f32 %v2591_v4, %v5779_v61  ;;  %v2627_v35 = vpop.f32.mrf.mxu0 }
 0x8a5   : > { %v3428_v6 = vpack.c.bf16 %v3416_v60, %v3414_v17  ;;  %v3267_v13 = vmul.f32 %v6392_v9, %v6392_v9  ;;  %v3194_v10 = vadd.f32 0.05243302, %v3193_v32 }
 0x8a6   : > { %v3098_v21 = vsel %vm3097_vm11, %v4377_v27, %v3094_v52  ;;  %v3208_v51 = vmul.f32 %v3207_v63, %v6349_v28  ;;  %v3149_v11 = vmul.f32 2.1237322e-06, %v6382_v44  ;;  %v3160_v3 = vmul.f32 3.8918573e-05, %v6382_v44 }
 0x8a7   : > { %3616 = vmatmul.bf16.gmra.mxu2 %v3428_v6  ;;  %v3103_v26 = vsel %vm3100_vm12, %v3102_v37, %v3098_v21  ;;  %v6403_v60 = vmin.f32 %v3267_v13, 16.0  ;;  %v6410_v6 = vadd.f32 %v2627_v35, %v5770_v2  ;;  %v6414_v62 = vmul.f32 0.70710677, %v6398_v22 }
 0x8a8   : > { %v3104_v38 = vmul.f32 %v3103_v26, %v3079_v39  ;;  %v6380_v27 = vadd.f32 1.0, %v3208_v51  ;;  %v3150_v55 = vadd.f32 0.00028619796, %v3149_v11  ;;  %v3161_v17 = vadd.f32 0.001143296, %v3160_v3 }
 0x8a9   : > { %v3269_v56 = vmul.f32 2.1237322e-06, %v6403_v60  ;;  %v3280_v52 = vmul.f32 3.8918573e-05, %v6403_v60  ;;  %v3195_v42 = vmul.f32 %v3194_v10, %v6349_v28  ;;  %v6422_v50 = vmul.f32 0.70710677, %v6410_v6 }
 0x8aa   : > { %v3953_v25 = vclamps-f32 %v3104_v38, 1.0  ;;  %4378 = vrcp.f32 %v6380_v27  ;;  %v3162_v46 = vmul.f32 %v3161_v17, %v6382_v44  ;;  %v3151_v12 = vmul.f32 %v3150_v55, %v6382_v44 }
 0x8ab   : > { %v3270_v21 = vadd.f32 0.00028619796, %v3269_v56  ;;  %v3281_v26 = vadd.f32 0.001143296, %v3280_v52  ;;  %v3227_v38 = vmul.f32 %v6414_v62, %v6414_v62  ;;  %v2594_v58 = vpop.f32.mrf.mxu3  ;;  %v3196_v63 = vadd.f32 0.18741608, %v3195_v42 }
 0x8ac   : > { %v3397_v53 = vadd.f32 1.0, %v3953_v25  ;;  %v3163_v57 = vadd.f32 0.014752088, %v3162_v46  ;;  %v3152_v39 = vadd.f32 0.0036580483, %v3151_v12  ;;  %v2629_v51 = vpop.f32.mrf.mxu0  ;;  %v3221_v35 = vand.u32 2147483648, %v6380_v27 }
 0x8ad   : > { %v3271_v43 = vmul.f32 %v3270_v21, %v6403_v60  ;;  %v3282_v2 = vmul.f32 %v3281_v26, %v6403_v60  ;;  %v6425_v54 = vmin.f32 %v3227_v38, 16.0  ;;  %v3197_v55 = vmul.f32 %v3196_v63, %v6349_v28 }
 0x8ae   : > { %v3415_v31 = vmul.f32 %v3397_v53, %v2641_v5  ;;  %v3164_v37 = vmul.f32 %v3163_v57, %v6382_v44  ;;  %v3153_v34 = vmul.f32 %v3152_v39, %v6382_v44  ;;  %vm3215_vm14 = vweird.f32 %v6380_v27 }
 0x8af   : > { %v3272_v5 = vadd.f32 0.0036580483, %v3271_v43  ;;  %v3283_v53 = vadd.f32 0.014752088, %v3282_v2  ;;  %v3240_v14 = vmul.f32 3.8918573e-05, %v6425_v54  ;;  %v6452_v39 = vadd.f32 %v2594_v58, %v5779_v61 }
 0x8b0   : > { %v3427_v59 = vpack.c.bf16 %v3415_v31, %v3413_v20  ;;  %v6400_v33 = vpop.eup %4378  ;;  %v3165_v19 = vadd.f32 0.112945676, %v3164_v37  ;;  %v3229_v31 = vmul.f32 2.1237322e-06, %v6425_v54  ;;  %v3154_v17 = vadd.f32 0.05243302, %v3153_v34 }
 0x8b1   : > { %v3211_v16 = vmul.f32 %v6400_v33, %v6380_v27  ;;  %v3284_v15 = vmul.f32 %v3283_v53, %v6403_v60  ;;  %v3273_v3 = vmul.f32 %v3272_v5, %v6403_v60  ;;  %v3241_v4 = vadd.f32 0.001143296, %v3240_v14 }
 0x8b2   : > { %3583 = vmatmul.bf16.gmra.mxu1 %v3427_v59  ;;  %v3166_v25 = vmul.f32 %v3165_v19, %v6382_v44  ;;  %v3347_v59 = vmul.f32 %v6422_v50, %v6422_v50  ;;  %v3230_v32 = vadd.f32 0.00028619796, %v3229_v31  ;;  %vm3216_vm13 = vweird.f32 %v6400_v33 }
 0x8b3   : > { %v3212_v1 = vsub.f32 1.0, %v3211_v16  ;;  %v3285_v13 = vadd.f32 0.112945676, %v3284_v15  ;;  %v3242_v57 = vmul.f32 %v3241_v4, %v6425_v54  ;;  %v2596_v28 = vpop.f32.mrf.mxu3  ;;  %v3219_v52 = vand.u32 2147483647, %v6380_v27  ;;  %vm3217_vm15 = vmor %vm3215_vm14, %vm3216_vm13 }
 0x8b4   : > { %v3167_v20 = vadd.f32 0.4994258, %v3166_v25  ;;  %v3231_v12 = vmul.f32 %v3230_v32, %v6425_v54  ;;  %v6445_v56 = vmin.f32 %v3347_v59, 16.0  ;;  %v3274_v37 = vadd.f32 0.05243302, %v3273_v3 }
 0x8b5   : > { %v3213_v8 = vmul.f32 %v6400_v33, %v3212_v1  ;;  %v3286_v16 = vmul.f32 %v3285_v13, %v6403_v60  ;;  %v3155_v42 = vmul.f32 %v3154_v17, %v6382_v44  ;;  %v3243_v19 = vadd.f32 0.014752088, %v3242_v57 }
 0x8b6   : > { %v3168_v11 = vmul.f32 %v3167_v20, %v6382_v44  ;;  %v3232_v1 = vadd.f32 0.0036580483, %v3231_v12  ;;  %v3198_v38 = vadd.f32 1.1283791, %v3197_v55  ;;  %v3222_v43 = vor.u32 1.1754944e-38, %v3221_v35 }
 0x8b7   : > { %v3214_v46 = vadd.f32 %v6400_v33, %v3213_v8  ;;  %v3287_v26 = vadd.f32 0.4994258, %v3286_v16  ;;  %v3349_v2 = vmul.f32 2.1237322e-06, %v6445_v56  ;;  %vm3220_vm0 = vcmp.eq.f32.partialorder %v3219_v52, 8.507059e+37 }
 0x8b8   : > { %v6439_v10 = vadd.f32 1.0, %v3168_v11  ;;  %v3275_v27 = vmul.f32 %v3274_v37, %v6403_v60  ;;  %v3244_v63 = vmul.f32 %v3243_v19, %v6425_v54  ;;  %v3156_v5 = vadd.f32 0.18741608, %v3155_v42 }
 0x8b9   : > { %v3218_v21 = vsel %vm3217_vm15, %v6400_v33, %v3214_v46  ;;  %v3288_v25 = vmul.f32 %v3287_v26, %v6403_v60  ;;  %v3360_v61 = vmul.f32 3.8918573e-05, %v6445_v56  ;;  %v3233_v53 = vmul.f32 %v3232_v1, %v6425_v54 }
 0x8ba   : > { %4380 = vrcp.f32 %v6439_v10  ;;  %v3223_v34 = vsel %vm3220_vm0, %v3222_v43, %v3218_v21  ;;  %v3245_v51 = vadd.f32 0.112945676, %v3244_v63  ;;  %v6464_v8 = vmul.f32 0.70710677, %v6452_v39 }
 0x8bb   : > { %v3289_v33 = vadd.f32 1.0, %v3288_v25  ;;  %v3199_v20 = vmul.f32 %v3198_v38, %v6332_v45  ;;  %v3350_v15 = vadd.f32 0.00028619796, %v3349_v2  ;;  %v3276_v14 = vadd.f32 0.18741608, %v3275_v27 }
 0x8bc   : > { %v3157_v11 = vmul.f32 %v3156_v5, %v6382_v44  ;;  %v3246_v3 = vmul.f32 %v3245_v51, %v6425_v54  ;;  %v3234_v55 = vadd.f32 0.05243302, %v3233_v53  ;;  %v3361_v17 = vadd.f32 0.001143296, %v3360_v61 }
 0x8bd   : > { %4382 = vrcp.f32 %v3289_v33  ;;  %v6469_v59 = vmul.f32 %v3223_v34, %v3199_v20  ;;  %v3307_v13 = vmul.f32 %v6464_v8, %v6464_v8  ;;  %v3351_v45 = vmul.f32 %v3350_v15, %v6445_v56 }
 0x8be   : > { %v3247_v4 = vadd.f32 0.4994258, %v3246_v3  ;;  %v3277_v46 = vmul.f32 %v3276_v14, %v6403_v60  ;;  %v3362_v12 = vmul.f32 %v3361_v17, %v6445_v56  ;;  %v6481_v16 = vmul.f32 0.5, %v6324_v48 }
 0x8bf   : > { %v6478_v35 = vmin.f32 %v3307_v13, 16.0  ;;  %v3956_v44 = vclamps-f32 %v6469_v59, 1.0  ;;  %v3158_v57 = vadd.f32 1.1283791, %v3157_v11  ;;  %v3235_v42 = vmul.f32 %v3234_v55, %v6425_v54 }
 0x8c0   : > { %v6460_v58 = vpop.eup %4380  ;;  %v3248_v28 = vmul.f32 %v3247_v4, %v6425_v54  ;;  %v3363_v21 = vadd.f32 0.014752088, %v3362_v12  ;;  %vm3175_vm1 = vweird.f32 %v6439_v10  ;;  %v3181_v26 = vand.u32 2147483648, %v6439_v10 }
 0x8c1   : > { %v3171_v31 = vmul.f32 %v6460_v58, %v6439_v10  ;;  %v3309_v60 = vmul.f32 2.1237322e-06, %v6478_v35  ;;  %v3352_v48 = vadd.f32 0.0036580483, %v3351_v45  ;;  %v3278_v19 = vadd.f32 1.1283791, %v3277_v46 }
 0x8c2   : > { %v6490_v38 = vadd.f32 1.0, %v3248_v28  ;;  %v3364_v43 = vmul.f32 %v3363_v21, %v6445_v56  ;;  %v3320_v2 = vmul.f32 3.8918573e-05, %v6478_v35  ;;  %vm3176_vm2 = vweird.f32 %v6460_v58 }
 0x8c3   : > { %v3172_v32 = vsub.f32 1.0, %v3171_v31  ;;  %v4383_v52 = vpop.eup %4382  ;;  %v3299_v25 = vand.u32 2147483647, %v3289_v33  ;;  %v3301_v63 = vand.u32 2147483648, %v3289_v33  ;;  %v3236_v5 = vadd.f32 0.18741608, %v3235_v42  ;;  %vm6504_vm4 = vmor %vm3175_vm1, %vm3176_vm2 }
 0x8c4   : > { %v3291_v1 = vmul.f32 %v4383_v52, %v3289_v33  ;;  %4384 = vrcp.f32 %v6490_v38  ;;  %v3310_v61 = vadd.f32 0.00028619796, %v3309_v60  ;;  %vm3296_vm3 = vweird.f32 %v4383_v52 }
 0x8c5   : > { %v3173_v37 = vmul.f32 %v6460_v58, %v3172_v32  ;;  %v3353_v51 = vmul.f32 %v3352_v48, %v6445_v56  ;;  %v3365_v20 = vadd.f32 0.112945676, %v3364_v43  ;;  %v3179_v31 = vand.u32 2147483647, %v6439_v10 }
 0x8c6   : > { %v3292_v27 = vsub.f32 1.0, %v3291_v1  ;;  %v3182_v15 = vor.u32 1.1754944e-38, %v3181_v26  ;;  %v3279_v14 = vmul.f32 %v3278_v19, %v6392_v9  ;;  %v3321_v59 = vadd.f32 0.001143296, %v3320_v2 }
 0x8c7   : > { %v3174_v34 = vadd.f32 %v6460_v58, %v3173_v37  ;;  %vm3295_vm5 = vweird.f32 %v3289_v33  ;;  %vm3300_vm6 = vcmp.eq.f32.partialorder %v3299_v25, 8.507059e+37  ;;  %v3366_v32 = vmul.f32 %v3365_v20, %v6445_v56 }
 0x8c8   : > { %v3293_v53 = vmul.f32 %v4383_v52, %v3292_v27  ;;  %vm3297_vm7 = vmor %vm3295_vm5, %vm3296_vm3  ;;  %v3302_v9 = vor.u32 1.1754944e-38, %v3301_v63  ;;  %v3311_v17 = vmul.f32 %v3310_v61, %v6478_v35  ;;  %v3322_v13 = vmul.f32 %v3321_v59, %v6478_v35 }
 0x8c9   : > { %v3178_v55 = vsel %vm6504_vm4, %v6460_v58, %v3174_v34  ;;  %v3237_v4 = vmul.f32 %v3236_v5, %v6425_v54  ;;  %v3354_v45 = vadd.f32 0.05243302, %v3353_v51  ;;  %v3367_v46 = vadd.f32 0.4994258, %v3366_v32 }
 0x8ca   : > { %v3294_v3 = vadd.f32 %v4383_v52, %v3293_v53  ;;  %v4385_v12 = vpop.eup %4384  ;;  %vm3180_vm8 = vcmp.eq.f32.partialorder %v3179_v31, 8.507059e+37  ;;  %v2646_v33 = vmul.f32 0.5, %v6385_v7  ;;  %v3323_v37 = vadd.f32 0.014752088, %v3322_v13 }
 0x8cb   : > { %v3400_v42 = vadd.f32 1.0, %v3956_v44  ;;  %v3183_v21 = vsel %vm3180_vm8, %v3182_v15, %v3178_v55  ;;  %v3251_v60 = vmul.f32 %v4385_v12, %v6490_v38  ;;  %v3159_v26 = vmul.f32 %v3158_v57, %v6373_v40 }
 0x8cc   : > { %v3298_v10 = vsel %vm3297_vm7, %v4383_v52, %v3294_v3  ;;  %v3368_v1 = vmul.f32 %v3367_v46, %v6445_v56  ;;  %v3312_v52 = vadd.f32 0.0036580483, %v3311_v17  ;;  %v3324_v54 = vmul.f32 %v3323_v37, %v6478_v35 }
 0x8cd   : > { %v3303_v28 = vsel %vm3300_vm6, %v3302_v9, %v3298_v10  ;;  %v3238_v19 = vadd.f32 1.1283791, %v3237_v4  ;;  %v3252_v43 = vsub.f32 1.0, %v3251_v60  ;;  %v3355_v2 = vmul.f32 %v3354_v45, %v6445_v56 }
 0x8ce   : > { %v3304_v58 = vmul.f32 %v3303_v28, %v3279_v14  ;;  %v3184_v7 = vmul.f32 %v3183_v21, %v3159_v26  ;;  %v3261_v27 = vand.u32 2147483648, %v6490_v38  ;;  %v3369_v44 = vadd.f32 1.0, %v3368_v1 }
 0x8cf   : > { %v3325_v25 = vadd.f32 0.112945676, %v3324_v54  ;;  %v3253_v34 = vmul.f32 %v4385_v12, %v3252_v43  ;;  %vm3256_vm9 = vweird.f32 %v4385_v12  ;;  %v3259_v40 = vand.u32 2147483647, %v6490_v38 }
 0x8d0   : > { %v3958_v48 = vclamps-f32 %v3304_v58, 1.0  ;;  %v3418_v57 = vmul.f32 %v3400_v42, %v6481_v16  ;;  %4386 = vrcp.f32 %v3369_v44  ;;  %v3313_v5 = vmul.f32 %v3312_v52, %v6478_v35 }
 0x8d1   : > { %v3254_v53 = vadd.f32 %v4385_v12, %v3253_v34  ;;  %vm3255_vm10 = vweird.f32 %v6490_v38  ;;  %v3326_v51 = vmul.f32 %v3325_v25, %v6478_v35  ;;  %v3955_v20 = vclamps-f32 %v3184_v7, 1.0 }
 0x8d2   : > { %v3402_v63 = vadd.f32 1.0, %v3958_v48  ;;  %v3239_v31 = vmul.f32 %v3238_v19, %v6414_v62  ;;  %vm3257_vm11 = vmor %vm3255_vm10, %vm3256_vm9  ;;  %v3262_v15 = vor.u32 1.1754944e-38, %v3261_v27  ;;  %v3356_v14 = vadd.f32 0.18741608, %v3355_v2 }
 0x8d3   : > { %v3258_v59 = vsel %vm3257_vm11, %v4385_v12, %v3254_v53  ;;  %vm3260_vm12 = vcmp.eq.f32.partialorder %v3259_v40, 8.507059e+37  ;;  %v3327_v11 = vadd.f32 0.4994258, %v3326_v51  ;;  %v3314_v32 = vadd.f32 0.05243302, %v3313_v5 }
 0x8d4   : > { %v3420_v61 = vmul.f32 %v3402_v63, %v2646_v33  ;;  %v3263_v16 = vsel %vm3260_vm12, %v3262_v15, %v3258_v59  ;;  %v3399_v38 = vadd.f32 1.0, %v3955_v20  ;;  %v3357_v13 = vmul.f32 %v3356_v14, %v6445_v56  ;;  %v6536_v56 = vld [vmem:[%s6592_s12] ss:$0 sm:$0xff] }
 0x8d5   : > { %v3264_v55 = vmul.f32 %v3263_v16, %v3239_v31  ;;  %v3328_v9 = vmul.f32 %v3327_v11, %v6478_v35  ;;  %v2643_v62 = vmul.f32 0.5, %v6369_v47  ;;  %v3315_v45 = vmul.f32 %v3314_v32, %v6478_v35 }
 0x8d6   : > { %v3430_v3 = vpack.c.bf16 %v3420_v61, %v3418_v57  ;;  %v4387_v17 = vpop.eup %4386  ;;  %v2645_v12 = vmul.f32 0.5, %v6398_v22  ;;  %v3358_v42 = vadd.f32 1.1283791, %v3357_v13  ;;  %v3381_v21 = vand.u32 2147483648, %v3369_v44 }
 0x8d7   : > { %v3957_v10 = vclamps-f32 %v3264_v55, 1.0  ;;  %v3371_v4 = vmul.f32 %v4387_v17, %v3369_v44  ;;  %v3329_v46 = vadd.f32 1.0, %v3328_v9  ;;  %v3417_v37 = vmul.f32 %v3399_v38, %v2643_v62 }
 0x8d8   : > { %3621 = vmatmul.bf16.gmra.mxu2 %v3430_v3  ;;  %vm3376_vm13 = vweird.f32 %v4387_v17  ;;  %v3379_v26 = vand.u32 2147483647, %v3369_v44  ;;  %v3316_v47 = vadd.f32 0.18741608, %v3315_v45  ;;  %vm3375_vm14 = vweird.f32 %v3369_v44 }
 0x8d9   : > { %v3401_v33 = vadd.f32 1.0, %v3957_v10  ;;  %v3372_v28 = vsub.f32 1.0, %v3371_v4  ;;  %4388 = vrcp.f32 %v3329_v46  ;;  %vm3377_vm15 = vmor %vm3375_vm14, %vm3376_vm13  ;;  %v3382_v54 = vor.u32 1.1754944e-38, %v3381_v21 }
 0x8da   : > { %v3359_v19 = vmul.f32 %v3358_v42, %v6422_v50  ;;  %vm3380_vm0 = vcmp.eq.f32.partialorder %v3379_v26, 8.507059e+37  ;;  %v3317_v25 = vmul.f32 %v3316_v47, %v6478_v35  ;;  %v2648_v5 = vmul.f32 0.5, %v6410_v6 }
 0x8db   : > { %v3419_v58 = vmul.f32 %v3401_v33, %v2645_v12  ;;  %v3373_v60 = vmul.f32 %v4387_v17, %v3372_v28  ;;  %v3341_v53 = vand.u32 2147483648, %v3329_v46  ;;  %v3339_v35 = vand.u32 2147483647, %v3329_v46 }
 0x8dc   : > { %v3318_v61 = vadd.f32 1.1283791, %v3317_v25  ;;  %vm3335_vm2 = vweird.f32 %v3329_v46  ;;  %v2647_v4 = vmul.f32 0.5, %v6452_v39 }
 0x8dd   : > { %v3374_v1 = vadd.f32 %v4387_v17, %v3373_v60  ;;  %v3429_v52 = vpack.c.bf16 %v3419_v58, %v3417_v37  ;;  %v3342_v3 = vor.u32 1.1754944e-38, %v3341_v53  ;;  %vm3340_vm4 = vcmp.eq.f32.partialorder %v3339_v35, 8.507059e+37 }
 0x8df   : > { %v3378_v43 = vsel %vm3377_vm15, %v4387_v17, %v3374_v1  ;;  %3588 = vmatmul.bf16.gmra.mxu1 %v3429_v52  ;;  %v4389_v7 = vpop.eup %4388 }
 0x8e0   : > { %v3383_v27 = vsel %vm3380_vm0, %v3382_v54, %v3378_v43  ;;  %v3331_v34 = vmul.f32 %v4389_v7, %v3329_v46  ;;  %vm3336_vm1 = vweird.f32 %v4389_v7 }
 0x8e1   : > { %v3384_v63 = vmul.f32 %v3383_v27, %v3359_v19  ;;  %vm3337_vm3 = vmor %vm3335_vm2, %vm3336_vm1 }
 0x8e2   : > { %v3332_v50 = vsub.f32 1.0, %v3331_v34 }
 0x8e3   : > { %v3960_v57 = vclamps-f32 %v3384_v63, 1.0 }
 0x8e4   : > { %v3333_v51 = vmul.f32 %v4389_v7, %v3332_v50 }
 0x8e5   : > { %v3404_v20 = vadd.f32 1.0, %v3960_v57 }
 0x8e6   : > { %v3334_v14 = vadd.f32 %v4389_v7, %v3333_v51 }
 0x8e7   : > { %v3422_v59 = vmul.f32 %v3404_v20, %v2648_v5 }
 0x8e8   : > { %v3338_v6 = vsel %vm3337_vm3, %v4389_v7, %v3334_v14 }
 0x8e9   : > { %v3432_v16 = vpack.c.bf16 %v3422_v59, %v3422_v59  ;;  %v3343_v55 = vsel %vm3340_vm4, %v3342_v3, %v3338_v6 }
 0x8eb   : > { %3626 = vmatmul.bf16.gmra.mxu2 %v3432_v16 }
 0x8f0   : > { %v3607_v22 = vpop.f32.mrf.mxu2  ;;  %v3574_v48 = vpop.f32.mrf.mxu1 }
 0x8f1   : > { %v3575_v2 = vadd.f32 %v6536_v56, %v3574_v48 }
 0x8f3   : > { %v3608_v44 = vadd.f32 %v3607_v22, %v3575_v2 }
 0x8f5   : > { %v3631_v40 = vadd.f32 %v3608_v44, %v5530_v23  ;;  %v3319_v23 = vmul.f32 %v3318_v61, %v6464_v8 }
 0x8f7   : > { %3640 = vst [vmem:[%s6546_s16] sm:$0xff] %v3631_v40  ;;  %v3344_v9 = vmul.f32 %v3343_v55, %v3319_v23 }
 0x8f8   : > { %v3609_v31 = vpop.f32.mrf.mxu2  ;;  %v3576_v15 = vpop.f32.mrf.mxu1 }
 0x8f9   : > { %v3577_v11 = vadd.f32 %v6536_v56, %v3576_v15  ;;  %v3959_v38 = vclamps-f32 %v3344_v9, 1.0 }
 0x8fb   : > { %v3610_v32 = vadd.f32 %v3609_v31, %v3577_v11  ;;  %v3403_v8 = vadd.f32 1.0, %v3959_v38 }
 0x8fd   : > { %v3632_v17 = vadd.f32 %v3610_v32, %v5536_v24  ;;  %v3421_v45 = vmul.f32 %v3403_v8, %v2647_v4 }
 0x8ff   : > { %3641 = vst [vmem:[%s6546_s16 + $0x8] sm:$0xff] %v3632_v17  ;;  %v3431_v12 = vpack.c.bf16 %v3421_v45, %v3421_v45 }
 0x901   : > { %3593 = vmatmul.bf16.gmra.mxu1 %v3431_v12 }
 0x904   : > { %v3579_v13 = vpop.f32.mrf.mxu1  ;;  %v3612_v10 = vpop.f32.mrf.mxu2 }
 0x905   : > { %v3580_v62 = vadd.f32 %v6536_v56, %v3579_v13 }
 0x907   : > { %v3613_v46 = vadd.f32 %v3612_v10, %v3580_v62 }
 0x909   : > { %v3633_v33 = vadd.f32 %v3613_v46, %v5541_v30 }
 0x90b   : > { %3642 = vst [vmem:[%s6546_s16 + $0x10] sm:$0xff] %v3633_v33 }
 0x90c   : > { %v3581_v28 = vpop.f32.mrf.mxu1  ;;  %v3614_v37 = vpop.f32.mrf.mxu2 }
 0x90d   : > { %v3582_v24 = vadd.f32 %v6536_v56, %v3581_v28 }
 0x90f   : > { %v3615_v42 = vadd.f32 %v3614_v37, %v3582_v24 }
 0x911   : > { %v3634_v21 = vadd.f32 %v3615_v42, %v5546_v41 }
 0x913   : > { %3643 = vst [vmem:[%s6546_s16 + $0x18] sm:$0xff] %v3634_v21 }
 0x92a   : > { %v3617_v58 = vpop.f32.mrf.mxu2 }
 0x92f   : > { %v3584_v39 = vpop.f32.mrf.mxu1 }
 0x930   : > { %v3585_v60 = vadd.f32 %v6536_v56, %v3584_v39 }
 0x932   : > { %v3618_v26 = vadd.f32 %v3617_v58, %v3585_v60  ;;  %v3619_v52 = vpop.f32.mrf.mxu2 }
 0x934   : > { %v3635_v47 = vadd.f32 %v3618_v26, %v5551_v49 }
 0x936   : > { %3644 = vst [vmem:[%s6546_s16 + $0x20] sm:$0xff] %v3635_v47 }
 0x937   : > { %v3586_v30 = vpop.f32.mrf.mxu1 }
 0x938   : > { %v3587_v1 = vadd.f32 %v6536_v56, %v3586_v30 }
 0x93a   : > { %v3620_v22 = vadd.f32 %v3619_v52, %v3587_v1 }
 0x93c   : > { %v3636_v54 = vadd.f32 %v3620_v22, %v5556_v36 }
 0x93e   : > { %3645 = vst [vmem:[%s6546_s16 + $0x28] sm:$0xff] %v3636_v54 }
 0x95b   : > { %v3622_v41 = vpop.f32.mrf.mxu2 }
 0x95c   : > { %v3589_v48 = vpop.f32.mrf.mxu1 }
 0x95d   : > { %v3590_v19 = vadd.f32 %v6536_v56, %v3589_v48 }
 0x95f   : > { %v3623_v43 = vadd.f32 %v3622_v41, %v3590_v19 }
 0x961   : > { %v3637_v2 = vadd.f32 %v3623_v43, %v5561_v29 }
 0x963   : > { %3646 = vst [vmem:[%s6546_s16 + $0x30] sm:$0xff] %v3637_v2  ;;  %v3624_v7 = vpop.f32.mrf.mxu2 }
 0x964   : > { %v3591_v49 = vpop.f32.mrf.mxu1 }
 0x965   : > { %v3592_v27 = vadd.f32 %v6536_v56, %v3591_v49 }
 0x967   : > { %v3625_v25 = vadd.f32 %v3624_v7, %v3592_v27 }
 0x969   : > { %v3638_v63 = vadd.f32 %v3625_v25, %v5576_v18 }
 0x96b   : > { %3647 = vst [vmem:[%s6546_s16 + $0x38] sm:$0xff] %v3638_v63 }
 0x96e   : > { %v3627_v34 = vpop.f32.mrf.mxu2 }
 0x976   : > { %v3629_v40 = vpop.f32.mrf.mxu2 }
 0x97e   : > { %v3594_v36 = vpop.f32.mrf.mxu1 }
 0x97f   : > { %v3595_v44 = vadd.f32 %v6536_v56, %v3594_v36 }
 0x981   : > { %v3628_v50 = vadd.f32 %v3627_v34, %v3595_v44 }
 0x983   : > { %v3639_v57 = vadd.f32 %v3628_v50, %v5587_v0 }
 0x985   : > { %3648 = vst [vmem:[%s6546_s16 + $0x40] sm:$0xff] %v3639_v57 }
 0x986   : > { %v3596_v5 = vpop.f32.mrf.mxu1 }
 0x987 PF: > { %s23_s25 = sadd.s32 1, %s4405_s25  }
 0x988   : > { %p20_p4 = scmp.ge.s32.totalorder %s23_s25, 4  }
 0x98a   :  { %22 = sbr.rel (!%p20_p4) target bundleno = 1 (0x1), region = 102 }

</bundles_post_ra>
